<compile_context>
chip_gen: v7x
topology: tpu7x:2x2x1
jax: 0.10.0
libtpu: 0.0.40
codegen_flags: <defaults>
</compile_context>

<pallas_src>
import functools

import jax
import jax.numpy as jnp
from jax.experimental import pallas as pl
from jax.experimental.pallas import tpu as pltpu

EMBED = 21     # get_embedding_size()
HIDDEN = 10    # self.hidden_size
HPAD = 128     # lane-aligned padding for one hidden/gate block (vreg lane width)


def _bilstm_fused_kernel(xin_ref, wih_ref, whh_ref, bg_ref, wout_ref, bout_ref,
                         out_ref, gin_ref, hcat_ref, *, L, B):
    """Fused bidirectional LSTM + output projection.

    xin_ref : (L*B, 2E)      row t*B+b = [one_hot(ids[b,t]) | one_hot(ids[b,L-1-t])]
    wih_ref : (2E, 8*HP)     block-diagonal packed input weights  (gate-major blocks)
    whh_ref : (2*HP, 8*HP)   block-diagonal packed recurrent weights
    bg_ref  : (1, 8*HP)      fused gate bias (bih + bhh), zero in padded lanes
    wout_ref: (2*HP, NP)     packed output projection (fwd rows 0:H, bwd rows HP:HP+H)
    bout_ref: (1, NP)        output bias (zero-padded to NP lanes)
    out_ref : (L*B, NP)      emissions, lane-padded
    gin_ref : (L*B, 8*HP)    scratch: precomputed x @ Wih + b
    hcat_ref: (L*B, 2*HP)    scratch: [h_fwd[t] | h_bwd[t]] per (t, b) row
    """
    HP = HPAD
    HP2 = 2 * HP

    whh = whh_ref[...]

    # (1) hoisted input contribution + bias: one matmul, off the serial chain.
    gin_ref[...] = (
        jnp.dot(xin_ref[...], wih_ref[...], preferred_element_type=jnp.float32)
        + bg_ref[...])

    # (2) fused forward+backward recurrence, fully unrolled (L is static & small).
    #     h/c columns: [forward dir 0:HP | backward dir HP:2HP]; init_hidden() = zeros.
    h = jnp.zeros((B, HP2), jnp.float32)
    c = jnp.zeros((B, HP2), jnp.float32)
    for s in range(L):
        gates = gin_ref[s * B:(s + 1) * B, :] + jnp.dot(
            h, whh, preferred_element_type=jnp.float32)            # (B, 8*HP)
        # gate-major, lane-aligned blocks: [i | f | g | o], each (B, 2*HP)
        i = jax.nn.sigmoid(gates[:, 0 * HP2:1 * HP2])
        f = jax.nn.sigmoid(gates[:, 1 * HP2:2 * HP2])
        g = jnp.tanh(gates[:, 2 * HP2:3 * HP2])
        o = jax.nn.sigmoid(gates[:, 3 * HP2:4 * HP2])
        c = f * c + i * g
        h = o * jnp.tanh(c)
        # forward hidden belongs to time t=s, backward hidden to time t=L-1-s
        hcat_ref[s * B:(s + 1) * B, 0:HP] = h[:, 0:HP]
        hcat_ref[(L - 1 - s) * B:(L - s) * B, HP:HP2] = h[:, HP:HP2]

    # (3) hoisted output projection: one matmul + one lane-dense store.
    out_ref[...] = (
        jnp.dot(hcat_ref[...], wout_ref[...], preferred_element_type=jnp.float32)
        + bout_ref[...])


@functools.partial(jax.jit, static_argnames=("num_labels",))
def example_model_forward(ids, params, num_labels):
    """ids: (B, L) int32.  Returns emissions of shape (L, B, num_labels) (PyTorch conv.)."""
    B, L = ids.shape
    H, E, HP = HIDDEN, EMBED, HPAD
    NP = ((num_labels + 127) // 128) * 128   # lane-pad the label dim for dense stores

    # self.embed(): one-hot scatter (B, L) -> (B, L, 21); LSTM runs sequence-major.
    x = jnp.transpose(jax.nn.one_hot(ids, E, dtype=jnp.float32), (1, 0, 2))   # (L, B, E)
    # Fused-direction input: row t*B+b = [x[t, b] | x[L-1-t, b]]   -> (L*B, 2E)
    xin = jnp.concatenate([x, x[::-1]], axis=-1).reshape(L * B, 2 * E)

    # ---- pack lane-aligned, block-diagonal weights (tiny; folded by XLA at trace) ----
    # Column block order (gate-major): [i_f, i_b, f_f, f_b, g_f, g_b, o_f, o_b],
    # each block HP=128 lanes wide with only the first H=10 columns nonzero.
    wih_bd = jnp.zeros((2 * E, 8 * HP), jnp.float32)
    whh_bd = jnp.zeros((2 * HP, 8 * HP), jnp.float32)
    b_bd = jnp.zeros((1, 8 * HP), jnp.float32)
    for g in range(4):                       # PyTorch gate order: i, f, g, o
        cf = (2 * g) * HP                    # forward-direction block for gate g
        cb = (2 * g + 1) * HP                # backward-direction block for gate g
        wih_bd = wih_bd.at[0:E, cf:cf + H].set(params["wih_f"][g * H:(g + 1) * H, :].T)
        wih_bd = wih_bd.at[E:2 * E, cb:cb + H].set(params["wih_b"][g * H:(g + 1) * H, :].T)
        whh_bd = whh_bd.at[0:H, cf:cf + H].set(params["whh_f"][g * H:(g + 1) * H, :].T)
        whh_bd = whh_bd.at[HP:HP + H, cb:cb + H].set(params["whh_b"][g * H:(g + 1) * H, :].T)
        b_bd = b_bd.at[0, cf:cf + H].set(
            params["bih_f"][g * H:(g + 1) * H] + params["bhh_f"][g * H:(g + 1) * H])
        b_bd = b_bd.at[0, cb:cb + H].set(
            params["bih_b"][g * H:(g + 1) * H] + params["bhh_b"][g * H:(g + 1) * H])

    wout_cat = jnp.zeros((2 * HP, NP), jnp.float32)
    wout_cat = wout_cat.at[0:H, 0:num_labels].set(params["w_out"][:, :H].T)
    wout_cat = wout_cat.at[HP:HP + H, 0:num_labels].set(params["w_out"][:, H:].T)
    bout_p = jnp.zeros((1, NP), jnp.float32).at[0, 0:num_labels].set(params["b_out"])

    vmem = pl.BlockSpec(memory_space=pltpu.MemorySpace.VMEM)
    out = pl.pallas_call(
        functools.partial(_bilstm_fused_kernel, L=L, B=B),
        out_shape=jax.ShapeDtypeStruct((L * B, NP), jnp.float32),
        in_specs=[vmem] * 6,
        out_specs=vmem,
        scratch_shapes=[
            pltpu.VMEM((L * B, 8 * HP), jnp.float32),   # precomputed gate inputs
            pltpu.VMEM((L * B, 2 * HP), jnp.float32),   # stacked [h_fwd | h_bwd]
        ],
    )(xin, wih_bd, whh_bd, b_bd, wout_cat, bout_p)

    return out.reshape(L, B, NP)[:, :, :num_labels]


def make_params(key, num_labels):
    """Deterministic params with PyTorch-style shapes / uniform(-1/sqrt(H), 1/sqrt(H)) init."""
    ks = jax.random.split(key, 10)
    bound = 1.0 / jnp.sqrt(jnp.float32(HIDDEN))
    u = lambda k, shape: jax.random.uniform(k, shape, jnp.float32, -bound, bound)
    return {
        # forward direction (weight_ih_l0 etc.)
        "wih_f": u(ks[0], (4 * HIDDEN, EMBED)),
        "whh_f": u(ks[1], (4 * HIDDEN, HIDDEN)),
        "bih_f": u(ks[2], (4 * HIDDEN,)),
        "bhh_f": u(ks[3], (4 * HIDDEN,)),
        # reverse direction (weight_ih_l0_reverse etc.)
        "wih_b": u(ks[4], (4 * HIDDEN, EMBED)),
        "whh_b": u(ks[5], (4 * HIDDEN, HIDDEN)),
        "bih_b": u(ks[6], (4 * HIDDEN,)),
        "bhh_b": u(ks[7], (4 * HIDDEN,)),
        # hidden_to_labels: Linear(2H, num_labels)
        "w_out": u(ks[8], (num_labels, 2 * HIDDEN)),
        "b_out": u(ks[9], (num_labels,)),
    }


def _reference_forward(ids, params, num_labels):
    """Pure-JAX reference of the same forward pass (sanity check)."""
    x = jnp.transpose(jax.nn.one_hot(ids, EMBED, dtype=jnp.float32), (1, 0, 2))  # (L,B,E)
    H = HIDDEN

    def cell(x_t, h, c, wih, whh, b):
        g = x_t @ wih.T + h @ whh.T + b
        i, f, gg, o = (jax.nn.sigmoid(g[:, :H]), jax.nn.sigmoid(g[:, H:2 * H]),
                       jnp.tanh(g[:, 2 * H:3 * H]), jax.nn.sigmoid(g[:, 3 * H:]))
        c = f * c + i * gg
        return o * jnp.tanh(c), c

    B = ids.shape[0]
    h = c = jnp.zeros((B, H), jnp.float32)
    hf = []
    for t in range(x.shape[0]):
        h, c = cell(x[t], h, c, params["wih_f"], params["whh_f"],
                    params["bih_f"] + params["bhh_f"])
        hf.append(h)
    h = c = jnp.zeros((B, H), jnp.float32)
    hb = [None] * x.shape[0]
    for t in range(x.shape[0] - 1, -1, -1):
        h, c = cell(x[t], h, c, params["wih_b"], params["whh_b"],
                    params["bih_b"] + params["bhh_b"])
        hb[t] = h
    hs = jnp.concatenate([jnp.stack(hf), jnp.stack(hb)], axis=-1)      # (L,B,2H)
    return hs @ params["w_out"].T + params["b_out"]                     # (L,B,N)


if __name__ == "__main__":
    num_labels = 5
    B, L = 2, 8                       # minibatch_size=2, sequence length=8

    key = jax.random.PRNGKey(0)
    k_ids, k_par = jax.random.split(key)
    ids = jax.random.randint(k_ids, (B, L), 0, EMBED, dtype=jnp.int32)
    params = make_params(k_par, num_labels)

    emissions = example_model_forward(ids, params, num_labels)
    emissions = jax.block_until_ready(emissions)
    assert emissions.shape == (L, B, num_labels)

    ref = _reference_forward(ids, params, num_labels)
    assert jnp.allclose(emissions, ref, atol=2e-3), "Pallas kernel mismatch vs reference"

    print("KERNEL_OK")
</pallas_src>

<mosaic_0001>
module attributes {stable_mosaic.version = 11 : i64} {
  func.func @_bilstm_fused_kernel(%arg0: memref<16x42xf32, #tpu.memory_space<vmem>>, %arg1: memref<42x1024xf32, #tpu.memory_space<vmem>>, %arg2: memref<256x1024xf32, #tpu.memory_space<vmem>>, %arg3: memref<1x1024xf32, #tpu.memory_space<vmem>>, %arg4: memref<256x128xf32, #tpu.memory_space<vmem>>, %arg5: memref<1x128xf32, #tpu.memory_space<vmem>>, %arg6: memref<16x128xf32, #tpu.memory_space<vmem>>, %arg7: memref<16x1024xf32, #tpu.memory_space<vmem>>, %arg8: memref<16x256xf32, #tpu.memory_space<vmem>>) attributes {dimension_semantics = [], scalar_prefetch = 0 : i64, scratch_operands = 2 : i64, tpu.core_type = #tpu.core_type<tc>} {
    %c0 = arith.constant 0 : index
    %c0_0 = arith.constant 0 : index
    %0 = vector.load %arg2[%c0, %c0_0] : memref<256x1024xf32, #tpu.memory_space<vmem>>, vector<256x1024xf32>
    %c0_1 = arith.constant 0 : index
    %c0_2 = arith.constant 0 : index
    %1 = vector.load %arg0[%c0_1, %c0_2] : memref<16x42xf32, #tpu.memory_space<vmem>>, vector<16x42xf32>
    %c0_3 = arith.constant 0 : index
    %c0_4 = arith.constant 0 : index
    %2 = vector.load %arg1[%c0_3, %c0_4] : memref<42x1024xf32, #tpu.memory_space<vmem>>, vector<42x1024xf32>
    %cst = arith.constant dense<0.000000e+00> : vector<16x1024xf32>
    %3 = tpu.matmul %1, %2, %cst {dimension_numbers = #tpu.dot_dimension_numbers<[1], [0], [0], [1], [0, 0, 1, 1], [], []>} : vector<16x42xf32>, vector<42x1024xf32>, vector<16x1024xf32> -> vector<16x1024xf32>
    %c0_5 = arith.constant 0 : index
    %c0_6 = arith.constant 0 : index
    %4 = vector.load %arg3[%c0_5, %c0_6] : memref<1x1024xf32, #tpu.memory_space<vmem>>, vector<1x1024xf32>
    %5 = vector.broadcast %4 : vector<1x1024xf32> to vector<16x1024xf32>
    %6 = arith.addf %3, %5 : vector<16x1024xf32>
    %c0_7 = arith.constant 0 : index
    %c0_8 = arith.constant 0 : index
    %7 = vector.load %arg7[%c0_7, %c0_8] : memref<16x1024xf32, #tpu.memory_space<vmem>>, vector<16x1024xf32>
    tpu.vector_store %arg7[%c0_7, %c0_8], %6 {strides = array<i32>} : memref<16x1024xf32, #tpu.memory_space<vmem>>, vector<16x1024xf32>,
    %cst_9 = arith.constant 0.000000e+00 : f32
    %8 = vector.broadcast %cst_9 : f32 to vector<2x256xf32>
    %cst_10 = arith.constant 0.000000e+00 : f32
    %9 = vector.broadcast %cst_10 : f32 to vector<2x256xf32>
    %c0_11 = arith.constant 0 : index
    %c0_12 = arith.constant 0 : index
    %10 = vector.load %arg7[%c0_11, %c0_12] : memref<16x1024xf32, #tpu.memory_space<vmem>>, vector<2x1024xf32>
    %cst_13 = arith.constant dense<0.000000e+00> : vector<2x1024xf32>
    %11 = tpu.matmul %8, %0, %cst_13 {dimension_numbers = #tpu.dot_dimension_numbers<[1], [0], [0], [1], [0, 0, 1, 1], [], []>} : vector<2x256xf32>, vector<256x1024xf32>, vector<2x1024xf32> -> vector<2x1024xf32>
    %12 = arith.addf %10, %11 : vector<2x1024xf32>
    %13 = vector.extract_strided_slice %12 {offsets = [0, 0], sizes = [2, 256], strides = [1, 1]} : vector<2x1024xf32> to vector<2x256xf32>
    %14 = arith.negf %13 : vector<2x256xf32>
    %15 = math.exp %14 : vector<2x256xf32>
    %cst_14 = arith.constant 1.000000e+00 : f32
    %16 = vector.broadcast %cst_14 : f32 to vector<2x256xf32>
    %17 = arith.addf %16, %15 : vector<2x256xf32>
    %18 = arith.divf %16, %17 : vector<2x256xf32>
    %19 = vector.extract_strided_slice %12 {offsets = [0, 256], sizes = [2, 256], strides = [1, 1]} : vector<2x1024xf32> to vector<2x256xf32>
    %20 = arith.negf %19 : vector<2x256xf32>
    %21 = math.exp %20 : vector<2x256xf32>
    %cst_15 = arith.constant 1.000000e+00 : f32
    %22 = vector.broadcast %cst_15 : f32 to vector<2x256xf32>
    %23 = arith.addf %22, %21 : vector<2x256xf32>
    %24 = arith.divf %22, %23 : vector<2x256xf32>
    %25 = vector.extract_strided_slice %12 {offsets = [0, 512], sizes = [2, 256], strides = [1, 1]} : vector<2x1024xf32> to vector<2x256xf32>
    %26 = math.tanh %25 : vector<2x256xf32>
    %27 = vector.extract_strided_slice %12 {offsets = [0, 768], sizes = [2, 256], strides = [1, 1]} : vector<2x1024xf32> to vector<2x256xf32>
    %28 = arith.negf %27 : vector<2x256xf32>
    %29 = math.exp %28 : vector<2x256xf32>
    %cst_16 = arith.constant 1.000000e+00 : f32
    %30 = vector.broadcast %cst_16 : f32 to vector<2x256xf32>
    %31 = arith.addf %30, %29 : vector<2x256xf32>
    %32 = arith.divf %30, %31 : vector<2x256xf32>
    %33 = arith.mulf %24, %9 : vector<2x256xf32>
    %34 = arith.mulf %18, %26 : vector<2x256xf32>
    %35 = arith.addf %33, %34 : vector<2x256xf32>
    %36 = math.tanh %35 : vector<2x256xf32>
    %37 = arith.mulf %32, %36 : vector<2x256xf32>
    %38 = vector.extract_strided_slice %37 {offsets = [0, 0], sizes = [2, 128], strides = [1, 1]} : vector<2x256xf32> to vector<2x128xf32>
    %c0_17 = arith.constant 0 : index
    %c0_18 = arith.constant 0 : index
    %39 = vector.load %arg8[%c0_17, %c0_18] : memref<16x256xf32, #tpu.memory_space<vmem>>, vector<2x128xf32>
    tpu.vector_store %arg8[%c0_17, %c0_18], %38 {strides = array<i32>} : memref<16x256xf32, #tpu.memory_space<vmem>>, vector<2x128xf32>,
    %40 = vector.extract_strided_slice %37 {offsets = [0, 128], sizes = [2, 128], strides = [1, 1]} : vector<2x256xf32> to vector<2x128xf32>
    %c14 = arith.constant 14 : index
    %c128 = arith.constant 128 : index
    %41 = vector.load %arg8[%c14, %c128] : memref<16x256xf32, #tpu.memory_space<vmem>>, vector<2x128xf32>
    tpu.vector_store %arg8[%c14, %c128], %40 {strides = array<i32>} : memref<16x256xf32, #tpu.memory_space<vmem>>, vector<2x128xf32>,
    %c2 = arith.constant 2 : index
    %c0_19 = arith.constant 0 : index
    %42 = vector.load %arg7[%c2, %c0_19] : memref<16x1024xf32, #tpu.memory_space<vmem>>, vector<2x1024xf32>
    %cst_20 = arith.constant dense<0.000000e+00> : vector<2x1024xf32>
    %43 = tpu.matmul %37, %0, %cst_20 {dimension_numbers = #tpu.dot_dimension_numbers<[1], [0], [0], [1], [0, 0, 1, 1], [], []>} : vector<2x256xf32>, vector<256x1024xf32>, vector<2x1024xf32> -> vector<2x1024xf32>
    %44 = arith.addf %42, %43 : vector<2x1024xf32>
    %45 = vector.extract_strided_slice %44 {offsets = [0, 0], sizes = [2, 256], strides = [1, 1]} : vector<2x1024xf32> to vector<2x256xf32>
    %46 = arith.negf %45 : vector<2x256xf32>
    %47 = math.exp %46 : vector<2x256xf32>
    %cst_21 = arith.constant 1.000000e+00 : f32
    %48 = vector.broadcast %cst_21 : f32 to vector<2x256xf32>
    %49 = arith.addf %48, %47 : vector<2x256xf32>
    %50 = arith.divf %48, %49 : vector<2x256xf32>
    %51 = vector.extract_strided_slice %44 {offsets = [0, 256], sizes = [2, 256], strides = [1, 1]} : vector<2x1024xf32> to vector<2x256xf32>
    %52 = arith.negf %51 : vector<2x256xf32>
    %53 = math.exp %52 : vector<2x256xf32>
    %cst_22 = arith.constant 1.000000e+00 : f32
    %54 = vector.broadcast %cst_22 : f32 to vector<2x256xf32>
    %55 = arith.addf %54, %53 : vector<2x256xf32>
    %56 = arith.divf %54, %55 : vector<2x256xf32>
    %57 = vector.extract_strided_slice %44 {offsets = [0, 512], sizes = [2, 256], strides = [1, 1]} : vector<2x1024xf32> to vector<2x256xf32>
    %58 = math.tanh %57 : vector<2x256xf32>
    %59 = vector.extract_strided_slice %44 {offsets = [0, 768], sizes = [2, 256], strides = [1, 1]} : vector<2x1024xf32> to vector<2x256xf32>
    %60 = arith.negf %59 : vector<2x256xf32>
    %61 = math.exp %60 : vector<2x256xf32>
    %cst_23 = arith.constant 1.000000e+00 : f32
    %62 = vector.broadcast %cst_23 : f32 to vector<2x256xf32>
    %63 = arith.addf %62, %61 : vector<2x256xf32>
    %64 = arith.divf %62, %63 : vector<2x256xf32>
    %65 = arith.mulf %56, %35 : vector<2x256xf32>
    %66 = arith.mulf %50, %58 : vector<2x256xf32>
    %67 = arith.addf %65, %66 : vector<2x256xf32>
    %68 = math.tanh %67 : vector<2x256xf32>
    %69 = arith.mulf %64, %68 : vector<2x256xf32>
    %70 = vector.extract_strided_slice %69 {offsets = [0, 0], sizes = [2, 128], strides = [1, 1]} : vector<2x256xf32> to vector<2x128xf32>
    %c2_24 = arith.constant 2 : index
    %c0_25 = arith.constant 0 : index
    %71 = vector.load %arg8[%c2_24, %c0_25] : memref<16x256xf32, #tpu.memory_space<vmem>>, vector<2x128xf32>
    tpu.vector_store %arg8[%c2_24, %c0_25], %70 {strides = array<i32>} : memref<16x256xf32, #tpu.memory_space<vmem>>, vector<2x128xf32>,
    %72 = vector.extract_strided_slice %69 {offsets = [0, 128], sizes = [2, 128], strides = [1, 1]} : vector<2x256xf32> to vector<2x128xf32>
    %c12 = arith.constant 12 : index
    %c128_26 = arith.constant 128 : index
    %73 = vector.load %arg8[%c12, %c128_26] : memref<16x256xf32, #tpu.memory_space<vmem>>, vector<2x128xf32>
    tpu.vector_store %arg8[%c12, %c128_26], %72 {strides = array<i32>} : memref<16x256xf32, #tpu.memory_space<vmem>>, vector<2x128xf32>,
    %c4 = arith.constant 4 : index
    %c0_27 = arith.constant 0 : index
    %74 = vector.load %arg7[%c4, %c0_27] : memref<16x1024xf32, #tpu.memory_space<vmem>>, vector<2x1024xf32>
    %cst_28 = arith.constant dense<0.000000e+00> : vector<2x1024xf32>
    %75 = tpu.matmul %69, %0, %cst_28 {dimension_numbers = #tpu.dot_dimension_numbers<[1], [0], [0], [1], [0, 0, 1, 1], [], []>} : vector<2x256xf32>, vector<256x1024xf32>, vector<2x1024xf32> -> vector<2x1024xf32>
    %76 = arith.addf %74, %75 : vector<2x1024xf32>
    %77 = vector.extract_strided_slice %76 {offsets = [0, 0], sizes = [2, 256], strides = [1, 1]} : vector<2x1024xf32> to vector<2x256xf32>
    %78 = arith.negf %77 : vector<2x256xf32>
    %79 = math.exp %78 : vector<2x256xf32>
    %cst_29 = arith.constant 1.000000e+00 : f32
    %80 = vector.broadcast %cst_29 : f32 to vector<2x256xf32>
    %81 = arith.addf %80, %79 : vector<2x256xf32>
    %82 = arith.divf %80, %81 : vector<2x256xf32>
    %83 = vector.extract_strided_slice %76 {offsets = [0, 256], sizes = [2, 256], strides = [1, 1]} : vector<2x1024xf32> to vector<2x256xf32>
    %84 = arith.negf %83 : vector<2x256xf32>
    %85 = math.exp %84 : vector<2x256xf32>
    %cst_30 = arith.constant 1.000000e+00 : f32
    %86 = vector.broadcast %cst_30 : f32 to vector<2x256xf32>
    %87 = arith.addf %86, %85 : vector<2x256xf32>
    %88 = arith.divf %86, %87 : vector<2x256xf32>
    %89 = vector.extract_strided_slice %76 {offsets = [0, 512], sizes = [2, 256], strides = [1, 1]} : vector<2x1024xf32> to vector<2x256xf32>
    %90 = math.tanh %89 : vector<2x256xf32>
    %91 = vector.extract_strided_slice %76 {offsets = [0, 768], sizes = [2, 256], strides = [1, 1]} : vector<2x1024xf32> to vector<2x256xf32>
    %92 = arith.negf %91 : vector<2x256xf32>
    %93 = math.exp %92 : vector<2x256xf32>
    %cst_31 = arith.constant 1.000000e+00 : f32
    %94 = vector.broadcast %cst_31 : f32 to vector<2x256xf32>
    %95 = arith.addf %94, %93 : vector<2x256xf32>
    %96 = arith.divf %94, %95 : vector<2x256xf32>
    %97 = arith.mulf %88, %67 : vector<2x256xf32>
    %98 = arith.mulf %82, %90 : vector<2x256xf32>
    %99 = arith.addf %97, %98 : vector<2x256xf32>
    %100 = math.tanh %99 : vector<2x256xf32>
    %101 = arith.mulf %96, %100 : vector<2x256xf32>
    %102 = vector.extract_strided_slice %101 {offsets = [0, 0], sizes = [2, 128], strides = [1, 1]} : vector<2x256xf32> to vector<2x128xf32>
    %c4_32 = arith.constant 4 : index
    %c0_33 = arith.constant 0 : index
    %103 = vector.load %arg8[%c4_32, %c0_33] : memref<16x256xf32, #tpu.memory_space<vmem>>, vector<2x128xf32>
    tpu.vector_store %arg8[%c4_32, %c0_33], %102 {strides = array<i32>} : memref<16x256xf32, #tpu.memory_space<vmem>>, vector<2x128xf32>,
    %104 = vector.extract_strided_slice %101 {offsets = [0, 128], sizes = [2, 128], strides = [1, 1]} : vector<2x256xf32> to vector<2x128xf32>
    %c10 = arith.constant 10 : index
    %c128_34 = arith.constant 128 : index
    %105 = vector.load %arg8[%c10, %c128_34] : memref<16x256xf32, #tpu.memory_space<vmem>>, vector<2x128xf32>
    tpu.vector_store %arg8[%c10, %c128_34], %104 {strides = array<i32>} : memref<16x256xf32, #tpu.memory_space<vmem>>, vector<2x128xf32>,
    %c6 = arith.constant 6 : index
    %c0_35 = arith.constant 0 : index
    %106 = vector.load %arg7[%c6, %c0_35] : memref<16x1024xf32, #tpu.memory_space<vmem>>, vector<2x1024xf32>
    %cst_36 = arith.constant dense<0.000000e+00> : vector<2x1024xf32>
    %107 = tpu.matmul %101, %0, %cst_36 {dimension_numbers = #tpu.dot_dimension_numbers<[1], [0], [0], [1], [0, 0, 1, 1], [], []>} : vector<2x256xf32>, vector<256x1024xf32>, vector<2x1024xf32> -> vector<2x1024xf32>
    %108 = arith.addf %106, %107 : vector<2x1024xf32>
    %109 = vector.extract_strided_slice %108 {offsets = [0, 0], sizes = [2, 256], strides = [1, 1]} : vector<2x1024xf32> to vector<2x256xf32>
    %110 = arith.negf %109 : vector<2x256xf32>
    %111 = math.exp %110 : vector<2x256xf32>
    %cst_37 = arith.constant 1.000000e+00 : f32
    %112 = vector.broadcast %cst_37 : f32 to vector<2x256xf32>
    %113 = arith.addf %112, %111 : vector<2x256xf32>
    %114 = arith.divf %112, %113 : vector<2x256xf32>
    %115 = vector.extract_strided_slice %108 {offsets = [0, 256], sizes = [2, 256], strides = [1, 1]} : vector<2x1024xf32> to vector<2x256xf32>
    %116 = arith.negf %115 : vector<2x256xf32>
    %117 = math.exp %116 : vector<2x256xf32>
    %cst_38 = arith.constant 1.000000e+00 : f32
    %118 = vector.broadcast %cst_38 : f32 to vector<2x256xf32>
    %119 = arith.addf %118, %117 : vector<2x256xf32>
    %120 = arith.divf %118, %119 : vector<2x256xf32>
    %121 = vector.extract_strided_slice %108 {offsets = [0, 512], sizes = [2, 256], strides = [1, 1]} : vector<2x1024xf32> to vector<2x256xf32>
    %122 = math.tanh %121 : vector<2x256xf32>
    %123 = vector.extract_strided_slice %108 {offsets = [0, 768], sizes = [2, 256], strides = [1, 1]} : vector<2x1024xf32> to vector<2x256xf32>
    %124 = arith.negf %123 : vector<2x256xf32>
    %125 = math.exp %124 : vector<2x256xf32>
    %cst_39 = arith.constant 1.000000e+00 : f32
    %126 = vector.broadcast %cst_39 : f32 to vector<2x256xf32>
    %127 = arith.addf %126, %125 : vector<2x256xf32>
    %128 = arith.divf %126, %127 : vector<2x256xf32>
    %129 = arith.mulf %120, %99 : vector<2x256xf32>
    %130 = arith.mulf %114, %122 : vector<2x256xf32>
    %131 = arith.addf %129, %130 : vector<2x256xf32>
    %132 = math.tanh %131 : vector<2x256xf32>
    %133 = arith.mulf %128, %132 : vector<2x256xf32>
    %134 = vector.extract_strided_slice %133 {offsets = [0, 0], sizes = [2, 128], strides = [1, 1]} : vector<2x256xf32> to vector<2x128xf32>
    %c6_40 = arith.constant 6 : index
    %c0_41 = arith.constant 0 : index
    %135 = vector.load %arg8[%c6_40, %c0_41] : memref<16x256xf32, #tpu.memory_space<vmem>>, vector<2x128xf32>
    tpu.vector_store %arg8[%c6_40, %c0_41], %134 {strides = array<i32>} : memref<16x256xf32, #tpu.memory_space<vmem>>, vector<2x128xf32>,
    %136 = vector.extract_strided_slice %133 {offsets = [0, 128], sizes = [2, 128], strides = [1, 1]} : vector<2x256xf32> to vector<2x128xf32>
    %c8 = arith.constant 8 : index
    %c128_42 = arith.constant 128 : index
    %137 = vector.load %arg8[%c8, %c128_42] : memref<16x256xf32, #tpu.memory_space<vmem>>, vector<2x128xf32>
    tpu.vector_store %arg8[%c8, %c128_42], %136 {strides = array<i32>} : memref<16x256xf32, #tpu.memory_space<vmem>>, vector<2x128xf32>,
    %c8_43 = arith.constant 8 : index
    %c0_44 = arith.constant 0 : index
    %138 = vector.load %arg7[%c8_43, %c0_44] : memref<16x1024xf32, #tpu.memory_space<vmem>>, vector<2x1024xf32>
    %cst_45 = arith.constant dense<0.000000e+00> : vector<2x1024xf32>
    %139 = tpu.matmul %133, %0, %cst_45 {dimension_numbers = #tpu.dot_dimension_numbers<[1], [0], [0], [1], [0, 0, 1, 1], [], []>} : vector<2x256xf32>, vector<256x1024xf32>, vector<2x1024xf32> -> vector<2x1024xf32>
    %140 = arith.addf %138, %139 : vector<2x1024xf32>
    %141 = vector.extract_strided_slice %140 {offsets = [0, 0], sizes = [2, 256], strides = [1, 1]} : vector<2x1024xf32> to vector<2x256xf32>
    %142 = arith.negf %141 : vector<2x256xf32>
    %143 = math.exp %142 : vector<2x256xf32>
    %cst_46 = arith.constant 1.000000e+00 : f32
    %144 = vector.broadcast %cst_46 : f32 to vector<2x256xf32>
    %145 = arith.addf %144, %143 : vector<2x256xf32>
    %146 = arith.divf %144, %145 : vector<2x256xf32>
    %147 = vector.extract_strided_slice %140 {offsets = [0, 256], sizes = [2, 256], strides = [1, 1]} : vector<2x1024xf32> to vector<2x256xf32>
    %148 = arith.negf %147 : vector<2x256xf32>
    %149 = math.exp %148 : vector<2x256xf32>
    %cst_47 = arith.constant 1.000000e+00 : f32
    %150 = vector.broadcast %cst_47 : f32 to vector<2x256xf32>
    %151 = arith.addf %150, %149 : vector<2x256xf32>
    %152 = arith.divf %150, %151 : vector<2x256xf32>
    %153 = vector.extract_strided_slice %140 {offsets = [0, 512], sizes = [2, 256], strides = [1, 1]} : vector<2x1024xf32> to vector<2x256xf32>
    %154 = math.tanh %153 : vector<2x256xf32>
    %155 = vector.extract_strided_slice %140 {offsets = [0, 768], sizes = [2, 256], strides = [1, 1]} : vector<2x1024xf32> to vector<2x256xf32>
    %156 = arith.negf %155 : vector<2x256xf32>
    %157 = math.exp %156 : vector<2x256xf32>
    %cst_48 = arith.constant 1.000000e+00 : f32
    %158 = vector.broadcast %cst_48 : f32 to vector<2x256xf32>
    %159 = arith.addf %158, %157 : vector<2x256xf32>
    %160 = arith.divf %158, %159 : vector<2x256xf32>
    %161 = arith.mulf %152, %131 : vector<2x256xf32>
    %162 = arith.mulf %146, %154 : vector<2x256xf32>
    %163 = arith.addf %161, %162 : vector<2x256xf32>
    %164 = math.tanh %163 : vector<2x256xf32>
    %165 = arith.mulf %160, %164 : vector<2x256xf32>
    %166 = vector.extract_strided_slice %165 {offsets = [0, 0], sizes = [2, 128], strides = [1, 1]} : vector<2x256xf32> to vector<2x128xf32>
    %c8_49 = arith.constant 8 : index
    %c0_50 = arith.constant 0 : index
    %167 = vector.load %arg8[%c8_49, %c0_50] : memref<16x256xf32, #tpu.memory_space<vmem>>, vector<2x128xf32>
    tpu.vector_store %arg8[%c8_49, %c0_50], %166 {strides = array<i32>} : memref<16x256xf32, #tpu.memory_space<vmem>>, vector<2x128xf32>,
    %168 = vector.extract_strided_slice %165 {offsets = [0, 128], sizes = [2, 128], strides = [1, 1]} : vector<2x256xf32> to vector<2x128xf32>
    %c6_51 = arith.constant 6 : index
    %c128_52 = arith.constant 128 : index
    %169 = vector.load %arg8[%c6_51, %c128_52] : memref<16x256xf32, #tpu.memory_space<vmem>>, vector<2x128xf32>
    tpu.vector_store %arg8[%c6_51, %c128_52], %168 {strides = array<i32>} : memref<16x256xf32, #tpu.memory_space<vmem>>, vector<2x128xf32>,
    %c10_53 = arith.constant 10 : index
    %c0_54 = arith.constant 0 : index
    %170 = vector.load %arg7[%c10_53, %c0_54] : memref<16x1024xf32, #tpu.memory_space<vmem>>, vector<2x1024xf32>
    %cst_55 = arith.constant dense<0.000000e+00> : vector<2x1024xf32>
    %171 = tpu.matmul %165, %0, %cst_55 {dimension_numbers = #tpu.dot_dimension_numbers<[1], [0], [0], [1], [0, 0, 1, 1], [], []>} : vector<2x256xf32>, vector<256x1024xf32>, vector<2x1024xf32> -> vector<2x1024xf32>
    %172 = arith.addf %170, %171 : vector<2x1024xf32>
    %173 = vector.extract_strided_slice %172 {offsets = [0, 0], sizes = [2, 256], strides = [1, 1]} : vector<2x1024xf32> to vector<2x256xf32>
    %174 = arith.negf %173 : vector<2x256xf32>
    %175 = math.exp %174 : vector<2x256xf32>
    %cst_56 = arith.constant 1.000000e+00 : f32
    %176 = vector.broadcast %cst_56 : f32 to vector<2x256xf32>
    %177 = arith.addf %176, %175 : vector<2x256xf32>
    %178 = arith.divf %176, %177 : vector<2x256xf32>
    %179 = vector.extract_strided_slice %172 {offsets = [0, 256], sizes = [2, 256], strides = [1, 1]} : vector<2x1024xf32> to vector<2x256xf32>
    %180 = arith.negf %179 : vector<2x256xf32>
    %181 = math.exp %180 : vector<2x256xf32>
    %cst_57 = arith.constant 1.000000e+00 : f32
    %182 = vector.broadcast %cst_57 : f32 to vector<2x256xf32>
    %183 = arith.addf %182, %181 : vector<2x256xf32>
    %184 = arith.divf %182, %183 : vector<2x256xf32>
    %185 = vector.extract_strided_slice %172 {offsets = [0, 512], sizes = [2, 256], strides = [1, 1]} : vector<2x1024xf32> to vector<2x256xf32>
    %186 = math.tanh %185 : vector<2x256xf32>
    %187 = vector.extract_strided_slice %172 {offsets = [0, 768], sizes = [2, 256], strides = [1, 1]} : vector<2x1024xf32> to vector<2x256xf32>
    %188 = arith.negf %187 : vector<2x256xf32>
    %189 = math.exp %188 : vector<2x256xf32>
    %cst_58 = arith.constant 1.000000e+00 : f32
    %190 = vector.broadcast %cst_58 : f32 to vector<2x256xf32>
    %191 = arith.addf %190, %189 : vector<2x256xf32>
    %192 = arith.divf %190, %191 : vector<2x256xf32>
    %193 = arith.mulf %184, %163 : vector<2x256xf32>
    %194 = arith.mulf %178, %186 : vector<2x256xf32>
    %195 = arith.addf %193, %194 : vector<2x256xf32>
    %196 = math.tanh %195 : vector<2x256xf32>
    %197 = arith.mulf %192, %196 : vector<2x256xf32>
    %198 = vector.extract_strided_slice %197 {offsets = [0, 0], sizes = [2, 128], strides = [1, 1]} : vector<2x256xf32> to vector<2x128xf32>
    %c10_59 = arith.constant 10 : index
    %c0_60 = arith.constant 0 : index
    %199 = vector.load %arg8[%c10_59, %c0_60] : memref<16x256xf32, #tpu.memory_space<vmem>>, vector<2x128xf32>
    tpu.vector_store %arg8[%c10_59, %c0_60], %198 {strides = array<i32>} : memref<16x256xf32, #tpu.memory_space<vmem>>, vector<2x128xf32>,
    %200 = vector.extract_strided_slice %197 {offsets = [0, 128], sizes = [2, 128], strides = [1, 1]} : vector<2x256xf32> to vector<2x128xf32>
    %c4_61 = arith.constant 4 : index
    %c128_62 = arith.constant 128 : index
    %201 = vector.load %arg8[%c4_61, %c128_62] : memref<16x256xf32, #tpu.memory_space<vmem>>, vector<2x128xf32>
    tpu.vector_store %arg8[%c4_61, %c128_62], %200 {strides = array<i32>} : memref<16x256xf32, #tpu.memory_space<vmem>>, vector<2x128xf32>,
    %c12_63 = arith.constant 12 : index
    %c0_64 = arith.constant 0 : index
    %202 = vector.load %arg7[%c12_63, %c0_64] : memref<16x1024xf32, #tpu.memory_space<vmem>>, vector<2x1024xf32>
    %cst_65 = arith.constant dense<0.000000e+00> : vector<2x1024xf32>
    %203 = tpu.matmul %197, %0, %cst_65 {dimension_numbers = #tpu.dot_dimension_numbers<[1], [0], [0], [1], [0, 0, 1, 1], [], []>} : vector<2x256xf32>, vector<256x1024xf32>, vector<2x1024xf32> -> vector<2x1024xf32>
    %204 = arith.addf %202, %203 : vector<2x1024xf32>
    %205 = vector.extract_strided_slice %204 {offsets = [0, 0], sizes = [2, 256], strides = [1, 1]} : vector<2x1024xf32> to vector<2x256xf32>
    %206 = arith.negf %205 : vector<2x256xf32>
    %207 = math.exp %206 : vector<2x256xf32>
    %cst_66 = arith.constant 1.000000e+00 : f32
    %208 = vector.broadcast %cst_66 : f32 to vector<2x256xf32>
    %209 = arith.addf %208, %207 : vector<2x256xf32>
    %210 = arith.divf %208, %209 : vector<2x256xf32>
    %211 = vector.extract_strided_slice %204 {offsets = [0, 256], sizes = [2, 256], strides = [1, 1]} : vector<2x1024xf32> to vector<2x256xf32>
    %212 = arith.negf %211 : vector<2x256xf32>
    %213 = math.exp %212 : vector<2x256xf32>
    %cst_67 = arith.constant 1.000000e+00 : f32
    %214 = vector.broadcast %cst_67 : f32 to vector<2x256xf32>
    %215 = arith.addf %214, %213 : vector<2x256xf32>
    %216 = arith.divf %214, %215 : vector<2x256xf32>
    %217 = vector.extract_strided_slice %204 {offsets = [0, 512], sizes = [2, 256], strides = [1, 1]} : vector<2x1024xf32> to vector<2x256xf32>
    %218 = math.tanh %217 : vector<2x256xf32>
    %219 = vector.extract_strided_slice %204 {offsets = [0, 768], sizes = [2, 256], strides = [1, 1]} : vector<2x1024xf32> to vector<2x256xf32>
    %220 = arith.negf %219 : vector<2x256xf32>
    %221 = math.exp %220 : vector<2x256xf32>
    %cst_68 = arith.constant 1.000000e+00 : f32
    %222 = vector.broadcast %cst_68 : f32 to vector<2x256xf32>
    %223 = arith.addf %222, %221 : vector<2x256xf32>
    %224 = arith.divf %222, %223 : vector<2x256xf32>
    %225 = arith.mulf %216, %195 : vector<2x256xf32>
    %226 = arith.mulf %210, %218 : vector<2x256xf32>
    %227 = arith.addf %225, %226 : vector<2x256xf32>
    %228 = math.tanh %227 : vector<2x256xf32>
    %229 = arith.mulf %224, %228 : vector<2x256xf32>
    %230 = vector.extract_strided_slice %229 {offsets = [0, 0], sizes = [2, 128], strides = [1, 1]} : vector<2x256xf32> to vector<2x128xf32>
    %c12_69 = arith.constant 12 : index
    %c0_70 = arith.constant 0 : index
    %231 = vector.load %arg8[%c12_69, %c0_70] : memref<16x256xf32, #tpu.memory_space<vmem>>, vector<2x128xf32>
    tpu.vector_store %arg8[%c12_69, %c0_70], %230 {strides = array<i32>} : memref<16x256xf32, #tpu.memory_space<vmem>>, vector<2x128xf32>,
    %232 = vector.extract_strided_slice %229 {offsets = [0, 128], sizes = [2, 128], strides = [1, 1]} : vector<2x256xf32> to vector<2x128xf32>
    %c2_71 = arith.constant 2 : index
    %c128_72 = arith.constant 128 : index
    %233 = vector.load %arg8[%c2_71, %c128_72] : memref<16x256xf32, #tpu.memory_space<vmem>>, vector<2x128xf32>
    tpu.vector_store %arg8[%c2_71, %c128_72], %232 {strides = array<i32>} : memref<16x256xf32, #tpu.memory_space<vmem>>, vector<2x128xf32>,
    %c14_73 = arith.constant 14 : index
    %c0_74 = arith.constant 0 : index
    %234 = vector.load %arg7[%c14_73, %c0_74] : memref<16x1024xf32, #tpu.memory_space<vmem>>, vector<2x1024xf32>
    %cst_75 = arith.constant dense<0.000000e+00> : vector<2x1024xf32>
    %235 = tpu.matmul %229, %0, %cst_75 {dimension_numbers = #tpu.dot_dimension_numbers<[1], [0], [0], [1], [0, 0, 1, 1], [], []>} : vector<2x256xf32>, vector<256x1024xf32>, vector<2x1024xf32> -> vector<2x1024xf32>
    %236 = arith.addf %234, %235 : vector<2x1024xf32>
    %237 = vector.extract_strided_slice %236 {offsets = [0, 0], sizes = [2, 256], strides = [1, 1]} : vector<2x1024xf32> to vector<2x256xf32>
    %238 = arith.negf %237 : vector<2x256xf32>
    %239 = math.exp %238 : vector<2x256xf32>
    %cst_76 = arith.constant 1.000000e+00 : f32
    %240 = vector.broadcast %cst_76 : f32 to vector<2x256xf32>
    %241 = arith.addf %240, %239 : vector<2x256xf32>
    %242 = arith.divf %240, %241 : vector<2x256xf32>
    %243 = vector.extract_strided_slice %236 {offsets = [0, 256], sizes = [2, 256], strides = [1, 1]} : vector<2x1024xf32> to vector<2x256xf32>
    %244 = arith.negf %243 : vector<2x256xf32>
    %245 = math.exp %244 : vector<2x256xf32>
    %cst_77 = arith.constant 1.000000e+00 : f32
    %246 = vector.broadcast %cst_77 : f32 to vector<2x256xf32>
    %247 = arith.addf %246, %245 : vector<2x256xf32>
    %248 = arith.divf %246, %247 : vector<2x256xf32>
    %249 = vector.extract_strided_slice %236 {offsets = [0, 512], sizes = [2, 256], strides = [1, 1]} : vector<2x1024xf32> to vector<2x256xf32>
    %250 = math.tanh %249 : vector<2x256xf32>
    %251 = vector.extract_strided_slice %236 {offsets = [0, 768], sizes = [2, 256], strides = [1, 1]} : vector<2x1024xf32> to vector<2x256xf32>
    %252 = arith.negf %251 : vector<2x256xf32>
    %253 = math.exp %252 : vector<2x256xf32>
    %cst_78 = arith.constant 1.000000e+00 : f32
    %254 = vector.broadcast %cst_78 : f32 to vector<2x256xf32>
    %255 = arith.addf %254, %253 : vector<2x256xf32>
    %256 = arith.divf %254, %255 : vector<2x256xf32>
    %257 = arith.mulf %248, %227 : vector<2x256xf32>
    %258 = arith.mulf %242, %250 : vector<2x256xf32>
    %259 = arith.addf %257, %258 : vector<2x256xf32>
    %260 = math.tanh %259 : vector<2x256xf32>
    %261 = arith.mulf %256, %260 : vector<2x256xf32>
    %262 = vector.extract_strided_slice %261 {offsets = [0, 0], sizes = [2, 128], strides = [1, 1]} : vector<2x256xf32> to vector<2x128xf32>
    %c14_79 = arith.constant 14 : index
    %c0_80 = arith.constant 0 : index
    %263 = vector.load %arg8[%c14_79, %c0_80] : memref<16x256xf32, #tpu.memory_space<vmem>>, vector<2x128xf32>
    tpu.vector_store %arg8[%c14_79, %c0_80], %262 {strides = array<i32>} : memref<16x256xf32, #tpu.memory_space<vmem>>, vector<2x128xf32>,
    %264 = vector.extract_strided_slice %261 {offsets = [0, 128], sizes = [2, 128], strides = [1, 1]} : vector<2x256xf32> to vector<2x128xf32>
    %c0_81 = arith.constant 0 : index
    %c128_82 = arith.constant 128 : index
    %265 = vector.load %arg8[%c0_81, %c128_82] : memref<16x256xf32, #tpu.memory_space<vmem>>, vector<2x128xf32>
    tpu.vector_store %arg8[%c0_81, %c128_82], %264 {strides = array<i32>} : memref<16x256xf32, #tpu.memory_space<vmem>>, vector<2x128xf32>,
    %c0_83 = arith.constant 0 : index
    %c0_84 = arith.constant 0 : index
    %266 = vector.load %arg8[%c0_83, %c0_84] : memref<16x256xf32, #tpu.memory_space<vmem>>, vector<16x256xf32>
    %c0_85 = arith.constant 0 : index
    %c0_86 = arith.constant 0 : index
    %267 = vector.load %arg4[%c0_85, %c0_86] : memref<256x128xf32, #tpu.memory_space<vmem>>, vector<256x128xf32>
    %cst_87 = arith.constant dense<0.000000e+00> : vector<16x128xf32>
    %268 = tpu.matmul %266, %267, %cst_87 {dimension_numbers = #tpu.dot_dimension_numbers<[1], [0], [0], [1], [0, 0, 1, 1], [], []>} : vector<16x256xf32>, vector<256x128xf32>, vector<16x128xf32> -> vector<16x128xf32>
    %c0_88 = arith.constant 0 : index
    %c0_89 = arith.constant 0 : index
    %269 = vector.load %arg5[%c0_88, %c0_89] : memref<1x128xf32, #tpu.memory_space<vmem>>, vector<1x128xf32>
    %270 = vector.broadcast %269 : vector<1x128xf32> to vector<16x128xf32>
    %271 = arith.addf %268, %270 : vector<16x128xf32>
    %c0_90 = arith.constant 0 : index
    %c0_91 = arith.constant 0 : index
    %272 = vector.load %arg6[%c0_90, %c0_91] : memref<16x128xf32, #tpu.memory_space<vmem>>, vector<16x128xf32>
    tpu.vector_store %arg6[%c0_90, %c0_91], %271 {strides = array<i32>} : memref<16x128xf32, #tpu.memory_space<vmem>>, vector<16x128xf32>,
    return
  }
}

</mosaic_0001>

<bundles_post_ra>
// kernel: example_model_forward.1
= control target key start
LH: loop header
LB: loop body
LE: loop exit
PB: predicated region body
PF: predicated region fallthrough
CT: control target
= control target key end

     0   :  { %v8898_v3 = vmov 0.0   ;;  %vm378_vm0 = vcmask 1041408   ;;  %vm6382_vm1 = vmmov 1   ;;  %vm371_vm3 = vcmask 343040   ;;  %s8891_s1 = inlined_call_operand.vmem [shape: f32[42,1024], index: 1, kind: input, shape index: {}]   ;;  %s8892_s2 = inlined_call_operand.vmem [shape: f32[256,1024], index: 2, kind: input, shape index: {}]   ;;  %s8893_s0 = inlined_call_operand.vmem [shape: f32[16,42], index: 0, kind: input, shape index: {}]   ;;  %s8894_s3 = inlined_call_operand.vmem [shape: f32[1,1024], index: 3, kind: input, shape index: {}]   ;;  %s8895_s4 = inlined_call_operand.vmem [shape: f32[256,128], index: 4, kind: input, shape index: {}]   ;;  %s8896_s5 = inlined_call_operand.vmem [shape: f32[1,128], index: 5, kind: input, shape index: {}]   ;;  %s8897_s6 = inlined_call_operand.vmem [shape: f32[16,128], index: 6, kind: output, shape index: {}]  }
   0x1   :  { %v282_v0 = vld [vmem:[%s8891_s1 + $0x8] sm:$0xff]  ;;  %467 = vmatprep.mubr.f32.mxu1 %v8898_v3  ;;  %621 = vmatprep.mubr.f32.mxu0 %v8898_v3  ;;  %v281_v6 = vld [vmem:[%s8891_s1] sm:$0xff]  ;;  %vm6475_vm2 = vmpackc.low %vm378_vm0, %vm6382_vm1 }
   0x2   :  { %v290_v1 = vld [vmem:[%s8891_s1 + $0x48] sm:$0xff]  ;;  %v289_v7 = vld [vmem:[%s8891_s1 + $0x40] sm:$0xff]  ;;  %v284_v37 = vld [vmem:[%s8891_s1 + $0x18] sm:$0xff] }
   0x3   :  { %v286_v2 = vld [vmem:[%s8891_s1 + $0x28] sm:$0xff]  ;;  %v3987_v4 = vpack.c.bf16 %v290_v1, %v282_v0  ;;  %v3989_v9 = vpack.c.bf16 %v289_v7, %v281_v6  ;;  %v285_v10 = vld [vmem:[%s8891_s1 + $0x20] sm:$0xff]  ;;  %v292_v39 = vld [vmem:[%s8891_s1 + $0x58] sm:$0xff] }
   0x4   :  { %v294_v5 = vld [vmem:[%s8891_s1 + $0x68] sm:$0xff]  ;;  %v293_v11 = vld [vmem:[%s8891_s1 + $0x60] sm:$0xff]  ;;  %v4001_v42 = vpack.c.bf16 %v292_v39, %v284_v37  ;;  %v283_v44 = vld [vmem:[%s8891_s1 + $0x10] sm:$0xff] }
   0x5   :  { %v4015_v8 = vpack.c.bf16 %v294_v5, %v286_v2  ;;  %v298_v12 = vld [vmem:[%s8891_s1 + $0x88] sm:$0xff]  ;;  %3988 = vmatprep.subr.bf16.mxu1 %v3987_v4  ;;  %v4017_v13 = vpack.c.bf16 %v293_v11, %v285_v10  ;;  %v297_v19 = vld [vmem:[%s8891_s1 + $0x80] sm:$0xff]  ;;  %v291_v45 = vld [vmem:[%s8891_s1 + $0x50] sm:$0xff] }
   0x6   :  { %v306_v14 = vld [vmem:[%s8891_s1 + $0xc8] sm:$0xff]  ;;  %3990 = vmatpush1.bf16.msra.mxu1 %v3989_v9  ;;  %v305_v20 = vld [vmem:[%s8891_s1 + $0xc0] sm:$0xff]  ;;  %v300_v48 = vld [vmem:[%s8891_s1 + $0x98] sm:$0xff]  ;;  %v4003_v51 = vpack.c.bf16 %v291_v45, %v283_v44 }
   0x7   :  { %v302_v15 = vld [vmem:[%s8891_s1 + $0xa8] sm:$0xff]  ;;  %4016 = vmatprep.subr.bf16.mxu0 %v4015_v8  ;;  %v3991_v17 = vpack.c.bf16 %v306_v14, %v298_v12  ;;  %v301_v21 = vld [vmem:[%s8891_s1 + $0xa0] sm:$0xff]  ;;  %v3993_v22 = vpack.c.bf16 %v305_v20, %v297_v19  ;;  %v308_v49 = vld [vmem:[%s8891_s1 + $0xd8] sm:$0xff] }
   0x8   :  { %v310_v16 = vld [vmem:[%s8891_s1 + $0xe8] sm:$0xff]  ;;  %4018 = vmatpush1.bf16.msra.mxu0 %v4017_v13  ;;  %v309_v23 = vld [vmem:[%s8891_s1 + $0xe0] sm:$0xff]  ;;  %v4005_v55 = vpack.c.bf16 %v308_v49, %v300_v48  ;;  %v299_v56 = vld [vmem:[%s8891_s1 + $0x90] sm:$0xff] }
   0x9   :  { %v4019_v18 = vpack.c.bf16 %v310_v16, %v302_v15  ;;  %v314_v24 = vld [vmem:[%s8891_s1 + $0x108] sm:$0xff]  ;;  %3992 = vmatprep.subr.bf16.mxu1 %v3991_v17  ;;  %v4021_v26 = vpack.c.bf16 %v309_v23, %v301_v21  ;;  %v313_v32 = vld [vmem:[%s8891_s1 + $0x100] sm:$0xff]  ;;  %v307_v57 = vld [vmem:[%s8891_s1 + $0xd0] sm:$0xff] }
   0xa   :  { %v322_v25 = vld [vmem:[%s8891_s1 + $0x148] sm:$0x3]  ;;  %v321_v33 = vld [vmem:[%s8891_s1 + $0x140] sm:$0x3]  ;;  %3994 = vmatpush1.bf16.msra.mxu1 %v3993_v22  ;;  %v316_v61 = vld [vmem:[%s8891_s1 + $0x118] sm:$0xff]  ;;  %v4007_v1 = vpack.c.bf16 %v307_v57, %v299_v56 }
   0xb   :  { %4020 = vmatprep.subr.bf16.mxu0 %v4019_v18  ;;  %v3995_v27 = vpack.c.bf16 %v322_v25, %v314_v24  ;;  %v318_v29 = vld [vmem:[%s8891_s1 + $0x128] sm:$0xff]  ;;  %v317_v34 = vld [vmem:[%s8891_s1 + $0x120] sm:$0xff]  ;;  %v3998_v35 = vpack.c.bf16 %v321_v33, %v313_v32  ;;  %v324_v62 = vld [vmem:[%s8891_s1 + $0x158] sm:$0x3] }
   0xc   :  { %v326_v30 = vld [vmem:[%s8891_s1 + $0x168] sm:$0x3]  ;;  %v325_v36 = vld [vmem:[%s8891_s1 + $0x160] sm:$0x3]  ;;  %4022 = vmatpush1.bf16.msra.mxu0 %v4021_v26  ;;  %v4009_v5 = vpack.c.bf16 %v324_v62, %v316_v61  ;;  %v315_v6 = vld [vmem:[%s8891_s1 + $0x110] sm:$0xff] }
   0xd   :  { %v4023_v31 = vpack.c.bf16 %v326_v30, %v318_v29  ;;  %3997 = vmatprep.subr.msk.bf16.mxu1 %vm6475_vm2, %v3995_v27  ;;  %v4026_v38 = vpack.c.bf16 %v325_v36, %v317_v34  ;;  %v24_v40 = vld [vmem:[%s8892_s2 + $0x8] sm:$0xff]  ;;  %v23_v46 = vld [vmem:[%s8892_s2] sm:$0xff]  ;;  %v323_v7 = vld [vmem:[%s8891_s1 + $0x150] sm:$0x3] }
   0xe   :  { %v32_v41 = vld [vmem:[%s8892_s2 + $0x48] sm:$0xff]  ;;  %v31_v47 = vld [vmem:[%s8892_s2 + $0x40] sm:$0xff]  ;;  %4000 = vmatpush1.bf16.msk.msra.mxu1 %vm6475_vm2, %v3998_v35  ;;  %v288_v11 = vld [vmem:[%s8891_s1 + $0x38] sm:$0xff]  ;;  %v4012_v15 = vpack.c.bf16 %v323_v7, %v315_v6 }
   0xf   :  { %4025 = vmatprep.subr.msk.bf16.mxu0 %vm6475_vm2, %v4023_v31  ;;  %v6513_v43 = vpack.c.bf16 %v32_v41, %v24_v40  ;;  %v6538_v50 = vld [vmem:[%s8893_s0] sm:$0xff]  ;;  %v40_v52 = vld [vmem:[%s8892_s2 + $0x88] sm:$0xff]  ;;  %4002 = vmatprep.subr.bf16.mxu1 %v4001_v42  ;;  %v6548_v54 = vpack.c.bf16 %v31_v47, %v23_v46  ;;  %v296_v12 = vld [vmem:[%s8891_s1 + $0x78] sm:$0xff] }
  0x10   :  { %v48_v53 = vld [vmem:[%s8892_s2 + $0xc8] sm:$0xff]  ;;  %4028 = vmatpush1.bf16.msk.msra.mxu0 %vm6475_vm2, %v4026_v38  ;;  %v39_v58 = vld [vmem:[%s8892_s2 + $0x80] sm:$0xff]  ;;  %v4029_v17 = vpack.c.bf16 %v296_v12, %v288_v11  ;;  %v287_v18 = vld [vmem:[%s8891_s1 + $0x30] sm:$0xff] }
  0x11   :  { %9180 = vst [vmem:[#allocation4_spill] sm:$0xff] %v6513_v43  ;;  %9181 = vst [vmem:[#allocation5_spill] sm:$0xff] %v6548_v54  ;;  %4044 = vmatprep.subr.bf16.mxu0 %v6513_v43  ;;  %v6560_v59 = vpack.c.bf16 %v48_v53, %v40_v52  ;;  %v47_v60 = vld [vmem:[%s8892_s2 + $0xc0] sm:$0xff]  ;;  %3886 = vmatmul.mubr.msk.f32.vlgmr.msra.gmra.mrb[0].mxu1 %vm371_vm3, %v6538_v50  ;;  %v56_v63 = vld [vmem:[%s8892_s2 + $0x108] sm:$0xff] }
  0x12   :  { %v64_v0 = vld [vmem:[%s8892_s2 + $0x148] sm:$0xff]  ;;  %4004 = vmatpush1.bf16.msra.mxu1 %v4003_v51  ;;  %v6587_v4 = vpack.c.bf16 %v47_v60, %v39_v58  ;;  %v55_v8 = vld [vmem:[%s8892_s2 + $0x100] sm:$0xff]  ;;  %473 = vmatprep.mubr.f32.mxu1 %v8898_v3  ;;  %v295_v19 = vld [vmem:[%s8891_s1 + $0x70] sm:$0xff] }
  0x13   :  { %9182 = vst [vmem:[#allocation6_spill] sm:$0xff] %v6560_v59  ;;  %3894 = vmatmul.mubr.msk.f32.vlgmr.msra.gmra.mrb[0].mxu0 %vm371_vm3, %v6538_v50  ;;  %v6584_v2 = vld [vmem:[%s8893_s0 + $0x8] sm:$0xff]  ;;  %4006 = vmatprep.subr.bf16.mxu1 %v4005_v55  ;;  %v6600_v9 = vpack.c.bf16 %v64_v0, %v56_v63  ;;  %v63_v10 = vld [vmem:[%s8892_s2 + $0x140] sm:$0xff]  ;;  %v304_v23 = vld [vmem:[%s8891_s1 + $0xb8] sm:$0xff]  ;;  %v4031_v27 = vpack.c.bf16 %v295_v19, %v287_v18 }
  0x14   :  { %4046 = vmatpush1.bf16.msra.mxu0 %v6548_v54  ;;  %9183 = vst [vmem:[#allocation7_spill] sm:$0xff] %v6587_v4  ;;  %v72_v13 = vld [vmem:[%s8892_s2 + $0x188] sm:$0xff]  ;;  %627 = vmatprep.mubr.f32.mxu0 %v8898_v3  ;;  %v6624_v16 = vpack.c.bf16 %v63_v10, %v55_v8  ;;  %v71_v20 = vld [vmem:[%s8892_s2 + $0x180] sm:$0xff]  ;;  %v312_v24 = vld [vmem:[%s8891_s1 + $0xf8] sm:$0xff] }
  0x15   :  { %4048 = vmatprep.subr.bf16.mxu0 %v6560_v59  ;;  %9184 = vst [vmem:[#allocation8_spill] sm:$0xff] %v6600_v9  ;;  %3887 = vmatmul.mubr.msk.f32.gmra.mrb[2].mxu1 %vm371_vm3, %v6584_v2  ;;  %v80_v14 = vld [vmem:[%s8892_s2 + $0x1c8] sm:$0xff]  ;;  %v79_v22 = vld [vmem:[%s8892_s2 + $0x1c0] sm:$0xff]  ;;  %v4033_v30 = vpack.c.bf16 %v312_v24, %v304_v23  ;;  %v303_v31 = vld [vmem:[%s8891_s1 + $0xb0] sm:$0xff] }
  0x16   :  { %4008 = vmatpush1.bf16.msra.mxu1 %v4007_v1  ;;  %544 = vmatprep.mubr.f32.mxu1 %v8898_v3  ;;  %9185 = vst [vmem:[#allocation9_spill] sm:$0xff] %v6624_v16  ;;  %v6636_v21 = vpack.c.bf16 %v80_v14, %v72_v13  ;;  %v88_v25 = vld [vmem:[%s8892_s2 + $0x208] sm:$0xff]  ;;  %v6659_v29 = vpack.c.bf16 %v79_v22, %v71_v20  ;;  %v311_v32 = vld [vmem:[%s8891_s1 + $0xf0] sm:$0xff]  ;;  %v87_v33 = vld [vmem:[%s8892_s2 + $0x200] sm:$0xff] }
  0x17   :  { %4011 = vmatprep.subr.msk.bf16.mxu1 %vm6475_vm2, %v4009_v5  ;;  %3895 = vmatmul.mubr.msk.f32.gmra.mrb[2].mxu0 %vm371_vm3, %v6584_v2  ;;  %v96_v26 = vld [vmem:[%s8892_s2 + $0x248] sm:$0xff]  ;;  %v95_v35 = vld [vmem:[%s8892_s2 + $0x240] sm:$0xff]  ;;  %v320_v36 = vld [vmem:[%s8891_s1 + $0x138] sm:$0xff]  ;;  %v4035_v40 = vpack.c.bf16 %v311_v32, %v303_v31 }
  0x18   :  { %4050 = vmatpush1.bf16.msra.mxu0 %v6587_v4  ;;  %9186 = vst [vmem:[#allocation10_spill] sm:$0xff] %v6636_v21  ;;  %799 = vmatprep.mubr.f32.mxu0 %v8898_v3  ;;  %9187 = vst [vmem:[#allocation11_spill] sm:$0xff] %v6659_v29  ;;  %v6671_v34 = vpack.c.bf16 %v96_v26, %v88_v25  ;;  %v328_v37 = vld [vmem:[%s8891_s1 + $0x178] sm:$0x3]  ;;  %v104_v38 = vld [vmem:[%s8892_s2 + $0x288] sm:$0xff]  ;;  %v6692_v41 = vpack.c.bf16 %v95_v35, %v87_v33 }
  0x19   :  { %4052 = vmatprep.subr.bf16.mxu0 %v6600_v9  ;;  %v112_v39 = vld [vmem:[%s8892_s2 + $0x2c8] sm:$0xff]  ;;  %v4037_v42 = vpack.c.bf16 %v328_v37, %v320_v36  ;;  %v319_v44 = vld [vmem:[%s8891_s1 + $0x130] sm:$0xff]  ;;  %v103_v46 = vld [vmem:[%s8892_s2 + $0x280] sm:$0xff] }
  0x1a   :  { %4014 = vmatpush1.bf16.msk.msra.mxu1 %vm6475_vm2, %v4012_v15  ;;  %9188 = vst [vmem:[#allocation12_spill] sm:$0xff] %v6671_v34  ;;  %9189 = vst [vmem:[#allocation13_spill] sm:$0xff] %v6692_v41  ;;  %v327_v45 = vld [vmem:[%s8891_s1 + $0x170] sm:$0x3]  ;;  %v6704_v47 = vpack.c.bf16 %v112_v39, %v104_v38  ;;  %v111_v48 = vld [vmem:[%s8892_s2 + $0x2c0] sm:$0xff] }
  0x1b   :  { %4030 = vmatprep.subr.bf16.mxu1 %v4029_v17  ;;  %v26_v49 = vld [vmem:[%s8892_s2 + $0x18] sm:$0xff]  ;;  %v120_v52 = vld [vmem:[%s8892_s2 + $0x308] sm:$0xff]  ;;  %v4040_v55 = vpack.c.bf16 %v327_v45, %v319_v44  ;;  %v6727_v56 = vpack.c.bf16 %v111_v48, %v103_v46  ;;  %v119_v58 = vld [vmem:[%s8892_s2 + $0x300] sm:$0xff] }
  0x1c   :  { %4054 = vmatpush1.bf16.msra.mxu0 %v6624_v16  ;;  %9190 = vst [vmem:[#allocation14_spill] sm:$0xff] %v6704_v47  ;;  %v34_v51 = vld [vmem:[%s8892_s2 + $0x58] sm:$0xff]  ;;  %v128_v53 = vld [vmem:[%s8892_s2 + $0x348] sm:$0xff]  ;;  %v25_v60 = vld [vmem:[%s8892_s2 + $0x10] sm:$0xff] }
  0x1d   :  { %4056 = vmatprep.subr.bf16.mxu0 %v6636_v21  ;;  %3890 = vmatmul.mubr.msk.f32.vlgmr.msra.gmra.mrb[4].mxu1 %vm371_vm3, %v6538_v50  ;;  %9191 = vst [vmem:[#allocation15_spill] sm:$0xff] %v6727_v56  ;;  %v6729_v57 = vpack.c.bf16 %v34_v51, %v26_v49  ;;  %v33_v61 = vld [vmem:[%s8892_s2 + $0x50] sm:$0xff]  ;;  %v6741_v62 = vpack.c.bf16 %v128_v53, %v120_v52  ;;  %v127_v63 = vld [vmem:[%s8892_s2 + $0x340] sm:$0xff]  ;;  %v42_v0 = vld [vmem:[%s8892_s2 + $0x98] sm:$0xff] }
  0x1e   :  { %4032 = vmatpush1.bf16.msra.mxu1 %v4031_v27  ;;  %550 = vmatprep.mubr.f32.mxu1 %v8898_v3  ;;  %v50_v1 = vld [vmem:[%s8892_s2 + $0xd8] sm:$0xff]  ;;  %v136_v5 = vld [vmem:[%s8892_s2 + $0x388] sm:$0xff]  ;;  %v6760_v7 = vpack.c.bf16 %v33_v61, %v25_v60  ;;  %v6764_v8 = vpack.c.bf16 %v127_v63, %v119_v58  ;;  %v135_v11 = vld [vmem:[%s8892_s2 + $0x380] sm:$0xff] }
  0x1f   :  { %4034 = vmatprep.subr.bf16.mxu1 %v4033_v30  ;;  %9192 = vst [vmem:[#allocation16_spill] sm:$0xff] %v6729_v57  ;;  %9193 = vst [vmem:[#allocation17_spill] sm:$0xff] %v6741_v62  ;;  %v144_v6 = vld [vmem:[%s8892_s2 + $0x3c8] sm:$0xff]  ;;  %v6766_v10 = vpack.c.bf16 %v50_v1, %v42_v0  ;;  %v41_v12 = vld [vmem:[%s8892_s2 + $0x90] sm:$0xff] }
  0x20   :  { %4058 = vmatpush1.bf16.msra.mxu0 %v6659_v29  ;;  %9194 = vst [vmem:[#allocation18_spill] sm:$0xff] %v6760_v7  ;;  %9195 = vst [vmem:[#allocation19_spill] sm:$0xff] %v6764_v8  ;;  %v49_v28 = vld [vmem:[%s8892_s2 + $0xd0] sm:$0xff]  ;;  %v6778_v13 = vpack.c.bf16 %v144_v6, %v136_v5  ;;  %v143_v14 = vld [vmem:[%s8892_s2 + $0x3c0] sm:$0xff] }
  0x21   :  { %4060 = vmatprep.subr.bf16.mxu0 %v6671_v34  ;;  %3891 = vmatmul.mubr.msk.f32.gmra.mrb[6].mxu1 %vm371_vm3, %v6584_v2  ;;  %9196 = vst [vmem:[#allocation20_spill] sm:$0xff] %v6766_v10  ;;  %v58_v15 = vld [vmem:[%s8892_s2 + $0x118] sm:$0xff]  ;;  %v152_v18 = vld [vmem:[%s8892_s2 + $0x408] sm:$0xff]  ;;  %v6798_v20 = vpack.c.bf16 %v49_v28, %v41_v12  ;;  %v6803_v22 = vpack.c.bf16 %v143_v14, %v135_v11  ;;  %v151_v23 = vld [vmem:[%s8892_s2 + $0x400] sm:$0xff] }
  0x22   :  { %4036 = vmatpush1.bf16.msra.mxu1 %v4035_v40  ;;  %698 = vmatprep.mubr.f32.mxu1 %v8898_v3  ;;  %9197 = vst [vmem:[#allocation21_spill] sm:$0xff] %v6778_v13  ;;  %v66_v17 = vld [vmem:[%s8892_s2 + $0x158] sm:$0xff]  ;;  %v160_v19 = vld [vmem:[%s8892_s2 + $0x448] sm:$0xff]  ;;  %v57_v24 = vld [vmem:[%s8892_s2 + $0x110] sm:$0xff] }
  0x23   :  { %4039 = vmatprep.subr.msk.bf16.mxu1 %vm6475_vm2, %v4037_v42  ;;  %9198 = vst [vmem:[#allocation22_spill] sm:$0xff] %v6798_v20  ;;  %9199 = vst [vmem:[#allocation23_spill] sm:$0xff] %v6803_v22  ;;  %v65_v25 = vld [vmem:[%s8892_s2 + $0x150] sm:$0xff]  ;;  %v6817_v26 = vpack.c.bf16 %v160_v19, %v152_v18  ;;  %v159_v27 = vld [vmem:[%s8892_s2 + $0x440] sm:$0xff] }
  0x24   :  { %4062 = vmatpush1.bf16.msra.mxu0 %v6692_v41  ;;  %v74_v30 = vld [vmem:[%s8892_s2 + $0x198] sm:$0xff]  ;;  %v168_v32 = vld [vmem:[%s8892_s2 + $0x488] sm:$0xff]  ;;  %v6837_v35 = vpack.c.bf16 %v65_v25, %v57_v24  ;;  %v6842_v36 = vpack.c.bf16 %v159_v27, %v151_v23  ;;  %v167_v38 = vld [vmem:[%s8892_s2 + $0x480] sm:$0xff] }
  0x25   :  { %4064 = vmatprep.subr.bf16.mxu0 %v6704_v47  ;;  %9201 = vst [vmem:[#allocation25_spill] sm:$0xff] %v6817_v26  ;;  %v82_v31 = vld [vmem:[%s8892_s2 + $0x1d8] sm:$0xff]  ;;  %v176_v33 = vld [vmem:[%s8892_s2 + $0x4c8] sm:$0xff]  ;;  %v81_v39 = vld [vmem:[%s8892_s2 + $0x1d0] sm:$0xff] }
  0x26   :  { %4042 = vmatpush1.bf16.msk.msra.mxu1 %vm6475_vm2, %v4040_v55  ;;  %9202 = vst [vmem:[#allocation26_spill] sm:$0xff] %v6837_v35  ;;  %9203 = vst [vmem:[#allocation27_spill] sm:$0xff] %v6842_v36  ;;  %v6844_v37 = vpack.c.bf16 %v82_v31, %v74_v30  ;;  %v6856_v40 = vpack.c.bf16 %v176_v33, %v168_v32  ;;  %v175_v42 = vld [vmem:[%s8892_s2 + $0x4c0] sm:$0xff]  ;;  %v90_v44 = vld [vmem:[%s8892_s2 + $0x218] sm:$0xff] }
  0x27   :  { %4108 = vmatprep.subr.bf16.mxu1 %v6729_v57  ;;  %v98_v45 = vld [vmem:[%s8892_s2 + $0x258] sm:$0xff]  ;;  %v184_v46 = vld [vmem:[%s8892_s2 + $0x508] sm:$0xff]  ;;  %v6878_v51 = vpack.c.bf16 %v175_v42, %v167_v38  ;;  %v183_v53 = vld [vmem:[%s8892_s2 + $0x500] sm:$0xff] }
  0x28   :  { %4066 = vmatpush1.bf16.msra.mxu0 %v6727_v56  ;;  %9204 = vst [vmem:[#allocation28_spill] sm:$0xff] %v6844_v37  ;;  %9205 = vst [vmem:[#allocation29_spill] sm:$0xff] %v6856_v40  ;;  %v192_v48 = vld [vmem:[%s8892_s2 + $0x548] sm:$0xff]  ;;  %v6880_v52 = vpack.c.bf16 %v98_v45, %v90_v44  ;;  %v89_v55 = vld [vmem:[%s8892_s2 + $0x210] sm:$0xff] }
  0x29   :  { %4068 = vmatprep.subr.bf16.mxu0 %v6741_v62  ;;  %3898 = vmatmul.mubr.msk.f32.vlgmr.msra.gmra.mrb[8].mxu1 %vm371_vm3, %v6538_v50  ;;  %v6805_v50 = vpack.c.bf16 %v66_v17, %v58_v15  ;;  %9207 = vst [vmem:[#allocation31_spill] sm:$0xff] %v6878_v51  ;;  %v97_v58 = vld [vmem:[%s8892_s2 + $0x250] sm:$0xff]  ;;  %v6892_v60 = vpack.c.bf16 %v192_v48, %v184_v46  ;;  %v191_v61 = vld [vmem:[%s8892_s2 + $0x540] sm:$0xff]  ;;  %v106_v63 = vld [vmem:[%s8892_s2 + $0x298] sm:$0xff] }
  0x2a   :  { %4110 = vmatpush1.bf16.msra.mxu1 %v6760_v7  ;;  %704 = vmatprep.mubr.f32.mxu1 %v8898_v3  ;;  %9208 = vst [vmem:[#allocation32_spill] sm:$0xff] %v6880_v52  ;;  %v114_v0 = vld [vmem:[%s8892_s2 + $0x2d8] sm:$0xff]  ;;  %v200_v1 = vld [vmem:[%s8892_s2 + $0x588] sm:$0xff]  ;;  %v6910_v6 = vpack.c.bf16 %v97_v58, %v89_v55  ;;  %v6914_v11 = vpack.c.bf16 %v191_v61, %v183_v53  ;;  %v199_v28 = vld [vmem:[%s8892_s2 + $0x580] sm:$0xff] }
  0x2b   :  { %4112 = vmatprep.subr.bf16.mxu1 %v6766_v10  ;;  %9200 = vst [vmem:[#allocation24_spill] sm:$0xff] %v6805_v50  ;;  %9209 = vst [vmem:[#allocation33_spill] sm:$0xff] %v6892_v60  ;;  %v208_v5 = vld [vmem:[%s8892_s2 + $0x5c8] sm:$0xff]  ;;  %v6916_v12 = vpack.c.bf16 %v114_v0, %v106_v63  ;;  %v105_v14 = vld [vmem:[%s8892_s2 + $0x290] sm:$0xff] }
  0x2c   :  { %4070 = vmatpush1.bf16.msra.mxu0 %v6764_v8  ;;  %9210 = vst [vmem:[#allocation34_spill] sm:$0xff] %v6910_v6  ;;  %9211 = vst [vmem:[#allocation35_spill] sm:$0xff] %v6914_v11  ;;  %v113_v15 = vld [vmem:[%s8892_s2 + $0x2d0] sm:$0xff]  ;;  %v6928_v17 = vpack.c.bf16 %v208_v5, %v200_v1  ;;  %v207_v18 = vld [vmem:[%s8892_s2 + $0x5c0] sm:$0xff] }
  0x2d   :  { %4072 = vmatprep.subr.bf16.mxu0 %v6778_v13  ;;  %3899 = vmatmul.mubr.msk.f32.gmra.mrb[10].mxu1 %vm371_vm3, %v6584_v2  ;;  %v73_v2 = vld [vmem:[%s8892_s2 + $0x190] sm:$0xff]  ;;  %9212 = vst [vmem:[#allocation36_spill] sm:$0xff] %v6916_v12  ;;  %v122_v19 = vld [vmem:[%s8892_s2 + $0x318] sm:$0xff]  ;;  %v216_v24 = vld [vmem:[%s8892_s2 + $0x608] sm:$0xff]  ;;  %v6946_v27 = vpack.c.bf16 %v113_v15, %v105_v14  ;;  %v6950_v30 = vpack.c.bf16 %v207_v18, %v199_v28 }
  0x2e   :  { %4114 = vmatpush1.bf16.msra.mxu1 %v6798_v20  ;;  %870 = vmatprep.mubr.f32.mxu1 %v8898_v3  ;;  %v6874_v49 = vpack.c.bf16 %v81_v39, %v73_v2  ;;  %9213 = vst [vmem:[#allocation37_spill] sm:$0xff] %v6928_v17  ;;  %v130_v23 = vld [vmem:[%s8892_s2 + $0x358] sm:$0xff]  ;;  %v224_v25 = vld [vmem:[%s8892_s2 + $0x648] sm:$0xff]  ;;  %v215_v32 = vld [vmem:[%s8892_s2 + $0x600] sm:$0xff] }
  0x2f   :  { %4116 = vmatprep.subr.bf16.mxu1 %v6805_v50  ;;  %9214 = vst [vmem:[#allocation38_spill] sm:$0xff] %v6946_v27  ;;  %9215 = vst [vmem:[#allocation39_spill] sm:$0xff] %v6950_v30  ;;  %v6952_v31 = vpack.c.bf16 %v130_v23, %v122_v19  ;;  %v121_v33 = vld [vmem:[%s8892_s2 + $0x310] sm:$0xff]  ;;  %v6964_v2 = vpack.c.bf16 %v224_v25, %v216_v24  ;;  %v223_v39 = vld [vmem:[%s8892_s2 + $0x640] sm:$0xff] }
  0x30   :  { %4074 = vmatpush1.bf16.msra.mxu0 %v6803_v22  ;;  %9206 = vst [vmem:[#allocation30_spill] sm:$0xff] %v6874_v49  ;;  %v129_v38 = vld [vmem:[%s8892_s2 + $0x350] sm:$0xff]  ;;  %v138_v42 = vld [vmem:[%s8892_s2 + $0x398] sm:$0xff]  ;;  %v232_v45 = vld [vmem:[%s8892_s2 + $0x688] sm:$0xff]  ;;  %v6986_v53 = vpack.c.bf16 %v223_v39, %v215_v32 }
  0x31   :  { %4076 = vmatprep.subr.bf16.mxu0 %v6817_v26  ;;  %9216 = vst [vmem:[#allocation40_spill] sm:$0xff] %v6952_v31  ;;  %9217 = vst [vmem:[#allocation41_spill] sm:$0xff] %v6964_v2  ;;  %v146_v44 = vld [vmem:[%s8892_s2 + $0x3d8] sm:$0xff]  ;;  %v240_v46 = vld [vmem:[%s8892_s2 + $0x6c8] sm:$0xff]  ;;  %v6982_v48 = vpack.c.bf16 %v129_v38, %v121_v33 }
  0x32   :  { %4118 = vmatpush1.bf16.msra.mxu1 %v6837_v35  ;;  %9219 = vst [vmem:[#allocation43_spill] sm:$0xff] %v6986_v53  ;;  %v6988_v55 = vpack.c.bf16 %v146_v44, %v138_v42  ;;  %v231_v58 = vld [vmem:[%s8892_s2 + $0x680] sm:$0xff]  ;;  %v137_v61 = vld [vmem:[%s8892_s2 + $0x390] sm:$0xff]  ;;  %v7000_v0 = vpack.c.bf16 %v240_v46, %v232_v45  ;;  %v154_v5 = vld [vmem:[%s8892_s2 + $0x418] sm:$0xff] }
  0x33   :  { %4120 = vmatprep.subr.bf16.mxu1 %v6844_v37  ;;  %9218 = vst [vmem:[#allocation42_spill] sm:$0xff] %v6982_v48  ;;  %v145_v63 = vld [vmem:[%s8892_s2 + $0x3d0] sm:$0xff]  ;;  %v239_v1 = vld [vmem:[%s8892_s2 + $0x6c0] sm:$0xff]  ;;  %v162_v28 = vld [vmem:[%s8892_s2 + $0x458] sm:$0xff] }
  0x34   :  { %4078 = vmatpush1.bf16.msra.mxu0 %v6842_v36  ;;  %9220 = vst [vmem:[#allocation44_spill] sm:$0xff] %v6988_v55  ;;  %9221 = vst [vmem:[#allocation45_spill] sm:$0xff] %v7000_v0  ;;  %v248_v14 = vld [vmem:[%s8892_s2 + $0x708] sm:$0xff]  ;;  %v7018_v18 = vpack.c.bf16 %v145_v63, %v137_v61  ;;  %v7022_v19 = vpack.c.bf16 %v239_v1, %v231_v58  ;;  %v7024_v23 = vpack.c.bf16 %v162_v28, %v154_v5  ;;  %v247_v24 = vld [vmem:[%s8892_s2 + $0x700] sm:$0xff] }
  0x35   :  { %4080 = vmatprep.subr.bf16.mxu0 %v6856_v40  ;;  %v256_v15 = vld [vmem:[%s8892_s2 + $0x748] sm:$0xff]  ;;  %v153_v25 = vld [vmem:[%s8892_s2 + $0x410] sm:$0xff]  ;;  %v255_v38 = vld [vmem:[%s8892_s2 + $0x740] sm:$0xff] }
  0x36   :  { %4122 = vmatpush1.bf16.msra.mxu1 %v6874_v49  ;;  %9222 = vst [vmem:[#allocation46_spill] sm:$0xff] %v7018_v18  ;;  %9223 = vst [vmem:[#allocation47_spill] sm:$0xff] %v7022_v19  ;;  %v161_v32 = vld [vmem:[%s8892_s2 + $0x450] sm:$0xff]  ;;  %v7036_v33 = vpack.c.bf16 %v256_v15, %v248_v14  ;;  %v170_v39 = vld [vmem:[%s8892_s2 + $0x498] sm:$0xff]  ;;  %v7058_v58 = vpack.c.bf16 %v255_v38, %v247_v24 }
  0x37   :  { %4124 = vmatprep.subr.bf16.mxu1 %v6880_v52  ;;  %9224 = vst [vmem:[#allocation48_spill] sm:$0xff] %v7024_v23  ;;  %v178_v42 = vld [vmem:[%s8892_s2 + $0x4d8] sm:$0xff]  ;;  %v264_v44 = vld [vmem:[%s8892_s2 + $0x788] sm:$0xff]  ;;  %v7054_v46 = vpack.c.bf16 %v161_v32, %v153_v25  ;;  %v263_v63 = vld [vmem:[%s8892_s2 + $0x780] sm:$0xff] }
  0x38   :  { %4082 = vmatpush1.bf16.msra.mxu0 %v6878_v51  ;;  %9225 = vst [vmem:[#allocation49_spill] sm:$0xff] %v7036_v33  ;;  %v272_v45 = vld [vmem:[%s8892_s2 + $0x7c8] sm:$0xff]  ;;  %9227 = vst [vmem:[#allocation51_spill] sm:$0xff] %v7058_v58  ;;  %v7060_v61 = vpack.c.bf16 %v178_v42, %v170_v39  ;;  %v169_v1 = vld [vmem:[%s8892_s2 + $0x490] sm:$0xff] }
  0x39   :  { %4084 = vmatprep.subr.bf16.mxu0 %v6892_v60  ;;  %9226 = vst [vmem:[#allocation50_spill] sm:$0xff] %v7054_v46  ;;  %v177_v5 = vld [vmem:[%s8892_s2 + $0x4d0] sm:$0xff]  ;;  %v7072_v28 = vpack.c.bf16 %v272_v45, %v264_v44  ;;  %v271_v14 = vld [vmem:[%s8892_s2 + $0x7c0] sm:$0xff]  ;;  %v186_v15 = vld [vmem:[%s8892_s2 + $0x518] sm:$0xff] }
  0x3a   :  { %4126 = vmatpush1.bf16.msra.mxu1 %v6910_v6  ;;  %9228 = vst [vmem:[#allocation52_spill] sm:$0xff] %v7060_v61  ;;  %v194_v24 = vld [vmem:[%s8892_s2 + $0x558] sm:$0xff]  ;;  %v28_v25 = vld [vmem:[%s8892_s2 + $0x28] sm:$0xff]  ;;  %v7090_v38 = vpack.c.bf16 %v177_v5, %v169_v1  ;;  %v7094_v39 = vpack.c.bf16 %v271_v14, %v263_v63  ;;  %v185_v44 = vld [vmem:[%s8892_s2 + $0x510] sm:$0xff] }
  0x3b   :  { %4128 = vmatprep.subr.bf16.mxu1 %v6916_v12  ;;  %9229 = vst [vmem:[#allocation53_spill] sm:$0xff] %v7072_v28  ;;  %v36_v32 = vld [vmem:[%s8892_s2 + $0x68] sm:$0xff]  ;;  %v7096_v42 = vpack.c.bf16 %v194_v24, %v186_v15  ;;  %v193_v45 = vld [vmem:[%s8892_s2 + $0x550] sm:$0xff]  ;;  %v27_v1 = vld [vmem:[%s8892_s2 + $0x20] sm:$0xff] }
  0x3c   :  { %4086 = vmatpush1.bf16.msra.mxu0 %v6914_v11  ;;  %9230 = vst [vmem:[#allocation54_spill] sm:$0xff] %v7090_v38  ;;  %9231 = vst [vmem:[#allocation55_spill] sm:$0xff] %v7094_v39  ;;  %v7108_v5 = vpack.c.bf16 %v36_v32, %v28_v25  ;;  %v35_v63 = vld [vmem:[%s8892_s2 + $0x60] sm:$0xff]  ;;  %v202_v14 = vld [vmem:[%s8892_s2 + $0x598] sm:$0xff]  ;;  %v7126_v32 = vpack.c.bf16 %v193_v45, %v185_v44 }
  0x3d   :  { %4088 = vmatprep.subr.bf16.mxu0 %v6928_v17  ;;  %9232 = vst [vmem:[#allocation56_spill] sm:$0xff] %v7096_v42  ;;  %v210_v15 = vld [vmem:[%s8892_s2 + $0x5d8] sm:$0xff]  ;;  %v44_v24 = vld [vmem:[%s8892_s2 + $0xa8] sm:$0xff]  ;;  %v7130_v3 = vpack.c.bf16 %v35_v63, %v27_v1  ;;  %v43_v44 = vld [vmem:[%s8892_s2 + $0xa0] sm:$0xff] }
  0x3e   :  { %4130 = vmatpush1.bf16.msra.mxu1 %v6946_v27  ;;  %9233 = vst [vmem:[#allocation57_spill] sm:$0xff] %v7108_v5  ;;  %v52_v25 = vld [vmem:[%s8892_s2 + $0xe8] sm:$0xff]  ;;  %9234 = vst [vmem:[#allocation58_spill] sm:$0xff] %v7126_v32  ;;  %v51_v1 = vld [vmem:[%s8892_s2 + $0xe0] sm:$0xff] }
  0x3f   :  { %4132 = vmatprep.subr.bf16.mxu1 %v6952_v31  ;;  %9235 = vst [vmem:[#allocation59_spill] sm:$0xff] %v7130_v3  ;;  %v7144_v45 = vpack.c.bf16 %v52_v25, %v44_v24  ;;  %v218_v63 = vld [vmem:[%s8892_s2 + $0x618] sm:$0xff]  ;;  %v68_v24 = vld [vmem:[%s8892_s2 + $0x168] sm:$0xff]  ;;  %v9238_v25 = vmov 0.0  }
  0x40   :  { %4090 = vmatpush1.bf16.msra.mxu0 %v6950_v30 }
  0x41   :  { %4092 = vmatprep.subr.bf16.mxu0 %v6964_v2  ;;  %9237 = vst [vmem:[#allocation61_spill] sm:$0xff] %v7144_v45 }
  0x42   :  { %4134 = vmatpush1.bf16.msra.mxu1 %v6982_v48 }
  0x43   :  { %4136 = vmatprep.subr.bf16.mxu1 %v6988_v55 }
  0x44   :  { %4094 = vmatpush1.bf16.msra.mxu0 %v6986_v53 }
  0x45   :  { %4096 = vmatprep.subr.bf16.mxu0 %v7000_v0 }
  0x46   :  { %4138 = vmatpush1.bf16.msra.mxu1 %v7018_v18 }
  0x47   :  { %4140 = vmatprep.subr.bf16.mxu1 %v7024_v23 }
  0x48   :  { %4098 = vmatpush1.bf16.msra.mxu0 %v7022_v19 }
  0x49   :  { %4100 = vmatprep.subr.bf16.mxu0 %v7036_v33 }
  0x4a   :  { %4142 = vmatpush1.bf16.msra.mxu1 %v7054_v46  ;;  %v225_v46 = vld [vmem:[%s8892_s2 + $0x650] sm:$0xff] }
  0x4b   :  { %4144 = vmatprep.subr.bf16.mxu1 %v7060_v61  ;;  %v209_v61 = vld [vmem:[%s8892_s2 + $0x5d0] sm:$0xff] }
  0x4c   :  { %4102 = vmatpush1.bf16.msra.mxu0 %v7058_v58  ;;  %v201_v58 = vld [vmem:[%s8892_s2 + $0x590] sm:$0xff] }
  0x4d   :  { %4104 = vmatprep.subr.bf16.mxu0 %v7072_v28  ;;  %v7132_v28 = vpack.c.bf16 %v210_v15, %v202_v14  ;;  %v226_v14 = vld [vmem:[%s8892_s2 + $0x658] sm:$0xff]  ;;  %v60_v15 = vld [vmem:[%s8892_s2 + $0x128] sm:$0xff] }
  0x4e   :  { %4146 = vmatpush1.bf16.msra.mxu1 %v7090_v38  ;;  %v217_v38 = vld [vmem:[%s8892_s2 + $0x610] sm:$0xff] }
  0x4f   :  { %4148 = vmatprep.subr.bf16.mxu1 %v7096_v42  ;;  %9236 = vst [vmem:[#allocation60_spill] sm:$0xff] %v7132_v28  ;;  %v7169_v42 = vpack.c.bf16 %v226_v14, %v218_v63  ;;  %v242_v63 = vld [vmem:[%s8892_s2 + $0x6d8] sm:$0xff]  ;;  %v76_v14 = vld [vmem:[%s8892_s2 + $0x1a8] sm:$0xff] }
  0x50   :  { %4106 = vmatpush1.bf16.msra.mxu0 %v7094_v39  ;;  %v7167_v39 = vpack.c.bf16 %v51_v1, %v43_v44  ;;  %v67_v44 = vld [vmem:[%s8892_s2 + $0x160] sm:$0xff]  ;;  %v234_v1 = vld [vmem:[%s8892_s2 + $0x698] sm:$0xff] }
  0x51   :  { %4172 = vmatprep.subr.bf16.mxu0 %v7108_v5  ;;  %v7163_v5 = vpack.c.bf16 %v209_v61, %v201_v58  ;;  %9241 = vst [vmem:[#allocation64_spill] sm:$0xff] %v7169_v42  ;;  %v59_v58 = vld [vmem:[%s8892_s2 + $0x120] sm:$0xff]  ;;  %v7181_v61 = vpack.c.bf16 %v68_v24, %v60_v15  ;;  %v84_v15 = vld [vmem:[%s8892_s2 + $0x1e8] sm:$0xff]  ;;  %v7200_v24 = vpack.c.bf16 %v225_v46, %v217_v38 }
  0x52   :  { %4150 = vmatpush1.bf16.msra.mxu1 %v7126_v32  ;;  %9240 = vst [vmem:[#allocation63_spill] sm:$0xff] %v7167_v39  ;;  %v241_v32 = vld [vmem:[%s8892_s2 + $0x6d0] sm:$0xff]  ;;  %v75_v46 = vld [vmem:[%s8892_s2 + $0x1a0] sm:$0xff]  ;;  %v7218_v38 = vpack.c.bf16 %v84_v15, %v76_v14  ;;  %v100_v14 = vld [vmem:[%s8892_s2 + $0x268] sm:$0xff] }
  0x53   :  { %800 = vmatmul.mubr.f32.vlgmr.msra.gmra.mrb[4].mxu0 %v9238_v25  ;;  %9239 = vst [vmem:[#allocation62_spill] sm:$0xff] %v7163_v5  ;;  %4152 = vmatprep.subr.bf16.mxu1 %v7132_v28  ;;  %9242 = vst [vmem:[#allocation65_spill] sm:$0xff] %v7181_v61  ;;  %v233_v28 = vld [vmem:[%s8892_s2 + $0x690] sm:$0xff] }
  0x54   :  { %4174 = vmatpush1.bf16.msra.mxu0 %v7130_v3  ;;  %941 = vmatprep.mubr.f32.mxu0 %v9238_v25  ;;  %9243 = vst [vmem:[#allocation66_spill] sm:$0xff] %v7200_v24  ;;  %v7206_v3 = vpack.c.bf16 %v242_v63, %v234_v1  ;;  %9246 = vst [vmem:[#allocation69_spill] sm:$0xff] %v7218_v38  ;;  %v258_v1 = vld [vmem:[%s8892_s2 + $0x758] sm:$0xff]  ;;  %v92_v63 = vld [vmem:[%s8892_s2 + $0x228] sm:$0xff]  ;;  %v7236_v15 = vpack.c.bf16 %v241_v32, %v233_v28 }
  0x55   :  { %4176 = vmatprep.subr.bf16.mxu0 %v7144_v45  ;;  %v7204_v45 = vpack.c.bf16 %v67_v44, %v59_v58  ;;  %v83_v58 = vld [vmem:[%s8892_s2 + $0x1e0] sm:$0xff]  ;;  %v250_v44 = vld [vmem:[%s8892_s2 + $0x718] sm:$0xff]  ;;  %v7254_v32 = vpack.c.bf16 %v100_v14, %v92_v63  ;;  %v116_v63 = vld [vmem:[%s8892_s2 + $0x2e8] sm:$0xff] }
  0x56   :  { %4154 = vmatpush1.bf16.msra.mxu1 %v7163_v5  ;;  %9245 = vst [vmem:[#allocation68_spill] sm:$0xff] %v7206_v3  ;;  %9247 = vst [vmem:[#allocation70_spill] sm:$0xff] %v7236_v15  ;;  %v257_v5 = vld [vmem:[%s8892_s2 + $0x750] sm:$0xff]  ;;  %v91_v28 = vld [vmem:[%s8892_s2 + $0x220] sm:$0xff] }
  0x57   :  { %4156 = vmatprep.subr.bf16.mxu1 %v7169_v42  ;;  %9244 = vst [vmem:[#allocation67_spill] sm:$0xff] %v7204_v45  ;;  %v249_v42 = vld [vmem:[%s8892_s2 + $0x710] sm:$0xff]  ;;  %9250 = vst [vmem:[#allocation73_spill] sm:$0xff] %v7254_v32 }
  0x58   :  { %4178 = vmatpush1.bf16.msra.mxu0 %v7167_v39  ;;  %v7242_v39 = vpack.c.bf16 %v258_v1, %v250_v44  ;;  %v274_v44 = vld [vmem:[%s8892_s2 + $0x7d8] sm:$0xff]  ;;  %v108_v1 = vld [vmem:[%s8892_s2 + $0x2a8] sm:$0xff]  ;;  %v7272_v14 = vpack.c.bf16 %v257_v5, %v249_v42  ;;  %v107_v42 = vld [vmem:[%s8892_s2 + $0x2a0] sm:$0xff] }
  0x59   :  { %4180 = vmatprep.subr.bf16.mxu0 %v7181_v61  ;;  %v7240_v61 = vpack.c.bf16 %v83_v58, %v75_v46  ;;  %v99_v46 = vld [vmem:[%s8892_s2 + $0x260] sm:$0xff]  ;;  %v266_v58 = vld [vmem:[%s8892_s2 + $0x798] sm:$0xff]  ;;  %v7290_v5 = vpack.c.bf16 %v116_v63, %v108_v1  ;;  %v132_v1 = vld [vmem:[%s8892_s2 + $0x368] sm:$0xff] }
  0x5a   :  { %4158 = vmatpush1.bf16.msra.mxu1 %v7200_v24  ;;  %9249 = vst [vmem:[#allocation72_spill] sm:$0xff] %v7242_v39  ;;  %9251 = vst [vmem:[#allocation74_spill] sm:$0xff] %v7272_v14  ;;  %v273_v24 = vld [vmem:[%s8892_s2 + $0x7d0] sm:$0xff] }
  0x5b   :  { %4160 = vmatprep.subr.bf16.mxu1 %v7206_v3  ;;  %9248 = vst [vmem:[#allocation71_spill] sm:$0xff] %v7240_v61  ;;  %v265_v3 = vld [vmem:[%s8892_s2 + $0x790] sm:$0xff]  ;;  %9254 = vst [vmem:[#allocation77_spill] sm:$0xff] %v7290_v5 }
  0x5c   :  { %4182 = vmatpush1.bf16.msra.mxu0 %v7204_v45  ;;  %v7278_v45 = vpack.c.bf16 %v274_v44, %v266_v58  ;;  %v38_v58 = vld [vmem:[%s8892_s2 + $0x78] sm:$0xff]  ;;  %v124_v44 = vld [vmem:[%s8892_s2 + $0x328] sm:$0xff]  ;;  %v7308_v63 = vpack.c.bf16 %v273_v24, %v265_v3  ;;  %v37_v3 = vld [vmem:[%s8892_s2 + $0x70] sm:$0xff] }
  0x5d   :  { %4184 = vmatprep.subr.bf16.mxu0 %v7218_v38  ;;  %v7276_v38 = vpack.c.bf16 %v99_v46, %v91_v28  ;;  %v115_v28 = vld [vmem:[%s8892_s2 + $0x2e0] sm:$0xff]  ;;  %v30_v46 = vld [vmem:[%s8892_s2 + $0x38] sm:$0xff]  ;;  %v7326_v24 = vpack.c.bf16 %v132_v1, %v124_v44  ;;  %v148_v44 = vld [vmem:[%s8892_s2 + $0x3e8] sm:$0xff] }
  0x5e   :  { %4162 = vmatpush1.bf16.msra.mxu1 %v7236_v15  ;;  %9253 = vst [vmem:[#allocation76_spill] sm:$0xff] %v7278_v45  ;;  %9255 = vst [vmem:[#allocation78_spill] sm:$0xff] %v7308_v63  ;;  %v29_v15 = vld [vmem:[%s8892_s2 + $0x30] sm:$0xff] }
  0x5f   :  { %4164 = vmatprep.subr.bf16.mxu1 %v7242_v39  ;;  %9252 = vst [vmem:[#allocation75_spill] sm:$0xff] %v7276_v38  ;;  %v123_v39 = vld [vmem:[%s8892_s2 + $0x320] sm:$0xff]  ;;  %9258 = vst [vmem:[#allocation81_spill] sm:$0xff] %v7326_v24  ;;  %v7344_v1 = vpack.c.bf16 %v37_v3, %v29_v15  ;;  %v53_v15 = vld [vmem:[%s8892_s2 + $0xf0] sm:$0xff] }
  0x60   :  { %4186 = vmatpush1.bf16.msra.mxu0 %v7240_v61  ;;  %v7314_v61 = vpack.c.bf16 %v38_v58, %v30_v46  ;;  %v54_v46 = vld [vmem:[%s8892_s2 + $0xf8] sm:$0xff]  ;;  %v140_v58 = vld [vmem:[%s8892_s2 + $0x3a8] sm:$0xff] }
  0x61   :  { %4188 = vmatprep.subr.bf16.mxu0 %v7254_v32  ;;  %v7312_v32 = vpack.c.bf16 %v115_v28, %v107_v42  ;;  %v131_v42 = vld [vmem:[%s8892_s2 + $0x360] sm:$0xff]  ;;  %v46_v28 = vld [vmem:[%s8892_s2 + $0xb8] sm:$0xff]  ;;  %9259 = vst [vmem:[#allocation82_spill] sm:$0xff] %v7344_v1  ;;  %v7362_v3 = vpack.c.bf16 %v148_v44, %v140_v58  ;;  %v164_v58 = vld [vmem:[%s8892_s2 + $0x468] sm:$0xff] }
  0x62   :  { %4166 = vmatpush1.bf16.msra.mxu1 %v7272_v14  ;;  %9257 = vst [vmem:[#allocation80_spill] sm:$0xff] %v7314_v61  ;;  %v45_v14 = vld [vmem:[%s8892_s2 + $0xb0] sm:$0xff] }
  0x63   :  { %4168 = vmatprep.subr.bf16.mxu1 %v7278_v45  ;;  %9256 = vst [vmem:[#allocation79_spill] sm:$0xff] %v7312_v32  ;;  %v139_v45 = vld [vmem:[%s8892_s2 + $0x3a0] sm:$0xff]  ;;  %9262 = vst [vmem:[#allocation85_spill] sm:$0xff] %v7362_v3  ;;  %v7381_v44 = vpack.c.bf16 %v53_v15, %v45_v14  ;;  %v69_v14 = vld [vmem:[%s8892_s2 + $0x170] sm:$0xff] }
  0x64   :  { %4190 = vmatpush1.bf16.msra.mxu0 %v7276_v38  ;;  %v7350_v38 = vpack.c.bf16 %v54_v46, %v46_v28  ;;  %v70_v28 = vld [vmem:[%s8892_s2 + $0x178] sm:$0xff]  ;;  %v156_v46 = vld [vmem:[%s8892_s2 + $0x428] sm:$0xff] }
  0x65   :  { %4192 = vmatprep.subr.bf16.mxu0 %v7290_v5  ;;  %v7348_v5 = vpack.c.bf16 %v131_v42, %v123_v39  ;;  %v147_v39 = vld [vmem:[%s8892_s2 + $0x3e0] sm:$0xff]  ;;  %v62_v42 = vld [vmem:[%s8892_s2 + $0x138] sm:$0xff]  ;;  %9263 = vst [vmem:[#allocation86_spill] sm:$0xff] %v7381_v44  ;;  %v7400_v15 = vpack.c.bf16 %v164_v58, %v156_v46  ;;  %v180_v46 = vld [vmem:[%s8892_s2 + $0x4e8] sm:$0xff] }
  0x66   :  { %4170 = vmatpush1.bf16.msra.mxu1 %v7308_v63  ;;  %9261 = vst [vmem:[#allocation84_spill] sm:$0xff] %v7350_v38  ;;  %v77_v63 = vld [vmem:[%s8892_s2 + $0x1b0] sm:$0xff] }
  0x67   :  { %4236 = vmatprep.subr.bf16.mxu1 %v7314_v61  ;;  %9260 = vst [vmem:[#allocation83_spill] sm:$0xff] %v7348_v5  ;;  %v155_v61 = vld [vmem:[%s8892_s2 + $0x420] sm:$0xff]  ;;  %9266 = vst [vmem:[#allocation89_spill] sm:$0xff] %v7400_v15 }
  0x68   :  { %4194 = vmatpush1.bf16.msra.mxu0 %v7312_v32  ;;  %v7388_v32 = vpack.c.bf16 %v70_v28, %v62_v42  ;;  %v86_v42 = vld [vmem:[%s8892_s2 + $0x1f8] sm:$0xff]  ;;  %v172_v28 = vld [vmem:[%s8892_s2 + $0x4a8] sm:$0xff] }
  0x69   :  { %4196 = vmatprep.subr.bf16.mxu0 %v7326_v24  ;;  %871 = vmatmul.mubr.f32.vlgmr.msra.gmra.mrb[12].mxu1 %v9238_v25  ;;  %v7386_v24 = vpack.c.bf16 %v147_v39, %v139_v45  ;;  %v163_v45 = vld [vmem:[%s8892_s2 + $0x460] sm:$0xff]  ;;  %v78_v39 = vld [vmem:[%s8892_s2 + $0x1b8] sm:$0xff] }
  0x6a   :  { %4238 = vmatpush1.bf16.msra.mxu1 %v7344_v1  ;;  %1012 = vmatprep.mubr.f32.mxu1 %v9238_v25  ;;  %9265 = vst [vmem:[#allocation88_spill] sm:$0xff] %v7388_v32  ;;  %v61_v1 = vld [vmem:[%s8892_s2 + $0x130] sm:$0xff] }
  0x6b   :  { %4240 = vmatprep.subr.bf16.mxu1 %v7350_v38  ;;  %9264 = vst [vmem:[#allocation87_spill] sm:$0xff] %v7386_v24  ;;  %v7418_v58 = vpack.c.bf16 %v69_v14, %v61_v1  ;;  %v171_v38 = vld [vmem:[%s8892_s2 + $0x4a0] sm:$0xff]  ;;  %v85_v1 = vld [vmem:[%s8892_s2 + $0x1f0] sm:$0xff]  ;;  %v7436_v14 = vpack.c.bf16 %v180_v46, %v172_v28  ;;  %v196_v28 = vld [vmem:[%s8892_s2 + $0x568] sm:$0xff] }
  0x6c   :  { %4198 = vmatpush1.bf16.msra.mxu0 %v7348_v5  ;;  %v7424_v5 = vpack.c.bf16 %v86_v42, %v78_v39  ;;  %v102_v39 = vld [vmem:[%s8892_s2 + $0x278] sm:$0xff]  ;;  %v188_v42 = vld [vmem:[%s8892_s2 + $0x528] sm:$0xff]  ;;  %v7454_v46 = vpack.c.bf16 %v85_v1, %v77_v63  ;;  %v101_v63 = vld [vmem:[%s8892_s2 + $0x270] sm:$0xff] }
  0x6d   :  { %4200 = vmatprep.subr.bf16.mxu0 %v7362_v3  ;;  %9267 = vst [vmem:[#allocation90_spill] sm:$0xff] %v7418_v58  ;;  %v7422_v3 = vpack.c.bf16 %v163_v45, %v155_v61  ;;  %9270 = vst [vmem:[#allocation93_spill] sm:$0xff] %v7436_v14  ;;  %v179_v61 = vld [vmem:[%s8892_s2 + $0x4e0] sm:$0xff]  ;;  %v94_v45 = vld [vmem:[%s8892_s2 + $0x238] sm:$0xff]  ;;  %v7472_v1 = vpack.c.bf16 %v196_v28, %v188_v42 }
  0x6e   :  { %4242 = vmatpush1.bf16.msra.mxu1 %v7381_v44  ;;  %9269 = vst [vmem:[#allocation92_spill] sm:$0xff] %v7424_v5  ;;  %9271 = vst [vmem:[#allocation94_spill] sm:$0xff] %v7454_v46  ;;  %v93_v44 = vld [vmem:[%s8892_s2 + $0x230] sm:$0xff]  ;;  %v212_v42 = vld [vmem:[%s8892_s2 + $0x5e8] sm:$0xff] }
  0x6f   :  { %4244 = vmatprep.subr.bf16.mxu1 %v7388_v32  ;;  %9268 = vst [vmem:[#allocation91_spill] sm:$0xff] %v7422_v3  ;;  %v187_v32 = vld [vmem:[%s8892_s2 + $0x520] sm:$0xff]  ;;  %9274 = vst [vmem:[#allocation97_spill] sm:$0xff] %v7472_v1  ;;  %v7490_v28 = vpack.c.bf16 %v101_v63, %v93_v44  ;;  %v117_v44 = vld [vmem:[%s8892_s2 + $0x2f0] sm:$0xff] }
  0x70   :  { %4202 = vmatpush1.bf16.msra.mxu0 %v7386_v24  ;;  %v7460_v24 = vpack.c.bf16 %v102_v39, %v94_v45  ;;  %v118_v45 = vld [vmem:[%s8892_s2 + $0x2f8] sm:$0xff]  ;;  %v204_v39 = vld [vmem:[%s8892_s2 + $0x5a8] sm:$0xff] }
  0x71   :  { %4204 = vmatprep.subr.bf16.mxu0 %v7400_v15  ;;  %v7458_v15 = vpack.c.bf16 %v179_v61, %v171_v38  ;;  %v195_v38 = vld [vmem:[%s8892_s2 + $0x560] sm:$0xff]  ;;  %v110_v61 = vld [vmem:[%s8892_s2 + $0x2b8] sm:$0xff]  ;;  %9275 = vst [vmem:[#allocation98_spill] sm:$0xff] %v7490_v28  ;;  %v7508_v63 = vpack.c.bf16 %v212_v42, %v204_v39  ;;  %v228_v39 = vld [vmem:[%s8892_s2 + $0x668] sm:$0xff] }
  0x72   :  { %4246 = vmatpush1.bf16.msra.mxu1 %v7418_v58  ;;  %9273 = vst [vmem:[#allocation96_spill] sm:$0xff] %v7460_v24  ;;  %v109_v58 = vld [vmem:[%s8892_s2 + $0x2b0] sm:$0xff] }
  0x73   :  { %4248 = vmatprep.subr.bf16.mxu1 %v7424_v5  ;;  %9272 = vst [vmem:[#allocation95_spill] sm:$0xff] %v7458_v15  ;;  %v203_v5 = vld [vmem:[%s8892_s2 + $0x5a0] sm:$0xff]  ;;  %9278 = vst [vmem:[#allocation101_spill] sm:$0xff] %v7508_v63  ;;  %v7526_v42 = vpack.c.bf16 %v117_v44, %v109_v58  ;;  %v133_v58 = vld [vmem:[%s8892_s2 + $0x370] sm:$0xff] }
  0x74   :  { %4206 = vmatpush1.bf16.msra.mxu0 %v7422_v3  ;;  %v7496_v3 = vpack.c.bf16 %v118_v45, %v110_v61  ;;  %v134_v61 = vld [vmem:[%s8892_s2 + $0x378] sm:$0xff]  ;;  %v220_v45 = vld [vmem:[%s8892_s2 + $0x628] sm:$0xff] }
  0x75   :  { %4208 = vmatprep.subr.bf16.mxu0 %v7436_v14  ;;  %v7494_v14 = vpack.c.bf16 %v195_v38, %v187_v32  ;;  %v211_v32 = vld [vmem:[%s8892_s2 + $0x5e0] sm:$0xff]  ;;  %v126_v38 = vld [vmem:[%s8892_s2 + $0x338] sm:$0xff]  ;;  %9279 = vst [vmem:[#allocation102_spill] sm:$0xff] %v7526_v42  ;;  %v7544_v44 = vpack.c.bf16 %v228_v39, %v220_v45  ;;  %v244_v45 = vld [vmem:[%s8892_s2 + $0x6e8] sm:$0xff] }
  0x76   :  { %4250 = vmatpush1.bf16.msra.mxu1 %v7454_v46  ;;  %9277 = vst [vmem:[#allocation100_spill] sm:$0xff] %v7496_v3  ;;  %v125_v46 = vld [vmem:[%s8892_s2 + $0x330] sm:$0xff] }
  0x77   :  { %4252 = vmatprep.subr.bf16.mxu1 %v7460_v24  ;;  %9276 = vst [vmem:[#allocation99_spill] sm:$0xff] %v7494_v14  ;;  %v219_v24 = vld [vmem:[%s8892_s2 + $0x620] sm:$0xff]  ;;  %9282 = vst [vmem:[#allocation105_spill] sm:$0xff] %v7544_v44  ;;  %v7562_v39 = vpack.c.bf16 %v133_v58, %v125_v46  ;;  %v149_v46 = vld [vmem:[%s8892_s2 + $0x3f0] sm:$0xff] }
  0x78   :  { %4210 = vmatpush1.bf16.msra.mxu0 %v7458_v15  ;;  %v7532_v15 = vpack.c.bf16 %v134_v61, %v126_v38  ;;  %v150_v38 = vld [vmem:[%s8892_s2 + $0x3f8] sm:$0xff]  ;;  %v236_v61 = vld [vmem:[%s8892_s2 + $0x6a8] sm:$0xff] }
  0x79   :  { %4212 = vmatprep.subr.bf16.mxu0 %v7472_v1  ;;  %v7530_v1 = vpack.c.bf16 %v211_v32, %v203_v5  ;;  %v227_v5 = vld [vmem:[%s8892_s2 + $0x660] sm:$0xff]  ;;  %v142_v32 = vld [vmem:[%s8892_s2 + $0x3b8] sm:$0xff]  ;;  %9283 = vst [vmem:[#allocation106_spill] sm:$0xff] %v7562_v39  ;;  %v7580_v58 = vpack.c.bf16 %v244_v45, %v236_v61  ;;  %v260_v61 = vld [vmem:[%s8892_s2 + $0x768] sm:$0xff] }
  0x7a   :  { %4254 = vmatpush1.bf16.msra.mxu1 %v7490_v28  ;;  %9281 = vst [vmem:[#allocation104_spill] sm:$0xff] %v7532_v15  ;;  %v141_v28 = vld [vmem:[%s8892_s2 + $0x3b0] sm:$0xff] }
  0x7b   :  { %4256 = vmatprep.subr.bf16.mxu1 %v7496_v3  ;;  %9280 = vst [vmem:[#allocation103_spill] sm:$0xff] %v7530_v1  ;;  %v235_v3 = vld [vmem:[%s8892_s2 + $0x6a0] sm:$0xff]  ;;  %9286 = vst [vmem:[#allocation109_spill] sm:$0xff] %v7580_v58  ;;  %v7598_v45 = vpack.c.bf16 %v149_v46, %v141_v28  ;;  %v165_v28 = vld [vmem:[%s8892_s2 + $0x470] sm:$0xff] }
  0x7c   :  { %4214 = vmatpush1.bf16.msra.mxu0 %v7494_v14  ;;  %v7568_v14 = vpack.c.bf16 %v150_v38, %v142_v32  ;;  %v166_v32 = vld [vmem:[%s8892_s2 + $0x478] sm:$0xff]  ;;  %v252_v38 = vld [vmem:[%s8892_s2 + $0x728] sm:$0xff] }
  0x7d   :  { %4216 = vmatprep.subr.bf16.mxu0 %v7508_v63  ;;  %v7566_v63 = vpack.c.bf16 %v227_v5, %v219_v24  ;;  %v243_v24 = vld [vmem:[%s8892_s2 + $0x6e0] sm:$0xff]  ;;  %v158_v5 = vld [vmem:[%s8892_s2 + $0x438] sm:$0xff]  ;;  %9287 = vst [vmem:[#allocation110_spill] sm:$0xff] %v7598_v45  ;;  %v7616_v46 = vpack.c.bf16 %v260_v61, %v252_v38  ;;  %v276_v38 = vld [vmem:[%s8892_s2 + $0x7e8] sm:$0xff] }
  0x7e   :  { %4258 = vmatpush1.bf16.msra.mxu1 %v7526_v42  ;;  %9285 = vst [vmem:[#allocation108_spill] sm:$0xff] %v7568_v14  ;;  %v157_v42 = vld [vmem:[%s8892_s2 + $0x430] sm:$0xff] }
  0x7f   :  { %4260 = vmatprep.subr.bf16.mxu1 %v7532_v15  ;;  %9284 = vst [vmem:[#allocation107_spill] sm:$0xff] %v7566_v63  ;;  %v251_v15 = vld [vmem:[%s8892_s2 + $0x720] sm:$0xff]  ;;  %9290 = vst [vmem:[#allocation113_spill] sm:$0xff] %v7616_v46  ;;  %v7634_v61 = vpack.c.bf16 %v165_v28, %v157_v42  ;;  %v181_v42 = vld [vmem:[%s8892_s2 + $0x4f0] sm:$0xff] }
  0x80   :  { %4218 = vmatpush1.bf16.msra.mxu0 %v7530_v1  ;;  %v7604_v1 = vpack.c.bf16 %v166_v32, %v158_v5  ;;  %v182_v5 = vld [vmem:[%s8892_s2 + $0x4f8] sm:$0xff]  ;;  %v268_v32 = vld [vmem:[%s8892_s2 + $0x7a8] sm:$0xff] }
  0x81   :  { %4220 = vmatprep.subr.bf16.mxu0 %v7544_v44  ;;  %v7602_v44 = vpack.c.bf16 %v243_v24, %v235_v3  ;;  %v259_v3 = vld [vmem:[%s8892_s2 + $0x760] sm:$0xff]  ;;  %v174_v24 = vld [vmem:[%s8892_s2 + $0x4b8] sm:$0xff]  ;;  %9291 = vst [vmem:[#allocation114_spill] sm:$0xff] %v7634_v61  ;;  %v7652_v28 = vpack.c.bf16 %v276_v38, %v268_v32 }
  0x82   :  { %4262 = vmatpush1.bf16.msra.mxu1 %v7562_v39  ;;  %9289 = vst [vmem:[#allocation112_spill] sm:$0xff] %v7604_v1  ;;  %v173_v39 = vld [vmem:[%s8892_s2 + $0x4b0] sm:$0xff] }
  0x83   :  { %4264 = vmatprep.subr.bf16.mxu1 %v7568_v14  ;;  %9288 = vst [vmem:[#allocation111_spill] sm:$0xff] %v7602_v44  ;;  %v267_v14 = vld [vmem:[%s8892_s2 + $0x7a0] sm:$0xff]  ;;  %9294 = vst [vmem:[#allocation117_spill] sm:$0xff] %v7652_v28 }
  0x84   :  { %4222 = vmatpush1.bf16.msra.mxu0 %v7566_v63  ;;  %v7640_v63 = vpack.c.bf16 %v182_v5, %v174_v24  ;;  %v198_v24 = vld [vmem:[%s8892_s2 + $0x578] sm:$0xff]  ;;  %v7664_v5 = vpack.c.bf16 %v181_v42, %v173_v39 }
  0x85   :  { %4224 = vmatprep.subr.bf16.mxu0 %v7580_v58  ;;  %v7638_v58 = vpack.c.bf16 %v259_v3, %v251_v15  ;;  %v275_v15 = vld [vmem:[%s8892_s2 + $0x7e0] sm:$0xff]  ;;  %v190_v3 = vld [vmem:[%s8892_s2 + $0x538] sm:$0xff] }
  0x86   :  { %4266 = vmatpush1.bf16.msra.mxu1 %v7598_v45  ;;  %9293 = vst [vmem:[#allocation116_spill] sm:$0xff] %v7640_v63  ;;  %9295 = vst [vmem:[#allocation118_spill] sm:$0xff] %v7664_v5  ;;  %v7668_v32 = vpack.c.bf16 %v275_v15, %v267_v14  ;;  %v7670_v38 = vpack.c.bf16 %v198_v24, %v190_v3  ;;  %v206_v39 = vld [vmem:[%s8892_s2 + $0x5b8] sm:$0xff]  ;;  %v205_v3 = vld [vmem:[%s8892_s2 + $0x5b0] sm:$0xff] }
  0x87   :  { %4268 = vmatprep.subr.bf16.mxu1 %v7604_v1  ;;  %9292 = vst [vmem:[#allocation115_spill] sm:$0xff] %v7638_v58  ;;  %v214_v14 = vld [vmem:[%s8892_s2 + $0x5f8] sm:$0xff]  ;;  %v213_v24 = vld [vmem:[%s8892_s2 + $0x5f0] sm:$0xff] }
  0x88   :  { %4226 = vmatpush1.bf16.msra.mxu0 %v7602_v44  ;;  %9296 = vst [vmem:[#allocation119_spill] sm:$0xff] %v7668_v32  ;;  %9297 = vst [vmem:[#allocation120_spill] sm:$0xff] %v7670_v38  ;;  %v197_v44 = vld [vmem:[%s8892_s2 + $0x570] sm:$0xff]  ;;  %v7690_v15 = vpack.c.bf16 %v214_v14, %v206_v39 }
  0x89   :  { %4228 = vmatprep.subr.bf16.mxu0 %v7616_v46  ;;  %v189_v46 = vld [vmem:[%s8892_s2 + $0x530] sm:$0xff] }
  0x8a   :  { %4270 = vmatpush1.bf16.msra.mxu1 %v7634_v61  ;;  %v7686_v42 = vpack.c.bf16 %v197_v44, %v189_v46  ;;  %9299 = vst [vmem:[#allocation122_spill] sm:$0xff] %v7690_v15  ;;  %v230_v44 = vld [vmem:[%s8892_s2 + $0x678] sm:$0xff]  ;;  %v7707_v46 = vpack.c.bf16 %v213_v24, %v205_v3  ;;  %v221_v14 = vld [vmem:[%s8892_s2 + $0x630] sm:$0xff] }
  0x8b   :  { %4272 = vmatprep.subr.bf16.mxu1 %v7640_v63  ;;  %v246_v3 = vld [vmem:[%s8892_s2 + $0x6f8] sm:$0xff] }
  0x8c   :  { %4230 = vmatpush1.bf16.msra.mxu0 %v7638_v58  ;;  %9298 = vst [vmem:[#allocation121_spill] sm:$0xff] %v7686_v42  ;;  %9300 = vst [vmem:[#allocation123_spill] sm:$0xff] %v7707_v46 }
  0x8d   :  { %4232 = vmatprep.subr.bf16.mxu0 %v7652_v28  ;;  %v222_v28 = vld [vmem:[%s8892_s2 + $0x638] sm:$0xff] }
  0x8e   :  { %4274 = vmatpush1.bf16.msra.mxu1 %v7664_v5  ;;  %v7710_v39 = vpack.c.bf16 %v230_v44, %v222_v28  ;;  %v237_v44 = vld [vmem:[%s8892_s2 + $0x6b0] sm:$0xff] }
  0x8f   :  { %4276 = vmatprep.subr.bf16.mxu1 %v7670_v38 }
  0x90   :  { %4234 = vmatpush1.bf16.msra.mxu0 %v7668_v32  ;;  %9301 = vst [vmem:[#allocation124_spill] sm:$0xff] %v7710_v39  ;;  %v229_v32 = vld [vmem:[%s8892_s2 + $0x670] sm:$0xff] }
  0x91   :  { %4300 = vmatprep.subr.bf16.mxu0 %v6513_v43  ;;  %v238_v43 = vld [vmem:[%s8892_s2 + $0x6b8] sm:$0xff]  ;;  %v7727_v28 = vpack.c.bf16 %v229_v32, %v221_v14 }
  0x92   :  { %4278 = vmatpush1.bf16.msra.mxu1 %v7686_v42  ;;  %v7730_v24 = vpack.c.bf16 %v246_v3, %v238_v43  ;;  %v262_v32 = vld [vmem:[%s8892_s2 + $0x778] sm:$0xff]  ;;  %v253_v3 = vld [vmem:[%s8892_s2 + $0x730] sm:$0xff] }
  0x93   :  { %942 = vmatmul.mubr.f32.vlgmr.msra.gmra.mrb[6].mxu0 %v9238_v25  ;;  %4280 = vmatprep.subr.bf16.mxu1 %v7690_v15  ;;  %9302 = vst [vmem:[#allocation125_spill] sm:$0xff] %v7727_v28 }
  0x94   :  { %4302 = vmatpush1.bf16.msra.mxu0 %v6548_v54  ;;  %9303 = vst [vmem:[#allocation126_spill] sm:$0xff] %v7730_v24  ;;  %v245_v54 = vld [vmem:[%s8892_s2 + $0x6f0] sm:$0xff] }
  0x95   :  { %4304 = vmatprep.subr.bf16.mxu0 %v6560_v59  ;;  %v254_v59 = vld [vmem:[%s8892_s2 + $0x738] sm:$0xff]  ;;  %v7747_v43 = vpack.c.bf16 %v245_v54, %v237_v44 }
  0x96   :  { %4282 = vmatpush1.bf16.msra.mxu1 %v7707_v46  ;;  %v7750_v14 = vpack.c.bf16 %v262_v32, %v254_v59  ;;  %v278_v54 = vld [vmem:[%s8892_s2 + $0x7f8] sm:$0xff]  ;;  %v269_v32 = vld [vmem:[%s8892_s2 + $0x7b0] sm:$0xff] }
  0x97   :  { %4284 = vmatprep.subr.bf16.mxu1 %v7710_v39  ;;  %9304 = vst [vmem:[#allocation127_spill] sm:$0xff] %v7747_v43 }
  0x98   :  { %4306 = vmatpush1.bf16.msra.mxu0 %v6587_v4  ;;  %9305 = vst [vmem:[#allocation128_spill] sm:$0xff] %v7750_v14  ;;  %v261_v4 = vld [vmem:[%s8892_s2 + $0x770] sm:$0xff] }
  0x99   :  { %4308 = vmatprep.subr.bf16.mxu0 %v6600_v9  ;;  %v270_v9 = vld [vmem:[%s8892_s2 + $0x7b8] sm:$0xff]  ;;  %v7767_v59 = vpack.c.bf16 %v261_v4, %v253_v3  ;;  %v9312_v3 = vld [vmem:[#allocation53_spill] sm:$0xff] }
  0x9a   :  { %4286 = vmatpush1.bf16.msra.mxu1 %v7727_v28  ;;  %v7770_v44 = vpack.c.bf16 %v278_v54, %v270_v9  ;;  %v9309_v9 = vld [vmem:[#allocation50_spill] sm:$0xff] }
  0x9b   :  { %4288 = vmatprep.subr.bf16.mxu1 %v7730_v24  ;;  %9306 = vst [vmem:[#allocation129_spill] sm:$0xff] %v7767_v59  ;;  %v9313_v54 = vld [vmem:[#allocation54_spill] sm:$0xff] }
  0x9c   :  { %4310 = vmatpush1.bf16.msra.mxu0 %v6624_v16  ;;  %9307 = vst [vmem:[#allocation130_spill] sm:$0xff] %v7770_v44  ;;  %v277_v16 = vld [vmem:[%s8892_s2 + $0x7f0] sm:$0xff] }
  0x9d   :  { %4312 = vmatprep.subr.bf16.mxu0 %v6636_v21  ;;  %v7781_v4 = vpack.c.bf16 %v277_v16, %v269_v32  ;;  %v9310_v16 = vld [vmem:[#allocation52_spill] sm:$0xff] }
  0x9e   :  { %4290 = vmatpush1.bf16.msra.mxu1 %v7747_v43  ;;  %v9314_v32 = vld [vmem:[#allocation56_spill] sm:$0xff] }
  0x9f   :  { %4292 = vmatprep.subr.bf16.mxu1 %v7750_v14  ;;  %9308 = vst [vmem:[#allocation131_spill] sm:$0xff] %v7781_v4 }
  0xa0   :  { %4314 = vmatpush1.bf16.msra.mxu0 %v6659_v29 }
  0xa1   :  { %4316 = vmatprep.subr.bf16.mxu0 %v6671_v34 }
  0xa2   :  { %4294 = vmatpush1.bf16.msra.mxu1 %v7767_v59 }
  0xa3   :  { %4296 = vmatprep.subr.bf16.mxu1 %v7770_v44 }
  0xa4   :  { %4318 = vmatpush1.bf16.msra.mxu0 %v6692_v41 }
  0xa5   :  { %4320 = vmatprep.subr.bf16.mxu0 %v6704_v47 }
  0xa6   :  { %4298 = vmatpush1.bf16.msra.mxu1 %v7781_v4 }
  0xa7   :  { %4364 = vmatprep.subr.bf16.mxu1 %v6729_v57 }
  0xa8   :  { %4322 = vmatpush1.bf16.msra.mxu0 %v6727_v56 }
  0xa9   :  { %4324 = vmatprep.subr.bf16.mxu0 %v6741_v62  ;;  %1013 = vmatmul.mubr.f32.vlgmr.msra.gmra.mrb[14].mxu1 %v9238_v25  ;;  %v9311_v25 = vld [vmem:[#allocation51_spill] sm:$0xff] }
  0xaa   :  { %4366 = vmatpush1.bf16.msra.mxu1 %v6760_v7 }
  0xab   :  { %4368 = vmatprep.subr.bf16.mxu1 %v6766_v10 }
  0xac   :  { %4326 = vmatpush1.bf16.msra.mxu0 %v6764_v8 }
  0xad   :  { %4328 = vmatprep.subr.bf16.mxu0 %v6778_v13 }
  0xae   :  { %4370 = vmatpush1.bf16.msra.mxu1 %v6798_v20 }
  0xaf   :  { %4372 = vmatprep.subr.bf16.mxu1 %v6805_v50 }
  0xb0   :  { %4330 = vmatpush1.bf16.msra.mxu0 %v6803_v22 }
  0xb1   :  { %4332 = vmatprep.subr.bf16.mxu0 %v6817_v26 }
  0xb2   :  { %4374 = vmatpush1.bf16.msra.mxu1 %v6837_v35 }
  0xb3   :  { %4376 = vmatprep.subr.bf16.mxu1 %v6844_v37 }
  0xb4   :  { %4334 = vmatpush1.bf16.msra.mxu0 %v6842_v36 }
  0xb5   :  { %4336 = vmatprep.subr.bf16.mxu0 %v6856_v40 }
  0xb6   :  { %4378 = vmatpush1.bf16.msra.mxu1 %v6874_v49 }
  0xb7   :  { %4380 = vmatprep.subr.bf16.mxu1 %v6880_v52 }
  0xb8   :  { %4338 = vmatpush1.bf16.msra.mxu0 %v6878_v51  ;;  %v9326_v51 = vld [vmem:[#allocation76_spill] sm:$0xff] }
  0xb9   :  { %4340 = vmatprep.subr.bf16.mxu0 %v6892_v60 }
  0xba   :  { %4382 = vmatpush1.bf16.msra.mxu1 %v6910_v6 }
  0xbb   :  { %4384 = vmatprep.subr.bf16.mxu1 %v6916_v12 }
  0xbc   :  { %4342 = vmatpush1.bf16.msra.mxu0 %v6914_v11  ;;  %v9322_v11 = vld [vmem:[#allocation68_spill] sm:$0xff] }
  0xbd   :  { %4344 = vmatprep.subr.bf16.mxu0 %v6928_v17  ;;  %v9320_v17 = vld [vmem:[#allocation64_spill] sm:$0xff] }
  0xbe   :  { %4386 = vmatpush1.bf16.msra.mxu1 %v6946_v27 }
  0xbf   :  { %4388 = vmatprep.subr.bf16.mxu1 %v6952_v31 }
  0xc0   :  { %4346 = vmatpush1.bf16.msra.mxu0 %v6950_v30  ;;  %v9319_v30 = vld [vmem:[#allocation62_spill] sm:$0xff] }
  0xc1   :  { %4348 = vmatprep.subr.bf16.mxu0 %v6964_v2  ;;  %v9317_v2 = vld [vmem:[#allocation58_spill] sm:$0xff] }
  0xc2   :  { %4390 = vmatpush1.bf16.msra.mxu1 %v6982_v48 }
  0xc3   :  { %4392 = vmatprep.subr.bf16.mxu1 %v6988_v55 }
  0xc4   :  { %4350 = vmatpush1.bf16.msra.mxu0 %v6986_v53  ;;  %v9316_v53 = vld [vmem:[#allocation57_spill] sm:$0xff] }
  0xc5   :  { %4352 = vmatprep.subr.bf16.mxu0 %v7000_v0  ;;  %v9315_v0 = vld [vmem:[#allocation55_spill] sm:$0xff] }
  0xc6   :  { %4394 = vmatpush1.bf16.msra.mxu1 %v7018_v18 }
  0xc7   :  { %4396 = vmatprep.subr.bf16.mxu1 %v7024_v23 }
  0xc8   :  { %4354 = vmatpush1.bf16.msra.mxu0 %v7022_v19  ;;  %v9318_v19 = vld [vmem:[#allocation60_spill] sm:$0xff] }
  0xc9   :  { %4356 = vmatprep.subr.bf16.mxu0 %v7036_v33  ;;  %v331_v33 = vlaneseq }
  0xca   :  { %4398 = vmatpush1.bf16.msra.mxu1 %v9309_v9 }
  0xcb   :  { %4400 = vmatprep.subr.bf16.mxu1 %v9310_v16 }
  0xcc   :  { %4358 = vmatpush1.bf16.msra.mxu0 %v9311_v25  ;;  %v7835_v25 = vshrl.u32 %v331_v33, 7  ;;  %v9324_v33 = vld [vmem:[#allocation72_spill] sm:$0xff] }
  0xcd   :  { %4360 = vmatprep.subr.bf16.mxu0 %v9312_v3  ;;  %v9321_v3 = vld [vmem:[#allocation66_spill] sm:$0xff] }
  0xce   :  { %4402 = vmatpush1.bf16.msra.mxu1 %v9313_v54 }
  0xcf   :  { %4404 = vmatprep.subr.bf16.mxu1 %v9314_v32  ;;  %v333_v32 = vsub.s32 0, %v7835_v25 }
  0xd0   :  { %4362 = vmatpush1.bf16.msra.mxu0 %v9315_v0  ;;  %v337_v0 = vsub.s32 1, %v7835_v25 }
  0xd1   :  { %4428 = vmatprep.subr.bf16.mxu0 %v9316_v53  ;;  %v329_v53 = vld [vmem:[%s8894_s3] sm:$0xff] }
  0xd2   :  { %4406 = vmatpush1.bf16.msra.mxu1 %v9317_v2  ;;  %v9323_v2 = vld [vmem:[#allocation70_spill] sm:$0xff] }
  0xd3   :  { %4408 = vmatprep.subr.bf16.mxu1 %v9318_v19  ;;  %v349_v19 = vsub.s32 4, %v7835_v25 }
  0xd5   :  { %v350_v60 = vrot.slane %v329_v53, %v349_v19 }
  0xd6   :  { %4410 = vmatpush1.bf16.msra.mxu1 %v9319_v30  ;;  %v334_v30 = vrot.slane %v329_v53, %v333_v32  ;;  %v341_v32 = vsub.s32 2, %v7835_v25 }
  0xd7   :  { %4412 = vmatprep.subr.bf16.mxu1 %v9320_v17  ;;  %v353_v17 = vsub.s32 5, %v7835_v25 }
  0xd9   :  { %v354_v54 = vrot.slane %v329_v53, %v353_v17 }
  0xda   :  { %4414 = vmatpush1.bf16.msra.mxu1 %v9321_v3  ;;  %v338_v3 = vrot.slane %v329_v53, %v337_v0 }
  0xdb   :  { %4416 = vmatprep.subr.bf16.mxu1 %v9322_v11  ;;  %v9325_v11 = vld [vmem:[#allocation74_spill] sm:$0xff] }
  0xde   :  { %4418 = vmatpush1.bf16.msra.mxu1 %v9323_v2  ;;  %v9327_v2 = vld [vmem:[#allocation78_spill] sm:$0xff] }
  0xdf   :  { %4420 = vmatprep.subr.bf16.mxu1 %v9324_v33  ;;  %v9328_v33 = vld [vmem:[#allocation80_spill] sm:$0xff] }
  0xe2   :  { %4422 = vmatpush1.bf16.msra.mxu1 %v9325_v11 }
  0xe3   :  { %4424 = vmatprep.subr.bf16.mxu1 %v9326_v51  ;;  %v345_v51 = vsub.s32 3, %v7835_v25 }
  0xe4   :  { %v469_v16 = vpop.f32.mrb[0].mxu1 }
  0xe5   :  { %v470_v40 = vadd.f32 %v469_v16, %v334_v30  ;;  %v471_v9 = vpop.f32.mrb[1].mxu1  ;;  %v346_v11 = vrot.slane %v329_v53, %v345_v51 }
  0xe6   :  { %v623_v36 = vpop.f32.mrb[0].mxu0  ;;  %v472_v23 = vadd.f32 %v471_v9, %v338_v3  ;;  %4426 = vmatpush1.bf16.msra.mxu1 %v9327_v2 }
  0xe7   :  { %v624_v26 = vadd.f32 %v623_v36, %v350_v60  ;;  %v625_v18 = vpop.f32.mrb[1].mxu0  ;;  %711 = vst [vmem:[#allocation2] sm:$0xff] %v470_v40  ;;  %4492 = vmatprep.subr.bf16.mxu1 %v9328_v33  ;;  %v342_v40 = vrot.slane %v329_v53, %v341_v32 }
  0xe8   :  { %v626_v22 = vadd.f32 %v625_v18, %v354_v54  ;;  %712 = vst [vmem:[#allocation2 + $0x8] sm:$0xff] %v472_v23  ;;  %v475_v0 = vpop.f32.mrb[2].mxu1 }
  0xe9   :  { %715 = vst [vmem:[#allocation2 + $0x20] sm:$0xff] %v624_v26  ;;  %v476_v19 = vadd.f32 %v475_v0, %v334_v30  ;;  %v477_v17 = vpop.f32.mrb[3].mxu1 }
  0xea   :  { %716 = vst [vmem:[#allocation2 + $0x28] sm:$0xff] %v626_v22  ;;  %v478_v16 = vadd.f32 %v477_v17, %v338_v3  ;;  %v629_v36 = vpop.f32.mrb[2].mxu0 }
  0xeb   :  { %719 = vst [vmem:[#allocation2 + $0x40] sm:$0xff] %v476_v19  ;;  %v630_v9 = vadd.f32 %v629_v36, %v350_v60  ;;  %v631_v2 = vpop.f32.mrb[3].mxu0  ;;  %v357_v19 = vsub.s32 6, %v7835_v25  ;;  %v361_v60 = vsub.s32 7, %v7835_v25 }
  0xec   :  { %720 = vst [vmem:[#allocation2 + $0x48] sm:$0xff] %v478_v16  ;;  %v632_v18 = vadd.f32 %v631_v2, %v354_v54 }
  0xed   :  { %723 = vst [vmem:[#allocation2 + $0x60] sm:$0xff] %v630_v9  ;;  %v358_v2 = vrot.slane %v329_v53, %v357_v19  ;;  %v362_v51 = vrot.slane %v329_v53, %v361_v60 }
  0xee   :  { %724 = vst [vmem:[#allocation2 + $0x68] sm:$0xff] %v632_v18 }
  0xf0   :  { %v546_v23 = vpop.f32.mrb[4].mxu1 }
  0xf1   :  { %v547_v26 = vadd.f32 %v546_v23, %v342_v40  ;;  %v548_v30 = vpop.f32.mrb[5].mxu1 }
  0xf2   :  { %v549_v0 = vadd.f32 %v548_v30, %v346_v11 }
  0xf3   :  { %713 = vst [vmem:[#allocation2 + $0x10] sm:$0xff] %v547_v26 }
  0xf4   :  { %714 = vst [vmem:[#allocation2 + $0x18] sm:$0xff] %v549_v0  ;;  %v552_v22 = vpop.f32.mrb[6].mxu1  ;;  %v727_v0 = vld [vmem:[#allocation2] sm:$0x3] }
  0xf5   :  { %v553_v3 = vadd.f32 %v552_v22, %v342_v40  ;;  %v554_v17 = vpop.f32.mrb[7].mxu1  ;;  %v728_v22 = vld [vmem:[#allocation2 + $0x8] sm:$0x3] }
  0xf6   :  { %v555_v33 = vadd.f32 %v554_v17, %v346_v11 }
  0xf7   :  { %721 = vst [vmem:[#allocation2 + $0x50] sm:$0xff] %v553_v3 }
  0xf8   :  { %722 = vst [vmem:[#allocation2 + $0x58] sm:$0xff] %v555_v33 }
  0xfa   :  { %v729_v3 = vld [vmem:[#allocation2 + $0x10] sm:$0x3] }
  0xfb   :  { %v730_v19 = vld [vmem:[#allocation2 + $0x18] sm:$0x3] }
  0xfc   :  { %v700_v54 = vpop.f32.mrb[8].mxu1 }
  0xfd   :  { %v701_v32 = vadd.f32 %v700_v54, %v358_v2  ;;  %v702_v16 = vpop.f32.mrb[9].mxu1 }
  0xfe   :  { %v703_v36 = vadd.f32 %v702_v16, %v362_v51 }
  0xff   :  { %717 = vst [vmem:[#allocation2 + $0x30] sm:$0xff] %v701_v32 }
 0x100   :  { %718 = vst [vmem:[#allocation2 + $0x38] sm:$0xff] %v703_v36  ;;  %v706_v9 = vpop.f32.mrb[10].mxu1 }
 0x101   :  { %v707_v18 = vadd.f32 %v706_v9, %v358_v2  ;;  %v708_v23 = vpop.f32.mrb[11].mxu1 }
 0x102   :  { %v709_v40 = vadd.f32 %v708_v23, %v362_v51 }
 0x103   :  { %725 = vst [vmem:[#allocation2 + $0x70] sm:$0xff] %v707_v18 }
 0x104   :  { %726 = vst [vmem:[#allocation2 + $0x78] sm:$0xff] %v709_v40 }
 0x126   :  { %v801_v26 = vpop.f32.mrb[4].mxu0 }
 0x127   :  { %v803_v11 = vpop.f32.mrb[5].mxu0  ;;  %v1019_v33 = vadd.f32 %v801_v26, %v727_v0 }
 0x128   :  { %v1020_v53 = vadd.f32 %v803_v11, %v728_v22 }
 0x129   :  { %v3900_v54 = vmul.f32 -1.442695, %v1019_v33  ;;  %v732_v33 = vld [vmem:[#allocation2 + $0x28] sm:$0x3] }
 0x12a   :  { %v3901_v32 = vmul.f32 -1.442695, %v1020_v53 }
 0x12b   :  { %6125 = vpow2.f32 %v3900_v54 }
 0x12c   :  { %6127 = vpow2.f32 %v3901_v32 }
 0x135   :  { %v6126_v51 = vpop.eup %6125 }
 0x136   :  { %v6128_v36 = vpop.eup %6127  ;;  %v1033_v23 = vadd.f32 1.0, %v6126_v51 }
 0x137   :  { %v1034_v40 = vadd.f32 1.0, %v6128_v36 }
 0x13c   :  { %v872_v30 = vpop.f32.mrb[12].mxu1 }
 0x13d   :  { %v874_v25 = vpop.f32.mrb[13].mxu1  ;;  %v1021_v17 = vadd.f32 %v872_v30, %v729_v3  ;;  %v731_v30 = vld [vmem:[#allocation2 + $0x20] sm:$0x3] }
 0x13e   :  { %v1022_v60 = vadd.f32 %v874_v25, %v730_v19 }
 0x13f   :  { %v3902_v16 = vmul.f32 -1.442695, %v1021_v17 }
 0x140   :  { %v3903_v2 = vmul.f32 -1.442695, %v1022_v60 }
 0x141   :  { %6129 = vpow2.f32 %v3902_v16 }
 0x142   :  { %6131 = vpow2.f32 %v3903_v2 }
 0x143   :  { %6133 = vrcp.f32 %v1033_v23  ;;  %v733_v23 = vld [vmem:[#allocation2 + $0x30] sm:$0x3] }
 0x144   :  { %6135 = vrcp.f32 %v1034_v40 }
 0x14b   :  { %v6130_v9 = vpop.eup %6129 }
 0x14c   :  { %v6132_v18 = vpop.eup %6131  ;;  %v1045_v26 = vadd.f32 1.0, %v6130_v9 }
 0x14d   :  { %v1046_v11 = vadd.f32 1.0, %v6132_v18  ;;  %v6134_v3 = vpop.eup %6133 }
 0x14e   :  { %6137 = vrcp.f32 %v1045_v26  ;;  %v6136_v17 = vpop.eup %6135 }
 0x14f   :  { %6139 = vrcp.f32 %v1046_v11  ;;  %v734_v11 = vld [vmem:[#allocation2 + $0x38] sm:$0x3] }
 0x158   :  { %v6138_v19 = vpop.eup %6137 }
 0x159   :  { %v6140_v60 = vpop.eup %6139  ;;  %v1065_v16 = vmul.f32 0.0, %v6138_v19 }
 0x15a   :  { %v1066_v51 = vmul.f32 0.0, %v6140_v60 }
 0x166   :  { %v943_v25 = vpop.f32.mrb[6].mxu0 }
 0x167   :  { %v1023_v0 = vadd.f32 %v943_v25, %v731_v30  ;;  %v945_v22 = vpop.f32.mrb[7].mxu0 }
 0x168   :  { %v1024_v53 = vadd.f32 %v945_v22, %v732_v33 }
 0x169   :  { %6141 = vtanh.f32 %v1023_v0 }
 0x16a   :  { %6143 = vtanh.f32 %v1024_v53 }
 0x173   :  { %v6142_v54 = vpop.eup %6141 }
 0x174   :  { %v6144_v32 = vpop.eup %6143  ;;  %v1067_v2 = vmul.f32 %v6142_v54, %v6134_v3 }
 0x175   :  { %v1068_v36 = vmul.f32 %v6144_v32, %v6136_v17 }
 0x176   :  { %v7856_v9 = vadd.f32 %v1067_v2, %v1065_v16 }
 0x177   :  { %v7858_v18 = vadd.f32 %v1068_v36, %v1066_v51  ;;  %v9329_v36 = vld [vmem:[#allocation59_spill] sm:$0xff] }
 0x17c   :  { %v1014_v40 = vpop.f32.mrb[14].mxu1 }
 0x17d   :  { %v1025_v26 = vadd.f32 %v1014_v40, %v733_v23  ;;  %v1016_v30 = vpop.f32.mrb[15].mxu1  ;;  %v9330_v23 = vld [vmem:[#allocation82_spill] sm:$0xff]  ;;  %v9331_v40 = vld [vmem:[#allocation61_spill] sm:$0xff] }
 0x17e   :  { %v1026_v25 = vadd.f32 %v1016_v30, %v734_v11  ;;  %v9333_v11 = vld [vmem:[#allocation63_spill] sm:$0xff]  ;;  %v9334_v30 = vld [vmem:[#allocation86_spill] sm:$0xff] }
 0x17f   :  { %v3904_v0 = vmul.f32 -1.442695, %v1025_v26  ;;  %v9332_v26 = vld [vmem:[#allocation84_spill] sm:$0xff] }
 0x180   :  { %v3905_v33 = vmul.f32 -1.442695, %v1026_v25  ;;  %v9335_v25 = vld [vmem:[#allocation65_spill] sm:$0xff] }
 0x181   :  { %6145 = vpow2.f32 %v3904_v0  ;;  %v9336_v0 = vld [vmem:[#allocation88_spill] sm:$0xff] }
 0x182   :  { %6147 = vpow2.f32 %v3905_v33  ;;  %v9337_v33 = vld [vmem:[#allocation67_spill] sm:$0xff] }
 0x183   :  { %6149 = vtanh.f32 %v7856_v9 }
 0x184   :  { %6151 = vtanh.f32 %v7858_v18 }
 0x18b   :  { %v6146_v22 = vpop.eup %6145 }
 0x18c   :  { %v6148_v53 = vpop.eup %6147  ;;  %v1059_v3 = vadd.f32 1.0, %v6146_v22  ;;  %v9338_v22 = vld [vmem:[#allocation90_spill] sm:$0xff] }
 0x18d   :  { %v1060_v17 = vadd.f32 1.0, %v6148_v53  ;;  %v6150_v19 = vpop.eup %6149  ;;  %v9339_v53 = vld [vmem:[#allocation69_spill] sm:$0xff] }
 0x18e   :  { %6153 = vrcp.f32 %v1059_v3  ;;  %v6152_v60 = vpop.eup %6151  ;;  %v9340_v3 = vld [vmem:[#allocation92_spill] sm:$0xff] }
 0x18f   :  { %6155 = vrcp.f32 %v1060_v17  ;;  %v9341_v17 = vld [vmem:[#allocation71_spill] sm:$0xff] }
 0x198   :  { %v6154_v54 = vpop.eup %6153 }
 0x199   :  { %v6156_v32 = vpop.eup %6155  ;;  %v7862_v16 = vmul.f32 %v6154_v54, %v6150_v19  ;;  %v9342_v19 = vld [vmem:[#allocation94_spill] sm:$0xff]  ;;  %v9344_v54 = vld [vmem:[#allocation96_spill] sm:$0xff] }
 0x19a   :  { %v1074_v2 = vmul.f32 %v6156_v32, %v6152_v60  ;;  %v9343_v60 = vld [vmem:[#allocation73_spill] sm:$0xff]  ;;  %v9345_v32 = vld [vmem:[#allocation75_spill] sm:$0xff] }
 0x19b   :  { %1075 = vst [vmem:[#allocation3] sm:$0x3] %v7862_v16 }
 0x19c   :  { %v1077_v51 = vrot.slane %v1074_v2, 2  ;;  %1152 = vmatprep.mubr.f32.mxu0 %v1074_v2  ;;  %1223 = vmatprep.mubr.f32.mxu1 %v1074_v2 }
 0x19d   :  { %1153 = vmatmul.mubr.f32.vlgmr.msra.gmra.mrb[8].mxu0 %v7862_v16  ;;  %1224 = vmatmul.mubr.f32.vlgmr.msra.gmra.mrb[16].mxu1 %v7862_v16 }
 0x19e   :  { %1079 = vst [vmem:[#allocation3 + $0x18] sm:$0xc0] %v1077_v51  ;;  %4430 = vmatpush1.bf16.msra.mxu0 %v9329_v36  ;;  %4494 = vmatpush1.bf16.msra.mxu1 %v9330_v23  ;;  %v9347_v51 = vld [vmem:[#allocation77_spill] sm:$0xff] }
 0x19f   :  { %1294 = vmatprep.mubr.f32.mxu0 %v1074_v2  ;;  %1365 = vmatprep.mubr.f32.mxu1 %v1074_v2  ;;  %v9346_v2 = vld [vmem:[#allocation98_spill] sm:$0xff] }
 0x1a0   :  { %4432 = vmatprep.subr.bf16.mxu0 %v9331_v40  ;;  %4496 = vmatprep.subr.bf16.mxu1 %v9332_v26 }
 0x1a2   :  { %4434 = vmatpush1.bf16.msra.mxu0 %v9333_v11  ;;  %4498 = vmatpush1.bf16.msra.mxu1 %v9334_v30 }
 0x1a3   :  { %4436 = vmatprep.subr.bf16.mxu0 %v9335_v25  ;;  %4500 = vmatprep.subr.bf16.mxu1 %v9336_v0 }
 0x1a6   :  { %4438 = vmatpush1.bf16.msra.mxu0 %v9337_v33  ;;  %4502 = vmatpush1.bf16.msra.mxu1 %v9338_v22  ;;  %v9348_v33 = vld [vmem:[#allocation100_spill] sm:$0xff]  ;;  %v9349_v22 = vld [vmem:[#allocation79_spill] sm:$0xff] }
 0x1a7   :  { %4440 = vmatprep.subr.bf16.mxu0 %v9339_v53  ;;  %4504 = vmatprep.subr.bf16.mxu1 %v9340_v3  ;;  %v9350_v53 = vld [vmem:[#allocation102_spill] sm:$0xff]  ;;  %v9351_v3 = vld [vmem:[#allocation81_spill] sm:$0xff] }
 0x1aa   :  { %4442 = vmatpush1.bf16.msra.mxu0 %v9341_v17  ;;  %4506 = vmatpush1.bf16.msra.mxu1 %v9342_v19  ;;  %v9352_v17 = vld [vmem:[#allocation104_spill] sm:$0xff]  ;;  %v9353_v19 = vld [vmem:[#allocation83_spill] sm:$0xff] }
 0x1ab   :  { %4444 = vmatprep.subr.bf16.mxu0 %v9343_v60  ;;  %4508 = vmatprep.subr.bf16.mxu1 %v9344_v54  ;;  %v9354_v60 = vld [vmem:[#allocation106_spill] sm:$0xff]  ;;  %v9355_v54 = vld [vmem:[#allocation85_spill] sm:$0xff] }
 0x1ae   :  { %4446 = vmatpush1.bf16.msra.mxu0 %v9345_v32  ;;  %4510 = vmatpush1.bf16.msra.mxu1 %v9346_v2  ;;  %v9356_v32 = vld [vmem:[#allocation108_spill] sm:$0xff]  ;;  %v9357_v2 = vld [vmem:[#allocation87_spill] sm:$0xff] }
 0x1af   :  { %4448 = vmatprep.subr.bf16.mxu0 %v9347_v51  ;;  %4512 = vmatprep.subr.bf16.mxu1 %v9348_v33  ;;  %v9358_v33 = vld [vmem:[#allocation89_spill] sm:$0xff] }
 0x1b2   :  { %4450 = vmatpush1.bf16.msra.mxu0 %v9349_v22  ;;  %4514 = vmatpush1.bf16.msra.mxu1 %v9350_v53  ;;  %v9359_v53 = vld [vmem:[#allocation91_spill] sm:$0xff] }
 0x1b3   :  { %4452 = vmatprep.subr.bf16.mxu0 %v9351_v3  ;;  %4516 = vmatprep.subr.bf16.mxu1 %v9352_v17  ;;  %v9360_v17 = vld [vmem:[#allocation93_spill] sm:$0xff] }
 0x1b6   :  { %4454 = vmatpush1.bf16.msra.mxu0 %v9353_v19  ;;  %4518 = vmatpush1.bf16.msra.mxu1 %v9354_v60  ;;  %v9361_v60 = vld [vmem:[#allocation95_spill] sm:$0xff] }
 0x1b7   :  { %4456 = vmatprep.subr.bf16.mxu0 %v9355_v54  ;;  %4520 = vmatprep.subr.bf16.mxu1 %v9356_v32  ;;  %v9362_v32 = vld [vmem:[#allocation97_spill] sm:$0xff] }
 0x1ba   :  { %4458 = vmatpush1.bf16.msra.mxu0 %v9357_v2  ;;  %4522 = vmatpush1.bf16.msra.mxu1 %v7598_v45  ;;  %v9363_v45 = vld [vmem:[#allocation99_spill] sm:$0xff] }
 0x1bb   :  { %4460 = vmatprep.subr.bf16.mxu0 %v9358_v33  ;;  %4524 = vmatprep.subr.bf16.mxu1 %v7604_v1  ;;  %v9364_v1 = vld [vmem:[#allocation101_spill] sm:$0xff] }
 0x1be   :  { %4462 = vmatpush1.bf16.msra.mxu0 %v9359_v53  ;;  %4526 = vmatpush1.bf16.msra.mxu1 %v7634_v61  ;;  %v9365_v61 = vld [vmem:[#allocation103_spill] sm:$0xff] }
 0x1bf   :  { %4464 = vmatprep.subr.bf16.mxu0 %v9360_v17  ;;  %4528 = vmatprep.subr.bf16.mxu1 %v7640_v63  ;;  %v9366_v63 = vld [vmem:[#allocation105_spill] sm:$0xff] }
 0x1c2   :  { %4466 = vmatpush1.bf16.msra.mxu0 %v9361_v60  ;;  %4530 = vmatpush1.bf16.msra.mxu1 %v7664_v5  ;;  %v9367_v5 = vld [vmem:[#allocation107_spill] sm:$0xff] }
 0x1c3   :  { %4468 = vmatprep.subr.bf16.mxu0 %v9362_v32  ;;  %4532 = vmatprep.subr.bf16.mxu1 %v7670_v38  ;;  %v9368_v38 = vld [vmem:[#allocation109_spill] sm:$0xff] }
 0x1c6   :  { %4470 = vmatpush1.bf16.msra.mxu0 %v9363_v45  ;;  %4534 = vmatpush1.bf16.msra.mxu1 %v7686_v42  ;;  %v9369_v42 = vld [vmem:[#allocation111_spill] sm:$0xff] }
 0x1c7   :  { %4472 = vmatprep.subr.bf16.mxu0 %v9364_v1  ;;  %4536 = vmatprep.subr.bf16.mxu1 %v7690_v15  ;;  %v9370_v15 = vld [vmem:[#allocation113_spill] sm:$0xff] }
 0x1ca   :  { %4474 = vmatpush1.bf16.msra.mxu0 %v9365_v61  ;;  %4538 = vmatpush1.bf16.msra.mxu1 %v7707_v46 }
 0x1cb   :  { %4476 = vmatprep.subr.bf16.mxu0 %v9366_v63  ;;  %4540 = vmatprep.subr.bf16.mxu1 %v7710_v39  ;;  %v9371_v39 = vld [vmem:[#allocation117_spill] sm:$0xff] }
 0x1ce   :  { %4478 = vmatpush1.bf16.msra.mxu0 %v9367_v5  ;;  %4542 = vmatpush1.bf16.msra.mxu1 %v7727_v28  ;;  %v9372_v28 = vld [vmem:[#allocation119_spill] sm:$0xff] }
 0x1cf   :  { %4480 = vmatprep.subr.bf16.mxu0 %v9368_v38  ;;  %4544 = vmatprep.subr.bf16.mxu1 %v7730_v24  ;;  %v9373_v24 = vld [vmem:[#allocation4_spill] sm:$0xff] }
 0x1d2   :  { %4482 = vmatpush1.bf16.msra.mxu0 %v9369_v42  ;;  %4546 = vmatpush1.bf16.msra.mxu1 %v7747_v43 }
 0x1d3   :  { %4484 = vmatprep.subr.bf16.mxu0 %v9370_v15  ;;  %4548 = vmatprep.subr.bf16.mxu1 %v7750_v14  ;;  %v9374_v14 = vld [vmem:[#allocation5_spill] sm:$0xff] }
 0x1d6   :  { %4486 = vmatpush1.bf16.msra.mxu0 %v7638_v58  ;;  %4550 = vmatpush1.bf16.msra.mxu1 %v7767_v59  ;;  %v9375_v59 = vld [vmem:[#allocation6_spill] sm:$0xff] }
 0x1d7   :  { %4488 = vmatprep.subr.bf16.mxu0 %v9371_v39  ;;  %4552 = vmatprep.subr.bf16.mxu1 %v7770_v44  ;;  %v9376_v44 = vld [vmem:[#allocation7_spill] sm:$0xff] }
 0x1da   :  { %4490 = vmatpush1.bf16.msra.mxu0 %v9372_v28  ;;  %4554 = vmatpush1.bf16.msra.mxu1 %v7781_v4  ;;  %v9377_v4 = vld [vmem:[#allocation8_spill] sm:$0xff] }
 0x1db   :  { %4556 = vmatprep.subr.bf16.mxu0 %v9373_v24  ;;  %4620 = vmatprep.subr.bf16.mxu1 %v6729_v57  ;;  %v9378_v57 = vld [vmem:[#allocation9_spill] sm:$0xff] }
 0x1dd   :  { %1295 = vmatmul.mubr.f32.vlgmr.msra.gmra.mrb[10].mxu0 %v7862_v16  ;;  %1366 = vmatmul.mubr.f32.vlgmr.msra.gmra.mrb[18].mxu1 %v7862_v16  ;;  %v9379_v16 = vld [vmem:[#allocation23_spill] sm:$0xff] }
 0x1de   :  { %4558 = vmatpush1.bf16.msra.mxu0 %v9374_v14  ;;  %4622 = vmatpush1.bf16.msra.mxu1 %v6760_v7 }
 0x1df   :  { %4560 = vmatprep.subr.bf16.mxu0 %v9375_v59  ;;  %4624 = vmatprep.subr.bf16.mxu1 %v6766_v10 }
 0x1e2   :  { %4562 = vmatpush1.bf16.msra.mxu0 %v9376_v44  ;;  %4626 = vmatpush1.bf16.msra.mxu1 %v6798_v20 }
 0x1e3   :  { %4564 = vmatprep.subr.bf16.mxu0 %v9377_v4  ;;  %4628 = vmatprep.subr.bf16.mxu1 %v6805_v50 }
 0x1e6   :  { %4566 = vmatpush1.bf16.msra.mxu0 %v9378_v57  ;;  %4630 = vmatpush1.bf16.msra.mxu1 %v6837_v35 }
 0x1e7   :  { %4568 = vmatprep.subr.bf16.mxu0 %v6636_v21  ;;  %4632 = vmatprep.subr.bf16.mxu1 %v6844_v37  ;;  %v1445_v37 = vrot.slane %v7858_v18, 6 }
 0x1ea   :  { %4570 = vmatpush1.bf16.msra.mxu0 %v6659_v29  ;;  %4634 = vmatpush1.bf16.msra.mxu1 %v6874_v49 }
 0x1eb   :  { %4572 = vmatprep.subr.bf16.mxu0 %v6671_v34  ;;  %4636 = vmatprep.subr.bf16.mxu1 %v6880_v52  ;;  %v1083_v34 = vld [vmem:[#allocation2 + $0x18] sm:$0xc] }
 0x1ee   :  { %4574 = vmatpush1.bf16.msra.mxu0 %v6692_v41  ;;  %4638 = vmatpush1.bf16.msra.mxu1 %v6910_v6 }
 0x1ef   :  { %4576 = vmatprep.subr.bf16.mxu0 %v6704_v47  ;;  %4640 = vmatprep.subr.bf16.mxu1 %v6916_v12  ;;  %v9380_v47 = vld [vmem:[#allocation46_spill] sm:$0xff]  ;;  %v9381_v12 = vld [vmem:[#allocation25_spill] sm:$0xff] }
 0x1f2   :  { %4578 = vmatpush1.bf16.msra.mxu0 %v6727_v56  ;;  %4642 = vmatpush1.bf16.msra.mxu1 %v6946_v27  ;;  %v9382_v56 = vld [vmem:[#allocation48_spill] sm:$0xff]  ;;  %v9383_v27 = vld [vmem:[#allocation27_spill] sm:$0xff] }
 0x1f3   :  { %4580 = vmatprep.subr.bf16.mxu0 %v6741_v62  ;;  %4644 = vmatprep.subr.bf16.mxu1 %v6952_v31  ;;  %v9384_v62 = vld [vmem:[#allocation50_spill] sm:$0xff]  ;;  %v9385_v31 = vld [vmem:[#allocation29_spill] sm:$0xff] }
 0x1f6   :  { %4582 = vmatpush1.bf16.msra.mxu0 %v6764_v8  ;;  %4646 = vmatpush1.bf16.msra.mxu1 %v6982_v48  ;;  %v9386_v8 = vld [vmem:[#allocation52_spill] sm:$0xff]  ;;  %v9387_v48 = vld [vmem:[#allocation31_spill] sm:$0xff] }
 0x1f7   :  { %4584 = vmatprep.subr.bf16.mxu0 %v6778_v13  ;;  %4648 = vmatprep.subr.bf16.mxu1 %v6988_v55  ;;  %v9388_v13 = vld [vmem:[#allocation54_spill] sm:$0xff]  ;;  %v9389_v55 = vld [vmem:[#allocation33_spill] sm:$0xff] }
 0x1fa   :  { %4586 = vmatpush1.bf16.msra.mxu0 %v9379_v16  ;;  %4650 = vmatpush1.bf16.msra.mxu1 %v9380_v47  ;;  %v9390_v16 = vld [vmem:[#allocation56_spill] sm:$0xff]  ;;  %v9391_v47 = vld [vmem:[#allocation35_spill] sm:$0xff] }
 0x1fb   :  { %4588 = vmatprep.subr.bf16.mxu0 %v9381_v12  ;;  %4652 = vmatprep.subr.bf16.mxu1 %v9382_v56  ;;  %v9392_v12 = vld [vmem:[#allocation58_spill] sm:$0xff]  ;;  %v9393_v56 = vld [vmem:[#allocation37_spill] sm:$0xff] }
 0x1fe   :  { %4590 = vmatpush1.bf16.msra.mxu0 %v9383_v27  ;;  %4654 = vmatpush1.bf16.msra.mxu1 %v9384_v62  ;;  %v9394_v27 = vld [vmem:[#allocation60_spill] sm:$0xff]  ;;  %v9395_v62 = vld [vmem:[#allocation39_spill] sm:$0xff] }
 0x1ff   :  { %4592 = vmatprep.subr.bf16.mxu0 %v9385_v31  ;;  %4656 = vmatprep.subr.bf16.mxu1 %v9386_v8  ;;  %v9396_v31 = vld [vmem:[#allocation62_spill] sm:$0xff]  ;;  %v9397_v8 = vld [vmem:[#allocation41_spill] sm:$0xff] }
 0x202   :  { %4594 = vmatpush1.bf16.msra.mxu0 %v9387_v48  ;;  %4658 = vmatpush1.bf16.msra.mxu1 %v9388_v13  ;;  %v9398_v48 = vld [vmem:[#allocation64_spill] sm:$0xff]  ;;  %v9399_v13 = vld [vmem:[#allocation43_spill] sm:$0xff] }
 0x203   :  { %4596 = vmatprep.subr.bf16.mxu0 %v9389_v55  ;;  %4660 = vmatprep.subr.bf16.mxu1 %v9390_v16  ;;  %v9400_v55 = vld [vmem:[#allocation66_spill] sm:$0xff]  ;;  %v9401_v16 = vld [vmem:[#allocation45_spill] sm:$0xff] }
 0x206   :  { %4598 = vmatpush1.bf16.msra.mxu0 %v9391_v47  ;;  %4662 = vmatpush1.bf16.msra.mxu1 %v9392_v12  ;;  %v9402_v47 = vld [vmem:[#allocation68_spill] sm:$0xff]  ;;  %v9403_v12 = vld [vmem:[#allocation47_spill] sm:$0xff] }
 0x207   :  { %4600 = vmatprep.subr.bf16.mxu0 %v9393_v56  ;;  %4664 = vmatprep.subr.bf16.mxu1 %v9394_v27  ;;  %v9404_v56 = vld [vmem:[#allocation70_spill] sm:$0xff]  ;;  %v9405_v27 = vld [vmem:[#allocation49_spill] sm:$0xff] }
 0x20a   :  { %4602 = vmatpush1.bf16.msra.mxu0 %v9395_v62  ;;  %4666 = vmatpush1.bf16.msra.mxu1 %v9396_v31  ;;  %v9406_v62 = vld [vmem:[#allocation72_spill] sm:$0xff]  ;;  %v9407_v31 = vld [vmem:[#allocation51_spill] sm:$0xff] }
 0x20b   :  { %4604 = vmatprep.subr.bf16.mxu0 %v9397_v8  ;;  %4668 = vmatprep.subr.bf16.mxu1 %v9398_v48  ;;  %v9408_v8 = vld [vmem:[#allocation74_spill] sm:$0xff]  ;;  %v9409_v48 = vld [vmem:[#allocation53_spill] sm:$0xff] }
 0x20e   :  { %4606 = vmatpush1.bf16.msra.mxu0 %v9399_v13  ;;  %4670 = vmatpush1.bf16.msra.mxu1 %v9400_v55  ;;  %v9410_v13 = vld [vmem:[#allocation76_spill] sm:$0xff]  ;;  %v9411_v55 = vld [vmem:[#allocation55_spill] sm:$0xff] }
 0x20f   :  { %4608 = vmatprep.subr.bf16.mxu0 %v9401_v16  ;;  %4672 = vmatprep.subr.bf16.mxu1 %v9402_v47  ;;  %v9412_v16 = vld [vmem:[#allocation78_spill] sm:$0xff]  ;;  %v9413_v47 = vld [vmem:[#allocation57_spill] sm:$0xff] }
 0x212   :  { %4610 = vmatpush1.bf16.msra.mxu0 %v9403_v12  ;;  %4674 = vmatpush1.bf16.msra.mxu1 %v9404_v56  ;;  %v9414_v12 = vld [vmem:[#allocation80_spill] sm:$0xff] }
 0x213   :  { %4612 = vmatprep.subr.bf16.mxu0 %v9405_v27  ;;  %4676 = vmatprep.subr.bf16.mxu1 %v9406_v62 }
 0x216   :  { %4614 = vmatpush1.bf16.msra.mxu0 %v9407_v31  ;;  %4678 = vmatpush1.bf16.msra.mxu1 %v9408_v8  ;;  %v1082_v31 = vld [vmem:[#allocation2 + $0x10] sm:$0xc] }
 0x217   :  { %4616 = vmatprep.subr.bf16.mxu0 %v9409_v48  ;;  %4680 = vmatprep.subr.bf16.mxu1 %v9410_v13 }
 0x21a   :  { %4618 = vmatpush1.bf16.msra.mxu0 %v9411_v55  ;;  %4682 = vmatpush1.bf16.msra.mxu1 %v9412_v16 }
 0x21b   :  { %4684 = vmatprep.subr.bf16.mxu0 %v9413_v47  ;;  %4748 = vmatprep.subr.bf16.mxu1 %v9414_v12  ;;  %v1444_v12 = vrot.slane %v7856_v9, 6 }
 0x270   :  { %v1154_v56 = vpop.f32.mrb[8].mxu0  ;;  %v1225_v27 = vpop.f32.mrb[16].mxu1 }
 0x271   :  { %v1382_v6 = vrot.slane %v1225_v27, 6  ;;  %v1156_v62 = vpop.f32.mrb[9].mxu0  ;;  %v1227_v41 = vpop.f32.mrb[17].mxu1 }
 0x272   :  { %v1383_v52 = vrot.slane %v1227_v41, 6 }
 0x273   :  { %v1398_v8 = vadd.f32 %v1382_v6, %v1082_v31  ;;  %v1380_v31 = vrot.slane %v1154_v56, 6  ;;  %v1084_v56 = vld [vmem:[#allocation2 + $0x20] sm:$0xc] }
 0x274   :  { %v1399_v48 = vadd.f32 %v1383_v52, %v1083_v34  ;;  %v1381_v34 = vrot.slane %v1156_v62, 6  ;;  %v1086_v62 = vld [vmem:[#allocation2 + $0x30] sm:$0xc] }
 0x275   :  { %v3908_v49 = vmul.f32 -1.442695, %v1398_v8  ;;  %v1080_v8 = vld [vmem:[#allocation2] sm:$0xc] }
 0x276   :  { %v3909_v13 = vmul.f32 -1.442695, %v1399_v48  ;;  %v1396_v52 = vadd.f32 %v1380_v31, %v1080_v8 }
 0x277   :  { %6157 = vpow2.f32 %v3908_v49  ;;  %v1081_v49 = vld [vmem:[#allocation2 + $0x8] sm:$0xc] }
 0x278   :  { %6159 = vpow2.f32 %v3909_v13  ;;  %v1397_v13 = vadd.f32 %v1381_v34, %v1081_v49  ;;  %v3906_v48 = vmul.f32 -1.442695, %v1396_v52  ;;  %v1085_v52 = vld [vmem:[#allocation2 + $0x28] sm:$0xc]  ;;  %v1087_v49 = vld [vmem:[#allocation2 + $0x38] sm:$0xc] }
 0x281   :  { %v6158_v55 = vpop.eup %6157 }
 0x282   :  { %v1422_v16 = vadd.f32 1.0, %v6158_v55  ;;  %v6160_v29 = vpop.eup %6159  ;;  %v3907_v55 = vmul.f32 -1.442695, %v1397_v13 }
 0x283   :  { %v1423_v47 = vadd.f32 1.0, %v6160_v29 }
 0x284   :  { %6161 = vrcp.f32 %v1422_v16 }
 0x285   :  { %6163 = vrcp.f32 %v1423_v47 }
 0x286   :  { %6165 = vpow2.f32 %v3906_v48 }
 0x287   :  { %6167 = vpow2.f32 %v3907_v55 }
 0x28e   :  { %v6162_v27 = vpop.eup %6161 }
 0x28f   :  { %v1448_v21 = vmul.f32 %v6162_v27, %v1444_v12  ;;  %v6164_v41 = vpop.eup %6163 }
 0x290   :  { %v1449_v6 = vmul.f32 %v6164_v41, %v1445_v37  ;;  %v6166_v29 = vpop.eup %6165 }
 0x291   :  { %v6168_v47 = vpop.eup %6167  ;;  %v1410_v16 = vadd.f32 1.0, %v6166_v29 }
 0x292   :  { %v1411_v9 = vadd.f32 1.0, %v6168_v47 }
 0x293   :  { %6169 = vrcp.f32 %v1410_v16 }
 0x294   :  { %6171 = vrcp.f32 %v1411_v9 }
 0x2b0   :  { %v1296_v35 = vpop.f32.mrb[10].mxu0  ;;  %v1367_v57 = vpop.f32.mrb[18].mxu1 }
 0x2b1   :  { %v1384_v18 = vrot.slane %v1296_v35, 6  ;;  %v1386_v12 = vrot.slane %v1367_v57, 6  ;;  %v1298_v27 = vpop.f32.mrb[11].mxu0  ;;  %v1369_v37 = vpop.f32.mrb[19].mxu1 }
 0x2b2   :  { %v1385_v41 = vrot.slane %v1298_v27, 6  ;;  %v1387_v31 = vrot.slane %v1369_v37, 6  ;;  %v6170_v57 = vpop.eup %6169 }
 0x2b3   :  { %v1400_v34 = vadd.f32 %v1384_v18, %v1084_v56  ;;  %v1402_v8 = vadd.f32 %v1386_v12, %v1086_v62  ;;  %v6172_v35 = vpop.eup %6171 }
 0x2b4   :  { %v1401_v13 = vadd.f32 %v1385_v41, %v1085_v52  ;;  %v1403_v48 = vadd.f32 %v1387_v31, %v1087_v49 }
 0x2b5   :  { %6173 = vtanh.f32 %v1400_v34  ;;  %v3910_v55 = vmul.f32 -1.442695, %v1402_v8 }
 0x2b6   :  { %6175 = vtanh.f32 %v1401_v13  ;;  %v3911_v29 = vmul.f32 -1.442695, %v1403_v48  ;;  %v9416_v48 = vld [vmem:[#allocation90_spill] sm:$0xff] }
 0x2b7   :  { %6177 = vpow2.f32 %v3910_v55  ;;  %v9417_v55 = vld [vmem:[#allocation69_spill] sm:$0xff] }
 0x2b8   :  { %6179 = vpow2.f32 %v3911_v29  ;;  %v9418_v29 = vld [vmem:[#allocation92_spill] sm:$0xff] }
 0x2bf   :  { %v6174_v47 = vpop.eup %6173 }
 0x2c0   :  { %v6176_v50 = vpop.eup %6175  ;;  %v1450_v27 = vmul.f32 %v6174_v47, %v6170_v57  ;;  %v9419_v57 = vld [vmem:[#allocation71_spill] sm:$0xff]  ;;  %v9421_v47 = vld [vmem:[#allocation73_spill] sm:$0xff] }
 0x2c1   :  { %v6178_v37 = vpop.eup %6177  ;;  %v1451_v16 = vmul.f32 %v6176_v50, %v6172_v35  ;;  %v9420_v35 = vld [vmem:[#allocation94_spill] sm:$0xff] }
 0x2c2   :  { %v6180_v18 = vpop.eup %6179  ;;  %v7999_v12 = vadd.f32 %v1450_v27, %v1448_v21  ;;  %v1436_v56 = vadd.f32 1.0, %v6178_v37  ;;  %v9422_v27 = vld [vmem:[#allocation96_spill] sm:$0xff]  ;;  %v9423_v37 = vld [vmem:[#allocation75_spill] sm:$0xff] }
 0x2c3   :  { %v8001_v9 = vadd.f32 %v1451_v16, %v1449_v6  ;;  %v1437_v62 = vadd.f32 1.0, %v6180_v18  ;;  %v9415_v6 = vld [vmem:[#allocation67_spill] sm:$0xff]  ;;  %v9424_v16 = vld [vmem:[#allocation98_spill] sm:$0xff]  ;;  %v9425_v18 = vld [vmem:[#allocation100_spill] sm:$0xff] }
 0x2c4   :  { %6181 = vtanh.f32 %v7999_v12 }
 0x2c5   :  { %6183 = vrcp.f32 %v1436_v56  ;;  %v9426_v56 = vld [vmem:[#allocation102_spill] sm:$0xff] }
 0x2c6   :  { %6185 = vtanh.f32 %v8001_v9 }
 0x2c7   :  { %6187 = vrcp.f32 %v1437_v62  ;;  %v9427_v62 = vld [vmem:[#allocation104_spill] sm:$0xff] }
 0x2ce   :  { %v6182_v41 = vpop.eup %6181 }
 0x2cf   :  { %v6184_v31 = vpop.eup %6183 }
 0x2d0   :  { %v6186_v34 = vpop.eup %6185  ;;  %v1456_v8 = vmul.f32 %v6184_v31, %v6182_v41  ;;  %v9428_v41 = vld [vmem:[#allocation106_spill] sm:$0xff]  ;;  %v9429_v31 = vld [vmem:[#allocation108_spill] sm:$0xff] }
 0x2d1   :  { %v6188_v52 = vpop.eup %6187 }
 0x2d2   :  { %v1457_v49 = vmul.f32 %v6188_v52, %v6186_v34  ;;  %1458 = vst [vmem:[#allocation3] sm:$0xc] %v1456_v8  ;;  %v8005_v13 = vrot.slane %v1456_v8, 2  ;;  %v9430_v34 = vld [vmem:[#allocation110_spill] sm:$0xff]  ;;  %v9431_v8 = vld [vmem:[#allocation112_spill] sm:$0xff] }
 0x2d3   :  { %v9432_v52 = vld [vmem:[#allocation114_spill] sm:$0xff] }
 0x2d4   :  { %v1460_v50 = vrot.slane %v1457_v49, 6  ;;  %v1473_v21 = vrot.slane %v1457_v49, 2  ;;  %v9433_v49 = vld [vmem:[#allocation116_spill] sm:$0xff] }
 0x2d6   :  { %1462 = vst [vmem:[#allocation3 + $0x18] sm:$0x30] %v1460_v50  ;;  %1540 = vmatprep.mubr.f32.mxu0 %v1473_v21  ;;  %1611 = vmatprep.mubr.f32.mxu1 %v1473_v21  ;;  %v9434_v50 = vld [vmem:[#allocation118_spill] sm:$0xff] }
 0x2d7   :  { %1541 = vmatmul.mubr.f32.vlgmr.msra.gmra.mrb[12].mxu0 %v8005_v13  ;;  %1612 = vmatmul.mubr.f32.vlgmr.msra.gmra.mrb[20].mxu1 %v8005_v13 }
 0x2d8   :  { %4686 = vmatpush1.bf16.msra.mxu0 %v9329_v36  ;;  %4750 = vmatpush1.bf16.msra.mxu1 %v9330_v23 }
 0x2d9   :  { %1682 = vmatprep.mubr.f32.mxu0 %v1473_v21  ;;  %1753 = vmatprep.mubr.f32.mxu1 %v1473_v21  ;;  %v9435_v21 = vld [vmem:[#allocation120_spill] sm:$0xff] }
 0x2da   :  { %4688 = vmatprep.subr.bf16.mxu0 %v9331_v40  ;;  %4752 = vmatprep.subr.bf16.mxu1 %v9332_v26 }
 0x2dc   :  { %4690 = vmatpush1.bf16.msra.mxu0 %v9333_v11  ;;  %4754 = vmatpush1.bf16.msra.mxu1 %v9334_v30 }
 0x2dd   :  { %4692 = vmatprep.subr.bf16.mxu0 %v9335_v25  ;;  %4756 = vmatprep.subr.bf16.mxu1 %v9336_v0 }
 0x2e0   :  { %4694 = vmatpush1.bf16.msra.mxu0 %v9415_v6  ;;  %4758 = vmatpush1.bf16.msra.mxu1 %v9416_v48 }
 0x2e1   :  { %4696 = vmatprep.subr.bf16.mxu0 %v9417_v55  ;;  %4760 = vmatprep.subr.bf16.mxu1 %v9418_v29 }
 0x2e4   :  { %4698 = vmatpush1.bf16.msra.mxu0 %v9419_v57  ;;  %4762 = vmatpush1.bf16.msra.mxu1 %v9420_v35 }
 0x2e5   :  { %4700 = vmatprep.subr.bf16.mxu0 %v9421_v47  ;;  %4764 = vmatprep.subr.bf16.mxu1 %v9422_v27 }
 0x2e8   :  { %4702 = vmatpush1.bf16.msra.mxu0 %v9423_v37  ;;  %4766 = vmatpush1.bf16.msra.mxu1 %v9424_v16 }
 0x2e9   :  { %4704 = vmatprep.subr.bf16.mxu0 %v9347_v51  ;;  %4768 = vmatprep.subr.bf16.mxu1 %v9425_v18 }
 0x2ec   :  { %4706 = vmatpush1.bf16.msra.mxu0 %v9349_v22  ;;  %4770 = vmatpush1.bf16.msra.mxu1 %v9426_v56 }
 0x2ed   :  { %4708 = vmatprep.subr.bf16.mxu0 %v9351_v3  ;;  %4772 = vmatprep.subr.bf16.mxu1 %v9427_v62 }
 0x2f0   :  { %4710 = vmatpush1.bf16.msra.mxu0 %v9353_v19  ;;  %4774 = vmatpush1.bf16.msra.mxu1 %v9428_v41 }
 0x2f1   :  { %4712 = vmatprep.subr.bf16.mxu0 %v9355_v54  ;;  %4776 = vmatprep.subr.bf16.mxu1 %v9429_v31 }
 0x2f4   :  { %4714 = vmatpush1.bf16.msra.mxu0 %v9357_v2  ;;  %4778 = vmatpush1.bf16.msra.mxu1 %v9430_v34 }
 0x2f5   :  { %4716 = vmatprep.subr.bf16.mxu0 %v9358_v33  ;;  %4780 = vmatprep.subr.bf16.mxu1 %v9431_v8  ;;  %v9436_v33 = vld [vmem:[#allocation121_spill] sm:$0xff] }
 0x2f8   :  { %4718 = vmatpush1.bf16.msra.mxu0 %v9359_v53  ;;  %4782 = vmatpush1.bf16.msra.mxu1 %v9432_v52  ;;  %v9437_v53 = vld [vmem:[#allocation122_spill] sm:$0xff] }
 0x2f9   :  { %4720 = vmatprep.subr.bf16.mxu0 %v9360_v17  ;;  %4784 = vmatprep.subr.bf16.mxu1 %v9433_v49 }
 0x2fc   :  { %4722 = vmatpush1.bf16.msra.mxu0 %v9361_v60  ;;  %4786 = vmatpush1.bf16.msra.mxu1 %v9434_v50  ;;  %v9438_v60 = vld [vmem:[#allocation124_spill] sm:$0xff] }
 0x2fd   :  { %4724 = vmatprep.subr.bf16.mxu0 %v9362_v32  ;;  %4788 = vmatprep.subr.bf16.mxu1 %v9435_v21  ;;  %v9439_v32 = vld [vmem:[#allocation125_spill] sm:$0xff] }
 0x300   :  { %4726 = vmatpush1.bf16.msra.mxu0 %v9363_v45  ;;  %4790 = vmatpush1.bf16.msra.mxu1 %v9436_v33  ;;  %v9440_v45 = vld [vmem:[#allocation126_spill] sm:$0xff] }
 0x301   :  { %4728 = vmatprep.subr.bf16.mxu0 %v9364_v1  ;;  %4792 = vmatprep.subr.bf16.mxu1 %v9437_v53 }
 0x304   :  { %4730 = vmatpush1.bf16.msra.mxu0 %v9365_v61  ;;  %4794 = vmatpush1.bf16.msra.mxu1 %v7707_v46  ;;  %v9441_v61 = vld [vmem:[#allocation128_spill] sm:$0xff] }
 0x305   :  { %4732 = vmatprep.subr.bf16.mxu0 %v9366_v63  ;;  %4796 = vmatprep.subr.bf16.mxu1 %v9438_v60  ;;  %v9442_v63 = vld [vmem:[#allocation129_spill] sm:$0xff] }
 0x308   :  { %4734 = vmatpush1.bf16.msra.mxu0 %v9367_v5  ;;  %4798 = vmatpush1.bf16.msra.mxu1 %v9439_v32  ;;  %v9443_v5 = vld [vmem:[#allocation130_spill] sm:$0xff] }
 0x309   :  { %4736 = vmatprep.subr.bf16.mxu0 %v9368_v38  ;;  %4800 = vmatprep.subr.bf16.mxu1 %v9440_v45  ;;  %v9444_v38 = vld [vmem:[#allocation131_spill] sm:$0xff] }
 0x30c   :  { %4738 = vmatpush1.bf16.msra.mxu0 %v9369_v42  ;;  %4802 = vmatpush1.bf16.msra.mxu1 %v7747_v43  ;;  %v9445_v42 = vld [vmem:[#allocation16_spill] sm:$0xff] }
 0x30d   :  { %4740 = vmatprep.subr.bf16.mxu0 %v9370_v15  ;;  %4804 = vmatprep.subr.bf16.mxu1 %v9441_v61  ;;  %v1833_v15 = vrot.slane %v8001_v9, 6 }
 0x310   :  { %4742 = vmatpush1.bf16.msra.mxu0 %v7638_v58  ;;  %4806 = vmatpush1.bf16.msra.mxu1 %v9442_v63  ;;  %v1466_v63 = vld [vmem:[#allocation2 + $0x18] sm:$0x30] }
 0x311   :  { %4744 = vmatprep.subr.bf16.mxu0 %v9371_v39  ;;  %4808 = vmatprep.subr.bf16.mxu1 %v9443_v5 }
 0x314   :  { %4746 = vmatpush1.bf16.msra.mxu0 %v9372_v28  ;;  %4810 = vmatpush1.bf16.msra.mxu1 %v9444_v38  ;;  %v9448_v38 = vld [vmem:[#allocation26_spill] sm:$0xff] }
 0x315   :  { %4812 = vmatprep.subr.bf16.mxu0 %v9373_v24  ;;  %4876 = vmatprep.subr.bf16.mxu1 %v9445_v42  ;;  %v9446_v24 = vld [vmem:[#allocation24_spill] sm:$0xff]  ;;  %v9447_v42 = vld [vmem:[#allocation9_spill] sm:$0xff] }
 0x317   :  { %1683 = vmatmul.mubr.f32.vlgmr.msra.gmra.mrb[14].mxu0 %v8005_v13  ;;  %1754 = vmatmul.mubr.f32.vlgmr.msra.gmra.mrb[22].mxu1 %v8005_v13  ;;  %v9449_v13 = vld [vmem:[#allocation10_spill] sm:$0xff] }
 0x318   :  { %4814 = vmatpush1.bf16.msra.mxu0 %v9374_v14  ;;  %4878 = vmatpush1.bf16.msra.mxu1 %v6760_v7  ;;  %v9450_v14 = vld [vmem:[#allocation28_spill] sm:$0xff]  ;;  %v9451_v7 = vld [vmem:[#allocation11_spill] sm:$0xff] }
 0x319   :  { %4816 = vmatprep.subr.bf16.mxu0 %v9375_v59  ;;  %4880 = vmatprep.subr.bf16.mxu1 %v6766_v10  ;;  %v9452_v59 = vld [vmem:[#allocation30_spill] sm:$0xff]  ;;  %v9453_v10 = vld [vmem:[#allocation12_spill] sm:$0xff] }
 0x31c   :  { %4818 = vmatpush1.bf16.msra.mxu0 %v9376_v44  ;;  %4882 = vmatpush1.bf16.msra.mxu1 %v6798_v20  ;;  %v9454_v44 = vld [vmem:[#allocation32_spill] sm:$0xff]  ;;  %v9455_v20 = vld [vmem:[#allocation13_spill] sm:$0xff] }
 0x31d   :  { %4820 = vmatprep.subr.bf16.mxu0 %v9377_v4  ;;  %4884 = vmatprep.subr.bf16.mxu1 %v9446_v24  ;;  %v9456_v4 = vld [vmem:[#allocation34_spill] sm:$0xff] }
 0x31e   :  { %v9457_v24 = vld [vmem:[#allocation14_spill] sm:$0xff] }
 0x320   :  { %4822 = vmatpush1.bf16.msra.mxu0 %v9447_v42  ;;  %4886 = vmatpush1.bf16.msra.mxu1 %v9448_v38  ;;  %v9458_v42 = vld [vmem:[#allocation36_spill] sm:$0xff]  ;;  %v9459_v38 = vld [vmem:[#allocation15_spill] sm:$0xff] }
 0x321   :  { %4824 = vmatprep.subr.bf16.mxu0 %v9449_v13  ;;  %4888 = vmatprep.subr.bf16.mxu1 %v9450_v14  ;;  %v9460_v13 = vld [vmem:[#allocation38_spill] sm:$0xff]  ;;  %v9461_v14 = vld [vmem:[#allocation17_spill] sm:$0xff] }
 0x324   :  { %4826 = vmatpush1.bf16.msra.mxu0 %v9451_v7  ;;  %4890 = vmatpush1.bf16.msra.mxu1 %v9452_v59  ;;  %v9462_v7 = vld [vmem:[#allocation40_spill] sm:$0xff]  ;;  %v9463_v59 = vld [vmem:[#allocation19_spill] sm:$0xff] }
 0x325   :  { %4828 = vmatprep.subr.bf16.mxu0 %v9453_v10  ;;  %4892 = vmatprep.subr.bf16.mxu1 %v9454_v44  ;;  %v9464_v10 = vld [vmem:[#allocation42_spill] sm:$0xff]  ;;  %v9465_v44 = vld [vmem:[#allocation21_spill] sm:$0xff] }
 0x328   :  { %4830 = vmatpush1.bf16.msra.mxu0 %v9455_v20  ;;  %4894 = vmatpush1.bf16.msra.mxu1 %v9456_v4  ;;  %v9466_v20 = vld [vmem:[#allocation44_spill] sm:$0xff]  ;;  %v9467_v4 = vld [vmem:[#allocation23_spill] sm:$0xff] }
 0x329   :  { %4832 = vmatprep.subr.bf16.mxu0 %v9457_v24  ;;  %4896 = vmatprep.subr.bf16.mxu1 %v9458_v42  ;;  %v9468_v24 = vld [vmem:[#allocation46_spill] sm:$0xff]  ;;  %v9469_v42 = vld [vmem:[#allocation25_spill] sm:$0xff] }
 0x32c   :  { %4834 = vmatpush1.bf16.msra.mxu0 %v9459_v38  ;;  %4898 = vmatpush1.bf16.msra.mxu1 %v9460_v13  ;;  %v9470_v38 = vld [vmem:[#allocation48_spill] sm:$0xff]  ;;  %v9471_v13 = vld [vmem:[#allocation27_spill] sm:$0xff] }
 0x32d   :  { %4836 = vmatprep.subr.bf16.mxu0 %v9461_v14  ;;  %4900 = vmatprep.subr.bf16.mxu1 %v9462_v7  ;;  %v9472_v14 = vld [vmem:[#allocation50_spill] sm:$0xff]  ;;  %v9473_v7 = vld [vmem:[#allocation29_spill] sm:$0xff] }
 0x330   :  { %4838 = vmatpush1.bf16.msra.mxu0 %v9463_v59  ;;  %4902 = vmatpush1.bf16.msra.mxu1 %v9464_v10  ;;  %v9474_v59 = vld [vmem:[#allocation52_spill] sm:$0xff]  ;;  %v9475_v10 = vld [vmem:[#allocation31_spill] sm:$0xff] }
 0x331   :  { %4840 = vmatprep.subr.bf16.mxu0 %v9465_v44  ;;  %4904 = vmatprep.subr.bf16.mxu1 %v9466_v20  ;;  %v9476_v44 = vld [vmem:[#allocation54_spill] sm:$0xff]  ;;  %v9477_v20 = vld [vmem:[#allocation33_spill] sm:$0xff] }
 0x334   :  { %4842 = vmatpush1.bf16.msra.mxu0 %v9467_v4  ;;  %4906 = vmatpush1.bf16.msra.mxu1 %v9468_v24  ;;  %v9478_v4 = vld [vmem:[#allocation56_spill] sm:$0xff]  ;;  %v9479_v24 = vld [vmem:[#allocation35_spill] sm:$0xff] }
 0x335   :  { %4844 = vmatprep.subr.bf16.mxu0 %v9469_v42  ;;  %4908 = vmatprep.subr.bf16.mxu1 %v9470_v38  ;;  %v9480_v42 = vld [vmem:[#allocation58_spill] sm:$0xff]  ;;  %v9481_v38 = vld [vmem:[#allocation37_spill] sm:$0xff] }
 0x338   :  { %4846 = vmatpush1.bf16.msra.mxu0 %v9471_v13  ;;  %4910 = vmatpush1.bf16.msra.mxu1 %v9472_v14  ;;  %v9482_v13 = vld [vmem:[#allocation60_spill] sm:$0xff]  ;;  %v9483_v14 = vld [vmem:[#allocation39_spill] sm:$0xff] }
 0x339   :  { %4848 = vmatprep.subr.bf16.mxu0 %v9473_v7  ;;  %4912 = vmatprep.subr.bf16.mxu1 %v9474_v59  ;;  %v9484_v7 = vld [vmem:[#allocation62_spill] sm:$0xff]  ;;  %v9485_v59 = vld [vmem:[#allocation41_spill] sm:$0xff] }
 0x33c   :  { %4850 = vmatpush1.bf16.msra.mxu0 %v9475_v10  ;;  %4914 = vmatpush1.bf16.msra.mxu1 %v9476_v44  ;;  %v9486_v10 = vld [vmem:[#allocation64_spill] sm:$0xff]  ;;  %v9487_v44 = vld [vmem:[#allocation43_spill] sm:$0xff] }
 0x33d   :  { %4852 = vmatprep.subr.bf16.mxu0 %v9477_v20  ;;  %4916 = vmatprep.subr.bf16.mxu1 %v9478_v4  ;;  %v9488_v20 = vld [vmem:[#allocation66_spill] sm:$0xff]  ;;  %v9489_v4 = vld [vmem:[#allocation45_spill] sm:$0xff] }
 0x340   :  { %4854 = vmatpush1.bf16.msra.mxu0 %v9479_v24  ;;  %4918 = vmatpush1.bf16.msra.mxu1 %v9480_v42  ;;  %v9490_v24 = vld [vmem:[#allocation68_spill] sm:$0xff]  ;;  %v9491_v42 = vld [vmem:[#allocation47_spill] sm:$0xff] }
 0x341   :  { %4856 = vmatprep.subr.bf16.mxu0 %v9481_v38  ;;  %4920 = vmatprep.subr.bf16.mxu1 %v9482_v13  ;;  %v9492_v38 = vld [vmem:[#allocation70_spill] sm:$0xff]  ;;  %v9493_v13 = vld [vmem:[#allocation49_spill] sm:$0xff] }
 0x344   :  { %4858 = vmatpush1.bf16.msra.mxu0 %v9483_v14  ;;  %4922 = vmatpush1.bf16.msra.mxu1 %v9484_v7  ;;  %v9494_v14 = vld [vmem:[#allocation72_spill] sm:$0xff]  ;;  %v9495_v7 = vld [vmem:[#allocation51_spill] sm:$0xff] }
 0x345   :  { %4860 = vmatprep.subr.bf16.mxu0 %v9485_v59  ;;  %4924 = vmatprep.subr.bf16.mxu1 %v9486_v10  ;;  %v9496_v59 = vld [vmem:[#allocation74_spill] sm:$0xff]  ;;  %v9497_v10 = vld [vmem:[#allocation53_spill] sm:$0xff] }
 0x348   :  { %4862 = vmatpush1.bf16.msra.mxu0 %v9487_v44  ;;  %4926 = vmatpush1.bf16.msra.mxu1 %v9488_v20  ;;  %v9498_v44 = vld [vmem:[#allocation76_spill] sm:$0xff]  ;;  %v9499_v20 = vld [vmem:[#allocation55_spill] sm:$0xff] }
 0x349   :  { %4864 = vmatprep.subr.bf16.mxu0 %v9489_v4  ;;  %4928 = vmatprep.subr.bf16.mxu1 %v9490_v24  ;;  %v9500_v4 = vld [vmem:[#allocation78_spill] sm:$0xff]  ;;  %v9501_v24 = vld [vmem:[#allocation57_spill] sm:$0xff] }
 0x34c   :  { %4866 = vmatpush1.bf16.msra.mxu0 %v9491_v42  ;;  %4930 = vmatpush1.bf16.msra.mxu1 %v9492_v38  ;;  %v9502_v42 = vld [vmem:[#allocation80_spill] sm:$0xff] }
 0x34d   :  { %4868 = vmatprep.subr.bf16.mxu0 %v9493_v13  ;;  %4932 = vmatprep.subr.bf16.mxu1 %v9494_v14 }
 0x350   :  { %4870 = vmatpush1.bf16.msra.mxu0 %v9495_v7  ;;  %4934 = vmatpush1.bf16.msra.mxu1 %v9496_v59  ;;  %v1465_v7 = vld [vmem:[#allocation2 + $0x10] sm:$0x30] }
 0x351   :  { %4872 = vmatprep.subr.bf16.mxu0 %v9497_v10  ;;  %4936 = vmatprep.subr.bf16.mxu1 %v9498_v44 }
 0x354   :  { %4874 = vmatpush1.bf16.msra.mxu0 %v9499_v20  ;;  %4938 = vmatpush1.bf16.msra.mxu1 %v9500_v4 }
 0x355   :  { %4940 = vmatprep.subr.bf16.mxu0 %v9501_v24  ;;  %5004 = vmatprep.subr.bf16.mxu1 %v9502_v42  ;;  %v1832_v42 = vrot.slane %v7999_v12, 6 }
 0x3aa   :  { %v1542_v38 = vpop.f32.mrb[12].mxu0  ;;  %v1613_v13 = vpop.f32.mrb[20].mxu1 }
 0x3ab   :  { %v1770_v28 = vrot.slane %v1613_v13, 4  ;;  %v1544_v14 = vpop.f32.mrb[13].mxu0  ;;  %v1615_v5 = vpop.f32.mrb[21].mxu1 }
 0x3ac   :  { %v1771_v39 = vrot.slane %v1615_v5, 4 }
 0x3ad   :  { %v1786_v59 = vadd.f32 %v1770_v28, %v1465_v7  ;;  %v1768_v28 = vrot.slane %v1542_v38, 4  ;;  %v1467_v38 = vld [vmem:[#allocation2 + $0x20] sm:$0x30] }
 0x3ae   :  { %v1787_v10 = vadd.f32 %v1771_v39, %v1466_v63  ;;  %v1769_v63 = vrot.slane %v1544_v14, 4  ;;  %v1463_v39 = vld [vmem:[#allocation2] sm:$0x30]  ;;  %v1469_v14 = vld [vmem:[#allocation2 + $0x30] sm:$0x30] }
 0x3af   :  { %v3914_v58 = vmul.f32 -1.442695, %v1786_v59 }
 0x3b0   :  { %v3915_v44 = vmul.f32 -1.442695, %v1787_v10  ;;  %v1784_v10 = vadd.f32 %v1768_v28, %v1463_v39 }
 0x3b1   :  { %6189 = vpow2.f32 %v3914_v58  ;;  %v1464_v58 = vld [vmem:[#allocation2 + $0x8] sm:$0x30] }
 0x3b2   :  { %6191 = vpow2.f32 %v3915_v44  ;;  %v1785_v59 = vadd.f32 %v1769_v63, %v1464_v58  ;;  %v3912_v44 = vmul.f32 -1.442695, %v1784_v10  ;;  %v1468_v10 = vld [vmem:[#allocation2 + $0x28] sm:$0x30]  ;;  %v1470_v58 = vld [vmem:[#allocation2 + $0x38] sm:$0x30] }
 0x3bb   :  { %v6190_v20 = vpop.eup %6189 }
 0x3bc   :  { %v1810_v4 = vadd.f32 1.0, %v6190_v20  ;;  %v6192_v61 = vpop.eup %6191  ;;  %v3913_v20 = vmul.f32 -1.442695, %v1785_v59 }
 0x3bd   :  { %v1811_v24 = vadd.f32 1.0, %v6192_v61 }
 0x3be   :  { %6193 = vrcp.f32 %v1810_v4 }
 0x3bf   :  { %6195 = vrcp.f32 %v1811_v24 }
 0x3c0   :  { %6197 = vpow2.f32 %v3912_v44 }
 0x3c1   :  { %6199 = vpow2.f32 %v3913_v20 }
 0x3c8   :  { %v6194_v13 = vpop.eup %6193 }
 0x3c9   :  { %v1836_v43 = vmul.f32 %v6194_v13, %v1832_v42  ;;  %v6196_v5 = vpop.eup %6195 }
 0x3ca   :  { %v1837_v7 = vmul.f32 %v6196_v5, %v1833_v15  ;;  %v6198_v61 = vpop.eup %6197 }
 0x3cb   :  { %v6200_v24 = vpop.eup %6199  ;;  %v1798_v4 = vadd.f32 1.0, %v6198_v61 }
 0x3cc   :  { %v1799_v12 = vadd.f32 1.0, %v6200_v24 }
 0x3cd   :  { %6201 = vrcp.f32 %v1798_v4 }
 0x3ce   :  { %6203 = vrcp.f32 %v1799_v12 }
 0x3ea   :  { %v1684_v45 = vpop.f32.mrb[14].mxu0  ;;  %v1755_v32 = vpop.f32.mrb[22].mxu1 }
 0x3eb   :  { %v1772_v9 = vrot.slane %v1684_v45, 4  ;;  %v1774_v42 = vrot.slane %v1755_v32, 4  ;;  %v1686_v13 = vpop.f32.mrb[15].mxu0  ;;  %v1757_v15 = vpop.f32.mrb[23].mxu1 }
 0x3ec   :  { %v1773_v5 = vrot.slane %v1686_v13, 4  ;;  %v1775_v28 = vrot.slane %v1757_v15, 4  ;;  %v6202_v45 = vpop.eup %6201 }
 0x3ed   :  { %v1788_v63 = vadd.f32 %v1772_v9, %v1467_v38  ;;  %v1790_v39 = vadd.f32 %v1774_v42, %v1469_v14  ;;  %v6204_v32 = vpop.eup %6203 }
 0x3ee   :  { %v1789_v59 = vadd.f32 %v1773_v5, %v1468_v10  ;;  %v1791_v44 = vadd.f32 %v1775_v28, %v1470_v58 }
 0x3ef   :  { %6205 = vtanh.f32 %v1788_v63  ;;  %v3916_v20 = vmul.f32 -1.442695, %v1790_v39 }
 0x3f0   :  { %6207 = vtanh.f32 %v1789_v59  ;;  %v3917_v61 = vmul.f32 -1.442695, %v1791_v44  ;;  %v9504_v44 = vld [vmem:[#allocation91_spill] sm:$0xff] }
 0x3f1   :  { %6209 = vpow2.f32 %v3916_v20  ;;  %v9505_v20 = vld [vmem:[#allocation95_spill] sm:$0xff] }
 0x3f2   :  { %6211 = vpow2.f32 %v3917_v61  ;;  %v9506_v61 = vld [vmem:[#allocation97_spill] sm:$0xff] }
 0x3f9   :  { %v6206_v24 = vpop.eup %6205 }
 0x3fa   :  { %v6208_v60 = vpop.eup %6207  ;;  %v1838_v13 = vmul.f32 %v6206_v24, %v6202_v45  ;;  %v9507_v45 = vld [vmem:[#allocation99_spill] sm:$0xff]  ;;  %v9509_v24 = vld [vmem:[#allocation105_spill] sm:$0xff] }
 0x3fb   :  { %v6210_v15 = vpop.eup %6209  ;;  %v1839_v4 = vmul.f32 %v6208_v60, %v6204_v32  ;;  %v9508_v32 = vld [vmem:[#allocation103_spill] sm:$0xff] }
 0x3fc   :  { %v6212_v9 = vpop.eup %6211  ;;  %v8141_v42 = vadd.f32 %v1838_v13, %v1836_v43  ;;  %v1824_v38 = vadd.f32 1.0, %v6210_v15  ;;  %v9510_v13 = vld [vmem:[#allocation124_spill] sm:$0xff]  ;;  %v9511_v15 = vld [vmem:[#allocation107_spill] sm:$0xff] }
 0x3fd   :  { %v8143_v12 = vadd.f32 %v1839_v4, %v1837_v7  ;;  %v1825_v14 = vadd.f32 1.0, %v6212_v9  ;;  %v9503_v7 = vld [vmem:[#allocation89_spill] sm:$0xff] }
 0x3fe   :  { %6213 = vtanh.f32 %v8141_v42  ;;  %v9512_v4 = vld [vmem:[#allocation125_spill] sm:$0xff] }
 0x3ff   :  { %6215 = vrcp.f32 %v1824_v38  ;;  %v9513_v9 = vld [vmem:[#allocation109_spill] sm:$0xff]  ;;  %v9514_v38 = vld [vmem:[#allocation126_spill] sm:$0xff] }
 0x400   :  { %6217 = vtanh.f32 %v8143_v12 }
 0x401   :  { %6219 = vrcp.f32 %v1825_v14  ;;  %v9515_v14 = vld [vmem:[#allocation111_spill] sm:$0xff] }
 0x408   :  { %v6214_v5 = vpop.eup %6213 }
 0x409   :  { %v6216_v28 = vpop.eup %6215 }
 0x40a   :  { %v6218_v63 = vpop.eup %6217  ;;  %v1844_v39 = vmul.f32 %v6216_v28, %v6214_v5  ;;  %v9516_v5 = vld [vmem:[#allocation127_spill] sm:$0xff]  ;;  %v9517_v28 = vld [vmem:[#allocation113_spill] sm:$0xff] }
 0x40b   :  { %v6220_v10 = vpop.eup %6219 }
 0x40c   :  { %v1845_v58 = vmul.f32 %v6220_v10, %v6218_v63  ;;  %1846 = vst [vmem:[#allocation3] sm:$0x30] %v1844_v39  ;;  %v8147_v59 = vrot.slane %v1844_v39, 4  ;;  %v9518_v63 = vld [vmem:[#allocation128_spill] sm:$0xff]  ;;  %v9519_v39 = vld [vmem:[#allocation115_spill] sm:$0xff]  ;;  %v9520_v10 = vld [vmem:[#allocation129_spill] sm:$0xff] }
 0x40e   :  { %v1848_v60 = vrot.slane %v1845_v58, 2  ;;  %v1861_v43 = vrot.slane %v1845_v58, 4  ;;  %v9521_v58 = vld [vmem:[#allocation117_spill] sm:$0xff] }
 0x410   :  { %1850 = vst [vmem:[#allocation3 + $0x18] sm:$0xc] %v1848_v60  ;;  %1928 = vmatprep.mubr.f32.mxu0 %v1861_v43  ;;  %1999 = vmatprep.mubr.f32.mxu1 %v1861_v43  ;;  %v9522_v60 = vld [vmem:[#allocation130_spill] sm:$0xff] }
 0x411   :  { %1929 = vmatmul.mubr.f32.vlgmr.msra.gmra.mrb[16].mxu0 %v8147_v59  ;;  %2000 = vmatmul.mubr.f32.vlgmr.msra.gmra.mrb[24].mxu1 %v8147_v59 }
 0x412   :  { %4942 = vmatpush1.bf16.msra.mxu0 %v9329_v36  ;;  %5006 = vmatpush1.bf16.msra.mxu1 %v9330_v23 }
 0x413   :  { %2070 = vmatprep.mubr.f32.mxu0 %v1861_v43  ;;  %2141 = vmatprep.mubr.f32.mxu1 %v1861_v43  ;;  %v9523_v43 = vld [vmem:[#allocation119_spill] sm:$0xff] }
 0x414   :  { %4944 = vmatprep.subr.bf16.mxu0 %v9331_v40  ;;  %5008 = vmatprep.subr.bf16.mxu1 %v9332_v26 }
 0x416   :  { %4946 = vmatpush1.bf16.msra.mxu0 %v9333_v11  ;;  %5010 = vmatpush1.bf16.msra.mxu1 %v9334_v30 }
 0x417   :  { %4948 = vmatprep.subr.bf16.mxu0 %v9335_v25  ;;  %5012 = vmatprep.subr.bf16.mxu1 %v9336_v0 }
 0x41a   :  { %4950 = vmatpush1.bf16.msra.mxu0 %v9415_v6  ;;  %5014 = vmatpush1.bf16.msra.mxu1 %v9416_v48 }
 0x41b   :  { %4952 = vmatprep.subr.bf16.mxu0 %v9417_v55  ;;  %5016 = vmatprep.subr.bf16.mxu1 %v9418_v29 }
 0x41e   :  { %4954 = vmatpush1.bf16.msra.mxu0 %v9419_v57  ;;  %5018 = vmatpush1.bf16.msra.mxu1 %v9420_v35 }
 0x41f   :  { %4956 = vmatprep.subr.bf16.mxu0 %v9421_v47  ;;  %5020 = vmatprep.subr.bf16.mxu1 %v9422_v27 }
 0x422   :  { %4958 = vmatpush1.bf16.msra.mxu0 %v9423_v37  ;;  %5022 = vmatpush1.bf16.msra.mxu1 %v9424_v16 }
 0x423   :  { %4960 = vmatprep.subr.bf16.mxu0 %v9347_v51  ;;  %5024 = vmatprep.subr.bf16.mxu1 %v9425_v18 }
 0x426   :  { %4962 = vmatpush1.bf16.msra.mxu0 %v9349_v22  ;;  %5026 = vmatpush1.bf16.msra.mxu1 %v9426_v56 }
 0x427   :  { %4964 = vmatprep.subr.bf16.mxu0 %v9351_v3  ;;  %5028 = vmatprep.subr.bf16.mxu1 %v9427_v62 }
 0x42a   :  { %4966 = vmatpush1.bf16.msra.mxu0 %v9353_v19  ;;  %5030 = vmatpush1.bf16.msra.mxu1 %v9428_v41 }
 0x42b   :  { %4968 = vmatprep.subr.bf16.mxu0 %v9355_v54  ;;  %5032 = vmatprep.subr.bf16.mxu1 %v9429_v31 }
 0x42e   :  { %4970 = vmatpush1.bf16.msra.mxu0 %v9357_v2  ;;  %5034 = vmatpush1.bf16.msra.mxu1 %v9430_v34 }
 0x42f   :  { %4972 = vmatprep.subr.bf16.mxu0 %v9503_v7  ;;  %5036 = vmatprep.subr.bf16.mxu1 %v9431_v8 }
 0x432   :  { %4974 = vmatpush1.bf16.msra.mxu0 %v9504_v44  ;;  %5038 = vmatpush1.bf16.msra.mxu1 %v9432_v52 }
 0x433   :  { %4976 = vmatprep.subr.bf16.mxu0 %v9360_v17  ;;  %5040 = vmatprep.subr.bf16.mxu1 %v9433_v49 }
 0x436   :  { %4978 = vmatpush1.bf16.msra.mxu0 %v9505_v20  ;;  %5042 = vmatpush1.bf16.msra.mxu1 %v9434_v50 }
 0x437   :  { %4980 = vmatprep.subr.bf16.mxu0 %v9506_v61  ;;  %5044 = vmatprep.subr.bf16.mxu1 %v9435_v21 }
 0x43a   :  { %4982 = vmatpush1.bf16.msra.mxu0 %v9507_v45  ;;  %5046 = vmatpush1.bf16.msra.mxu1 %v9436_v33 }
 0x43b   :  { %4984 = vmatprep.subr.bf16.mxu0 %v9364_v1  ;;  %5048 = vmatprep.subr.bf16.mxu1 %v9437_v53 }
 0x43e   :  { %4986 = vmatpush1.bf16.msra.mxu0 %v9508_v32  ;;  %5050 = vmatpush1.bf16.msra.mxu1 %v7707_v46  ;;  %v2221_v32 = vrot.slane %v8143_v12, 6 }
 0x43f   :  { %4988 = vmatprep.subr.bf16.mxu0 %v9509_v24  ;;  %5052 = vmatprep.subr.bf16.mxu1 %v9510_v13  ;;  %v1854_v13 = vld [vmem:[#allocation2 + $0x18] sm:$0xc0] }
 0x442   :  { %4990 = vmatpush1.bf16.msra.mxu0 %v9511_v15  ;;  %5054 = vmatpush1.bf16.msra.mxu1 %v9512_v4 }
 0x443   :  { %4992 = vmatprep.subr.bf16.mxu0 %v9513_v9  ;;  %5056 = vmatprep.subr.bf16.mxu1 %v9514_v38  ;;  %v9524_v9 = vld [vmem:[#allocation131_spill] sm:$0xff]  ;;  %v9525_v38 = vld [vmem:[#allocation4_spill] sm:$0xff] }
 0x446   :  { %4994 = vmatpush1.bf16.msra.mxu0 %v9515_v14  ;;  %5058 = vmatpush1.bf16.msra.mxu1 %v9516_v5  ;;  %v9526_v14 = vld [vmem:[#allocation16_spill] sm:$0xff] }
 0x447   :  { %4996 = vmatprep.subr.bf16.mxu0 %v9517_v28  ;;  %5060 = vmatprep.subr.bf16.mxu1 %v9518_v63  ;;  %v9527_v63 = vld [vmem:[#allocation5_spill] sm:$0xff]  ;;  %v9536_v28 = vld [vmem:[#allocation26_spill] sm:$0xff] }
 0x44a   :  { %4998 = vmatpush1.bf16.msra.mxu0 %v9519_v39  ;;  %5062 = vmatpush1.bf16.msra.mxu1 %v9520_v10  ;;  %v9528_v39 = vld [vmem:[#allocation18_spill] sm:$0xff] }
 0x44b   :  { %5000 = vmatprep.subr.bf16.mxu0 %v9521_v58  ;;  %5064 = vmatprep.subr.bf16.mxu1 %v9522_v60  ;;  %v9529_v10 = vld [vmem:[#allocation6_spill] sm:$0xff]  ;;  %v9530_v58 = vld [vmem:[#allocation20_spill] sm:$0xff]  ;;  %v9531_v60 = vld [vmem:[#allocation7_spill] sm:$0xff] }
 0x44e   :  { %5002 = vmatpush1.bf16.msra.mxu0 %v9523_v43  ;;  %5066 = vmatpush1.bf16.msra.mxu1 %v9524_v9  ;;  %v9532_v43 = vld [vmem:[#allocation22_spill] sm:$0xff]  ;;  %v9533_v9 = vld [vmem:[#allocation8_spill] sm:$0xff] }
 0x44f   :  { %5068 = vmatprep.subr.bf16.mxu0 %v9525_v38  ;;  %5132 = vmatprep.subr.bf16.mxu1 %v9526_v14  ;;  %v9534_v38 = vld [vmem:[#allocation24_spill] sm:$0xff]  ;;  %v9535_v14 = vld [vmem:[#allocation9_spill] sm:$0xff] }
 0x451   :  { %2071 = vmatmul.mubr.f32.vlgmr.msra.gmra.mrb[18].mxu0 %v8147_v59  ;;  %2142 = vmatmul.mubr.f32.vlgmr.msra.gmra.mrb[26].mxu1 %v8147_v59  ;;  %v9537_v59 = vld [vmem:[#allocation10_spill] sm:$0xff] }
 0x452   :  { %5070 = vmatpush1.bf16.msra.mxu0 %v9527_v63  ;;  %5134 = vmatpush1.bf16.msra.mxu1 %v9528_v39  ;;  %v9538_v63 = vld [vmem:[#allocation28_spill] sm:$0xff]  ;;  %v9539_v39 = vld [vmem:[#allocation11_spill] sm:$0xff] }
 0x453   :  { %5072 = vmatprep.subr.bf16.mxu0 %v9529_v10  ;;  %5136 = vmatprep.subr.bf16.mxu1 %v9530_v58  ;;  %v9540_v10 = vld [vmem:[#allocation30_spill] sm:$0xff]  ;;  %v9541_v58 = vld [vmem:[#allocation12_spill] sm:$0xff] }
 0x456   :  { %5074 = vmatpush1.bf16.msra.mxu0 %v9531_v60  ;;  %5138 = vmatpush1.bf16.msra.mxu1 %v9532_v43  ;;  %v9542_v60 = vld [vmem:[#allocation32_spill] sm:$0xff]  ;;  %v9543_v43 = vld [vmem:[#allocation13_spill] sm:$0xff] }
 0x457   :  { %5076 = vmatprep.subr.bf16.mxu0 %v9533_v9  ;;  %5140 = vmatprep.subr.bf16.mxu1 %v9534_v38  ;;  %v9544_v9 = vld [vmem:[#allocation34_spill] sm:$0xff] }
 0x458   :  { %v9545_v38 = vld [vmem:[#allocation14_spill] sm:$0xff] }
 0x45a   :  { %5078 = vmatpush1.bf16.msra.mxu0 %v9535_v14  ;;  %5142 = vmatpush1.bf16.msra.mxu1 %v9536_v28  ;;  %v9546_v14 = vld [vmem:[#allocation36_spill] sm:$0xff]  ;;  %v9547_v28 = vld [vmem:[#allocation15_spill] sm:$0xff] }
 0x45b   :  { %5080 = vmatprep.subr.bf16.mxu0 %v9537_v59  ;;  %5144 = vmatprep.subr.bf16.mxu1 %v9538_v63  ;;  %v9548_v59 = vld [vmem:[#allocation38_spill] sm:$0xff]  ;;  %v9549_v63 = vld [vmem:[#allocation17_spill] sm:$0xff] }
 0x45e   :  { %5082 = vmatpush1.bf16.msra.mxu0 %v9539_v39  ;;  %5146 = vmatpush1.bf16.msra.mxu1 %v9540_v10  ;;  %v9550_v39 = vld [vmem:[#allocation40_spill] sm:$0xff]  ;;  %v9551_v10 = vld [vmem:[#allocation19_spill] sm:$0xff] }
 0x45f   :  { %5084 = vmatprep.subr.bf16.mxu0 %v9541_v58  ;;  %5148 = vmatprep.subr.bf16.mxu1 %v9542_v60  ;;  %v9552_v58 = vld [vmem:[#allocation42_spill] sm:$0xff]  ;;  %v9553_v60 = vld [vmem:[#allocation21_spill] sm:$0xff] }
 0x462   :  { %5086 = vmatpush1.bf16.msra.mxu0 %v9543_v43  ;;  %5150 = vmatpush1.bf16.msra.mxu1 %v9544_v9  ;;  %v9554_v43 = vld [vmem:[#allocation44_spill] sm:$0xff]  ;;  %v9555_v9 = vld [vmem:[#allocation23_spill] sm:$0xff] }
 0x463   :  { %5088 = vmatprep.subr.bf16.mxu0 %v9545_v38  ;;  %5152 = vmatprep.subr.bf16.mxu1 %v9546_v14  ;;  %v9556_v38 = vld [vmem:[#allocation46_spill] sm:$0xff]  ;;  %v9557_v14 = vld [vmem:[#allocation25_spill] sm:$0xff] }
 0x466   :  { %5090 = vmatpush1.bf16.msra.mxu0 %v9547_v28  ;;  %5154 = vmatpush1.bf16.msra.mxu1 %v9548_v59  ;;  %v9558_v28 = vld [vmem:[#allocation48_spill] sm:$0xff]  ;;  %v9559_v59 = vld [vmem:[#allocation27_spill] sm:$0xff] }
 0x467   :  { %5092 = vmatprep.subr.bf16.mxu0 %v9549_v63  ;;  %5156 = vmatprep.subr.bf16.mxu1 %v9550_v39  ;;  %v9560_v63 = vld [vmem:[#allocation50_spill] sm:$0xff]  ;;  %v9561_v39 = vld [vmem:[#allocation29_spill] sm:$0xff] }
 0x46a   :  { %5094 = vmatpush1.bf16.msra.mxu0 %v9551_v10  ;;  %5158 = vmatpush1.bf16.msra.mxu1 %v9552_v58  ;;  %v9562_v10 = vld [vmem:[#allocation52_spill] sm:$0xff]  ;;  %v9563_v58 = vld [vmem:[#allocation31_spill] sm:$0xff] }
 0x46b   :  { %5096 = vmatprep.subr.bf16.mxu0 %v9553_v60  ;;  %5160 = vmatprep.subr.bf16.mxu1 %v9554_v43  ;;  %v9564_v60 = vld [vmem:[#allocation54_spill] sm:$0xff]  ;;  %v9565_v43 = vld [vmem:[#allocation33_spill] sm:$0xff] }
 0x46e   :  { %5098 = vmatpush1.bf16.msra.mxu0 %v9555_v9  ;;  %5162 = vmatpush1.bf16.msra.mxu1 %v9556_v38  ;;  %v9566_v9 = vld [vmem:[#allocation56_spill] sm:$0xff]  ;;  %v9567_v38 = vld [vmem:[#allocation35_spill] sm:$0xff] }
 0x46f   :  { %5100 = vmatprep.subr.bf16.mxu0 %v9557_v14  ;;  %5164 = vmatprep.subr.bf16.mxu1 %v9558_v28  ;;  %v9568_v14 = vld [vmem:[#allocation58_spill] sm:$0xff]  ;;  %v9569_v28 = vld [vmem:[#allocation37_spill] sm:$0xff] }
 0x472   :  { %5102 = vmatpush1.bf16.msra.mxu0 %v9559_v59  ;;  %5166 = vmatpush1.bf16.msra.mxu1 %v9560_v63  ;;  %v9570_v59 = vld [vmem:[#allocation60_spill] sm:$0xff]  ;;  %v9571_v63 = vld [vmem:[#allocation39_spill] sm:$0xff] }
 0x473   :  { %5104 = vmatprep.subr.bf16.mxu0 %v9561_v39  ;;  %5168 = vmatprep.subr.bf16.mxu1 %v9562_v10  ;;  %v9572_v39 = vld [vmem:[#allocation62_spill] sm:$0xff]  ;;  %v9573_v10 = vld [vmem:[#allocation41_spill] sm:$0xff] }
 0x476   :  { %5106 = vmatpush1.bf16.msra.mxu0 %v9563_v58  ;;  %5170 = vmatpush1.bf16.msra.mxu1 %v9564_v60  ;;  %v9574_v58 = vld [vmem:[#allocation64_spill] sm:$0xff]  ;;  %v9575_v60 = vld [vmem:[#allocation43_spill] sm:$0xff] }
 0x477   :  { %5108 = vmatprep.subr.bf16.mxu0 %v9565_v43  ;;  %5172 = vmatprep.subr.bf16.mxu1 %v9566_v9  ;;  %v9576_v43 = vld [vmem:[#allocation66_spill] sm:$0xff]  ;;  %v9577_v9 = vld [vmem:[#allocation45_spill] sm:$0xff] }
 0x47a   :  { %5110 = vmatpush1.bf16.msra.mxu0 %v9567_v38  ;;  %5174 = vmatpush1.bf16.msra.mxu1 %v9568_v14  ;;  %v9578_v38 = vld [vmem:[#allocation68_spill] sm:$0xff]  ;;  %v9579_v14 = vld [vmem:[#allocation47_spill] sm:$0xff] }
 0x47b   :  { %5112 = vmatprep.subr.bf16.mxu0 %v9569_v28  ;;  %5176 = vmatprep.subr.bf16.mxu1 %v9570_v59  ;;  %v9580_v28 = vld [vmem:[#allocation70_spill] sm:$0xff]  ;;  %v9581_v59 = vld [vmem:[#allocation49_spill] sm:$0xff] }
 0x47e   :  { %5114 = vmatpush1.bf16.msra.mxu0 %v9571_v63  ;;  %5178 = vmatpush1.bf16.msra.mxu1 %v9572_v39  ;;  %v9582_v63 = vld [vmem:[#allocation72_spill] sm:$0xff]  ;;  %v9583_v39 = vld [vmem:[#allocation51_spill] sm:$0xff] }
 0x47f   :  { %5116 = vmatprep.subr.bf16.mxu0 %v9573_v10  ;;  %5180 = vmatprep.subr.bf16.mxu1 %v9574_v58  ;;  %v9584_v10 = vld [vmem:[#allocation74_spill] sm:$0xff]  ;;  %v9585_v58 = vld [vmem:[#allocation53_spill] sm:$0xff] }
 0x482   :  { %5118 = vmatpush1.bf16.msra.mxu0 %v9575_v60  ;;  %5182 = vmatpush1.bf16.msra.mxu1 %v9576_v43  ;;  %v9586_v60 = vld [vmem:[#allocation76_spill] sm:$0xff]  ;;  %v9587_v43 = vld [vmem:[#allocation55_spill] sm:$0xff] }
 0x483   :  { %5120 = vmatprep.subr.bf16.mxu0 %v9577_v9  ;;  %5184 = vmatprep.subr.bf16.mxu1 %v9578_v38  ;;  %v9588_v9 = vld [vmem:[#allocation78_spill] sm:$0xff]  ;;  %v9589_v38 = vld [vmem:[#allocation57_spill] sm:$0xff] }
 0x486   :  { %5122 = vmatpush1.bf16.msra.mxu0 %v9579_v14  ;;  %5186 = vmatpush1.bf16.msra.mxu1 %v9580_v28  ;;  %v9590_v14 = vld [vmem:[#allocation80_spill] sm:$0xff] }
 0x487   :  { %5124 = vmatprep.subr.bf16.mxu0 %v9581_v59  ;;  %5188 = vmatprep.subr.bf16.mxu1 %v9582_v63 }
 0x48a   :  { %5126 = vmatpush1.bf16.msra.mxu0 %v9583_v39  ;;  %5190 = vmatpush1.bf16.msra.mxu1 %v9584_v10  ;;  %v1853_v39 = vld [vmem:[#allocation2 + $0x10] sm:$0xc0] }
 0x48b   :  { %5128 = vmatprep.subr.bf16.mxu0 %v9585_v58  ;;  %5192 = vmatprep.subr.bf16.mxu1 %v9586_v60 }
 0x48e   :  { %5130 = vmatpush1.bf16.msra.mxu0 %v9587_v43  ;;  %5194 = vmatpush1.bf16.msra.mxu1 %v9588_v9 }
 0x48f   :  { %5196 = vmatprep.subr.bf16.mxu0 %v9589_v38  ;;  %5260 = vmatprep.subr.bf16.mxu1 %v9590_v14  ;;  %v2220_v14 = vrot.slane %v8141_v42, 6 }
 0x4e4   :  { %v1930_v28 = vpop.f32.mrb[16].mxu0  ;;  %v2001_v59 = vpop.f32.mrb[24].mxu1 }
 0x4e5   :  { %v2158_v5 = vrot.slane %v2001_v59, 2  ;;  %v1932_v63 = vpop.f32.mrb[17].mxu0  ;;  %v2003_v4 = vpop.f32.mrb[25].mxu1 }
 0x4e6   :  { %v2159_v15 = vrot.slane %v2003_v4, 2 }
 0x4e7   :  { %v2174_v10 = vadd.f32 %v2158_v5, %v1853_v39  ;;  %v2156_v39 = vrot.slane %v1930_v28, 2  ;;  %v1855_v28 = vld [vmem:[#allocation2 + $0x20] sm:$0xc0] }
 0x4e8   :  { %v2175_v58 = vadd.f32 %v2159_v15, %v1854_v13  ;;  %v2157_v13 = vrot.slane %v1932_v63, 2  ;;  %v1851_v15 = vld [vmem:[#allocation2] sm:$0xc0]  ;;  %v1857_v63 = vld [vmem:[#allocation2 + $0x30] sm:$0xc0] }
 0x4e9   :  { %v3920_v24 = vmul.f32 -1.442695, %v2174_v10  ;;  %v2172_v10 = vadd.f32 %v2156_v39, %v1851_v15 }
 0x4ea   :  { %v3921_v60 = vmul.f32 -1.442695, %v2175_v58 }
 0x4eb   :  { %6221 = vpow2.f32 %v3920_v24  ;;  %v1852_v24 = vld [vmem:[#allocation2 + $0x8] sm:$0xc0] }
 0x4ec   :  { %6223 = vpow2.f32 %v3921_v60  ;;  %v2173_v58 = vadd.f32 %v2157_v13, %v1852_v24  ;;  %v3918_v60 = vmul.f32 -1.442695, %v2172_v10  ;;  %v1856_v10 = vld [vmem:[#allocation2 + $0x28] sm:$0xc0]  ;;  %v1858_v24 = vld [vmem:[#allocation2 + $0x38] sm:$0xc0] }
 0x4f5   :  { %v6222_v43 = vpop.eup %6221 }
 0x4f6   :  { %v2198_v9 = vadd.f32 1.0, %v6222_v43  ;;  %v6224_v46 = vpop.eup %6223  ;;  %v3919_v43 = vmul.f32 -1.442695, %v2173_v58 }
 0x4f7   :  { %v2199_v38 = vadd.f32 1.0, %v6224_v46 }
 0x4f8   :  { %6225 = vrcp.f32 %v2198_v9 }
 0x4f9   :  { %6227 = vrcp.f32 %v2199_v38 }
 0x4fa   :  { %6229 = vpow2.f32 %v3918_v60 }
 0x4fb   :  { %6231 = vpow2.f32 %v3919_v43 }
 0x502   :  { %v6226_v59 = vpop.eup %6225 }
 0x503   :  { %v2224_v53 = vmul.f32 %v6226_v59, %v2220_v14  ;;  %v6228_v4 = vpop.eup %6227 }
 0x504   :  { %v2225_v5 = vmul.f32 %v6228_v4, %v2221_v32  ;;  %v6230_v46 = vpop.eup %6229 }
 0x505   :  { %v6232_v9 = vpop.eup %6231  ;;  %v2186_v38 = vadd.f32 1.0, %v6230_v46 }
 0x506   :  { %v2187_v42 = vadd.f32 1.0, %v6232_v9 }
 0x507   :  { %6233 = vrcp.f32 %v2186_v38 }
 0x508   :  { %6235 = vrcp.f32 %v2187_v42 }
 0x524   :  { %v2072_v1 = vpop.f32.mrb[18].mxu0  ;;  %v2143_v33 = vpop.f32.mrb[26].mxu1 }
 0x525   :  { %v2160_v12 = vrot.slane %v2072_v1, 2  ;;  %v2162_v14 = vrot.slane %v2143_v33, 2  ;;  %v2074_v59 = vpop.f32.mrb[19].mxu0  ;;  %v2145_v32 = vpop.f32.mrb[27].mxu1 }
 0x526   :  { %v2161_v4 = vrot.slane %v2074_v59, 2  ;;  %v2163_v39 = vrot.slane %v2145_v32, 2  ;;  %v6234_v1 = vpop.eup %6233 }
 0x527   :  { %v2176_v13 = vadd.f32 %v2160_v12, %v1855_v28  ;;  %v2178_v15 = vadd.f32 %v2162_v14, %v1857_v63  ;;  %v6236_v33 = vpop.eup %6235 }
 0x528   :  { %v2177_v58 = vadd.f32 %v2161_v4, %v1856_v10  ;;  %v2179_v60 = vadd.f32 %v2163_v39, %v1858_v24 }
 0x529   :  { %6237 = vtanh.f32 %v2176_v13  ;;  %v3922_v43 = vmul.f32 -1.442695, %v2178_v15 }
 0x52a   :  { %6239 = vtanh.f32 %v2177_v58  ;;  %v3923_v46 = vmul.f32 -1.442695, %v2179_v60  ;;  %v9592_v58 = vld [vmem:[#allocation121_spill] sm:$0xff] }
 0x52b   :  { %6241 = vpow2.f32 %v3922_v43  ;;  %v9593_v60 = vld [vmem:[#allocation101_spill] sm:$0xff]  ;;  %v9594_v43 = vld [vmem:[#allocation122_spill] sm:$0xff] }
 0x52c   :  { %6243 = vpow2.f32 %v3923_v46  ;;  %v9595_v46 = vld [vmem:[#allocation103_spill] sm:$0xff] }
 0x533   :  { %v6238_v9 = vpop.eup %6237 }
 0x534   :  { %v6240_v45 = vpop.eup %6239  ;;  %v2226_v59 = vmul.f32 %v6238_v9, %v6234_v1  ;;  %v9596_v1 = vld [vmem:[#allocation123_spill] sm:$0xff]  ;;  %v9598_v9 = vld [vmem:[#allocation124_spill] sm:$0xff] }
 0x535   :  { %v6242_v32 = vpop.eup %6241  ;;  %v2227_v38 = vmul.f32 %v6240_v45, %v6236_v33  ;;  %v9597_v33 = vld [vmem:[#allocation105_spill] sm:$0xff] }
 0x536   :  { %v6244_v12 = vpop.eup %6243  ;;  %v8283_v14 = vadd.f32 %v2226_v59, %v2224_v53  ;;  %v2212_v28 = vadd.f32 1.0, %v6242_v32  ;;  %v9599_v59 = vld [vmem:[#allocation107_spill] sm:$0xff]  ;;  %v9600_v32 = vld [vmem:[#allocation125_spill] sm:$0xff] }
 0x537   :  { %v8285_v42 = vadd.f32 %v2227_v38, %v2225_v5  ;;  %v2213_v63 = vadd.f32 1.0, %v6244_v12  ;;  %v9591_v5 = vld [vmem:[#allocation99_spill] sm:$0xff]  ;;  %v9601_v38 = vld [vmem:[#allocation109_spill] sm:$0xff]  ;;  %v9602_v12 = vld [vmem:[#allocation126_spill] sm:$0xff] }
 0x538   :  { %6245 = vtanh.f32 %v8283_v14 }
 0x539   :  { %6247 = vrcp.f32 %v2212_v28  ;;  %v9603_v28 = vld [vmem:[#allocation111_spill] sm:$0xff] }
 0x53a   :  { %6249 = vtanh.f32 %v8285_v42 }
 0x53b   :  { %6251 = vrcp.f32 %v2213_v63  ;;  %v9604_v63 = vld [vmem:[#allocation127_spill] sm:$0xff] }
 0x542   :  { %v6246_v4 = vpop.eup %6245 }
 0x543   :  { %v6248_v39 = vpop.eup %6247 }
 0x544   :  { %v6250_v13 = vpop.eup %6249  ;;  %v2232_v15 = vmul.f32 %v6248_v39, %v6246_v4  ;;  %v9605_v4 = vld [vmem:[#allocation113_spill] sm:$0xff]  ;;  %v9606_v39 = vld [vmem:[#allocation128_spill] sm:$0xff] }
 0x545   :  { %v6252_v10 = vpop.eup %6251 }
 0x546   :  { %v2233_v24 = vmul.f32 %v6252_v10, %v6250_v13  ;;  %2234 = vst [vmem:[#allocation3] sm:$0xc0] %v2232_v15  ;;  %v8289_v53 = vrot.slane %v2232_v15, 6  ;;  %v9607_v13 = vld [vmem:[#allocation115_spill] sm:$0xff]  ;;  %v9608_v15 = vld [vmem:[#allocation129_spill] sm:$0xff] }
 0x547   :  { %v9609_v10 = vld [vmem:[#allocation117_spill] sm:$0xff] }
 0x548   :  { %v2236_v45 = vrot.slane %v2233_v24, 6  ;;  %v9610_v24 = vld [vmem:[#allocation130_spill] sm:$0xff] }
 0x54a   :  { %2238 = vst [vmem:[#allocation3 + $0x18] sm:$0x3] %v2236_v45  ;;  %2314 = vmatprep.mubr.f32.mxu0 %v2236_v45  ;;  %2385 = vmatprep.mubr.f32.mxu1 %v2236_v45 }
 0x54b   :  { %2315 = vmatmul.mubr.f32.vlgmr.msra.gmra.mrb[20].mxu0 %v8289_v53  ;;  %2386 = vmatmul.mubr.f32.vlgmr.msra.gmra.mrb[28].mxu1 %v8289_v53 }
 0x54c   :  { %5198 = vmatpush1.bf16.msra.mxu0 %v9329_v36  ;;  %5262 = vmatpush1.bf16.msra.mxu1 %v9330_v23 }
 0x54d   :  { %2456 = vmatprep.mubr.f32.mxu0 %v2236_v45  ;;  %2527 = vmatprep.mubr.f32.mxu1 %v2236_v45  ;;  %v9611_v45 = vld [vmem:[#allocation119_spill] sm:$0xff] }
 0x54e   :  { %5200 = vmatprep.subr.bf16.mxu0 %v9331_v40  ;;  %5264 = vmatprep.subr.bf16.mxu1 %v9332_v26 }
 0x550   :  { %5202 = vmatpush1.bf16.msra.mxu0 %v9333_v11  ;;  %5266 = vmatpush1.bf16.msra.mxu1 %v9334_v30 }
 0x551   :  { %5204 = vmatprep.subr.bf16.mxu0 %v9335_v25  ;;  %5268 = vmatprep.subr.bf16.mxu1 %v9336_v0 }
 0x554   :  { %5206 = vmatpush1.bf16.msra.mxu0 %v9415_v6  ;;  %5270 = vmatpush1.bf16.msra.mxu1 %v9416_v48 }
 0x555   :  { %5208 = vmatprep.subr.bf16.mxu0 %v9417_v55  ;;  %5272 = vmatprep.subr.bf16.mxu1 %v9418_v29 }
 0x558   :  { %5210 = vmatpush1.bf16.msra.mxu0 %v9419_v57  ;;  %5274 = vmatpush1.bf16.msra.mxu1 %v9420_v35 }
 0x559   :  { %5212 = vmatprep.subr.bf16.mxu0 %v9421_v47  ;;  %5276 = vmatprep.subr.bf16.mxu1 %v9422_v27 }
 0x55c   :  { %5214 = vmatpush1.bf16.msra.mxu0 %v9423_v37  ;;  %5278 = vmatpush1.bf16.msra.mxu1 %v9424_v16 }
 0x55d   :  { %5216 = vmatprep.subr.bf16.mxu0 %v9347_v51  ;;  %5280 = vmatprep.subr.bf16.mxu1 %v9425_v18 }
 0x560   :  { %5218 = vmatpush1.bf16.msra.mxu0 %v9349_v22  ;;  %5282 = vmatpush1.bf16.msra.mxu1 %v9426_v56 }
 0x561   :  { %5220 = vmatprep.subr.bf16.mxu0 %v9351_v3  ;;  %5284 = vmatprep.subr.bf16.mxu1 %v9427_v62 }
 0x564   :  { %5222 = vmatpush1.bf16.msra.mxu0 %v9353_v19  ;;  %5286 = vmatpush1.bf16.msra.mxu1 %v9428_v41 }
 0x565   :  { %5224 = vmatprep.subr.bf16.mxu0 %v9355_v54  ;;  %5288 = vmatprep.subr.bf16.mxu1 %v9429_v31 }
 0x568   :  { %5226 = vmatpush1.bf16.msra.mxu0 %v9357_v2  ;;  %5290 = vmatpush1.bf16.msra.mxu1 %v9430_v34 }
 0x569   :  { %5228 = vmatprep.subr.bf16.mxu0 %v9503_v7  ;;  %5292 = vmatprep.subr.bf16.mxu1 %v9431_v8 }
 0x56c   :  { %5230 = vmatpush1.bf16.msra.mxu0 %v9504_v44  ;;  %5294 = vmatpush1.bf16.msra.mxu1 %v9432_v52 }
 0x56d   :  { %5232 = vmatprep.subr.bf16.mxu0 %v9360_v17  ;;  %5296 = vmatprep.subr.bf16.mxu1 %v9433_v49 }
 0x570   :  { %5234 = vmatpush1.bf16.msra.mxu0 %v9505_v20  ;;  %5298 = vmatpush1.bf16.msra.mxu1 %v9434_v50 }
 0x571   :  { %5236 = vmatprep.subr.bf16.mxu0 %v9506_v61  ;;  %5300 = vmatprep.subr.bf16.mxu1 %v9435_v21 }
 0x574   :  { %5238 = vmatpush1.bf16.msra.mxu0 %v9591_v5  ;;  %5302 = vmatpush1.bf16.msra.mxu1 %v9592_v58 }
 0x575   :  { %5240 = vmatprep.subr.bf16.mxu0 %v9593_v60  ;;  %5304 = vmatprep.subr.bf16.mxu1 %v9594_v43  ;;  %v2239_v43 = vld [vmem:[#allocation2 + $0x40] sm:$0x3]  ;;  %v2245_v60 = vld [vmem:[#allocation2 + $0x70] sm:$0x3] }
 0x578   :  { %5242 = vmatpush1.bf16.msra.mxu0 %v9595_v46  ;;  %5306 = vmatpush1.bf16.msra.mxu1 %v9596_v1 }
 0x579   :  { %5244 = vmatprep.subr.bf16.mxu0 %v9597_v33  ;;  %5308 = vmatprep.subr.bf16.mxu1 %v9598_v9 }
 0x57c   :  { %5246 = vmatpush1.bf16.msra.mxu0 %v9599_v59  ;;  %5310 = vmatpush1.bf16.msra.mxu1 %v9600_v32 }
 0x57d   :  { %5248 = vmatprep.subr.bf16.mxu0 %v9601_v38  ;;  %5312 = vmatprep.subr.bf16.mxu1 %v9602_v12  ;;  %v9612_v38 = vld [vmem:[#allocation131_spill] sm:$0xff]  ;;  %v9613_v12 = vld [vmem:[#allocation4_spill] sm:$0xff] }
 0x580   :  { %5250 = vmatpush1.bf16.msra.mxu0 %v9603_v28  ;;  %5314 = vmatpush1.bf16.msra.mxu1 %v9604_v63  ;;  %v9614_v28 = vld [vmem:[#allocation16_spill] sm:$0xff] }
 0x581   :  { %5252 = vmatprep.subr.bf16.mxu0 %v9605_v4  ;;  %5316 = vmatprep.subr.bf16.mxu1 %v9606_v39  ;;  %v9615_v39 = vld [vmem:[#allocation5_spill] sm:$0xff]  ;;  %v9624_v4 = vld [vmem:[#allocation26_spill] sm:$0xff] }
 0x584   :  { %5254 = vmatpush1.bf16.msra.mxu0 %v9607_v13  ;;  %5318 = vmatpush1.bf16.msra.mxu1 %v9608_v15  ;;  %v9616_v13 = vld [vmem:[#allocation18_spill] sm:$0xff] }
 0x585   :  { %5256 = vmatprep.subr.bf16.mxu0 %v9609_v10  ;;  %5320 = vmatprep.subr.bf16.mxu1 %v9610_v24  ;;  %v9617_v15 = vld [vmem:[#allocation6_spill] sm:$0xff]  ;;  %v9618_v10 = vld [vmem:[#allocation20_spill] sm:$0xff]  ;;  %v9619_v24 = vld [vmem:[#allocation7_spill] sm:$0xff] }
 0x588   :  { %5258 = vmatpush1.bf16.msra.mxu0 %v9611_v45  ;;  %5322 = vmatpush1.bf16.msra.mxu1 %v9612_v38  ;;  %v9620_v45 = vld [vmem:[#allocation22_spill] sm:$0xff]  ;;  %v9621_v38 = vld [vmem:[#allocation8_spill] sm:$0xff] }
 0x589   :  { %5324 = vmatprep.subr.bf16.mxu0 %v9613_v12  ;;  %5388 = vmatprep.subr.bf16.mxu1 %v9614_v28  ;;  %v9622_v12 = vld [vmem:[#allocation24_spill] sm:$0xff]  ;;  %v9623_v28 = vld [vmem:[#allocation9_spill] sm:$0xff] }
 0x58b   :  { %2457 = vmatmul.mubr.f32.vlgmr.msra.gmra.mrb[22].mxu0 %v8289_v53  ;;  %2528 = vmatmul.mubr.f32.vlgmr.msra.gmra.mrb[30].mxu1 %v8289_v53  ;;  %v9625_v53 = vld [vmem:[#allocation10_spill] sm:$0xff] }
 0x58c   :  { %5326 = vmatpush1.bf16.msra.mxu0 %v9615_v39  ;;  %5390 = vmatpush1.bf16.msra.mxu1 %v9616_v13  ;;  %v9626_v39 = vld [vmem:[#allocation28_spill] sm:$0xff]  ;;  %v9627_v13 = vld [vmem:[#allocation11_spill] sm:$0xff] }
 0x58d   :  { %5328 = vmatprep.subr.bf16.mxu0 %v9617_v15  ;;  %5392 = vmatprep.subr.bf16.mxu1 %v9618_v10  ;;  %v9628_v15 = vld [vmem:[#allocation30_spill] sm:$0xff]  ;;  %v9629_v10 = vld [vmem:[#allocation12_spill] sm:$0xff] }
 0x590   :  { %5330 = vmatpush1.bf16.msra.mxu0 %v9619_v24  ;;  %5394 = vmatpush1.bf16.msra.mxu1 %v9620_v45  ;;  %v9630_v24 = vld [vmem:[#allocation32_spill] sm:$0xff]  ;;  %v9631_v45 = vld [vmem:[#allocation13_spill] sm:$0xff] }
 0x591   :  { %5332 = vmatprep.subr.bf16.mxu0 %v9621_v38  ;;  %5396 = vmatprep.subr.bf16.mxu1 %v9622_v12  ;;  %v9632_v38 = vld [vmem:[#allocation34_spill] sm:$0xff] }
 0x592   :  { %v9633_v12 = vld [vmem:[#allocation14_spill] sm:$0xff] }
 0x594   :  { %5334 = vmatpush1.bf16.msra.mxu0 %v9623_v28  ;;  %5398 = vmatpush1.bf16.msra.mxu1 %v9624_v4  ;;  %v9634_v28 = vld [vmem:[#allocation36_spill] sm:$0xff]  ;;  %v9635_v4 = vld [vmem:[#allocation15_spill] sm:$0xff] }
 0x595   :  { %5336 = vmatprep.subr.bf16.mxu0 %v9625_v53  ;;  %5400 = vmatprep.subr.bf16.mxu1 %v9626_v39  ;;  %v9636_v53 = vld [vmem:[#allocation38_spill] sm:$0xff]  ;;  %v9637_v39 = vld [vmem:[#allocation17_spill] sm:$0xff] }
 0x598   :  { %5338 = vmatpush1.bf16.msra.mxu0 %v9627_v13  ;;  %5402 = vmatpush1.bf16.msra.mxu1 %v9628_v15  ;;  %v9638_v13 = vld [vmem:[#allocation40_spill] sm:$0xff]  ;;  %v9639_v15 = vld [vmem:[#allocation19_spill] sm:$0xff] }
 0x599   :  { %5340 = vmatprep.subr.bf16.mxu0 %v9629_v10  ;;  %5404 = vmatprep.subr.bf16.mxu1 %v9630_v24  ;;  %v9640_v10 = vld [vmem:[#allocation42_spill] sm:$0xff]  ;;  %v9641_v24 = vld [vmem:[#allocation21_spill] sm:$0xff] }
 0x59c   :  { %5342 = vmatpush1.bf16.msra.mxu0 %v9631_v45  ;;  %5406 = vmatpush1.bf16.msra.mxu1 %v9632_v38  ;;  %v9642_v45 = vld [vmem:[#allocation44_spill] sm:$0xff]  ;;  %v9643_v38 = vld [vmem:[#allocation23_spill] sm:$0xff] }
 0x59d   :  { %5344 = vmatprep.subr.bf16.mxu0 %v9633_v12  ;;  %5408 = vmatprep.subr.bf16.mxu1 %v9634_v28  ;;  %v9644_v12 = vld [vmem:[#allocation46_spill] sm:$0xff]  ;;  %v9645_v28 = vld [vmem:[#allocation25_spill] sm:$0xff] }
 0x5a0   :  { %5346 = vmatpush1.bf16.msra.mxu0 %v9635_v4  ;;  %5410 = vmatpush1.bf16.msra.mxu1 %v9636_v53  ;;  %v9646_v4 = vld [vmem:[#allocation48_spill] sm:$0xff]  ;;  %v9647_v53 = vld [vmem:[#allocation27_spill] sm:$0xff] }
 0x5a1   :  { %5348 = vmatprep.subr.bf16.mxu0 %v9637_v39  ;;  %5412 = vmatprep.subr.bf16.mxu1 %v9638_v13  ;;  %v9648_v39 = vld [vmem:[#allocation50_spill] sm:$0xff]  ;;  %v9649_v13 = vld [vmem:[#allocation29_spill] sm:$0xff] }
 0x5a4   :  { %5350 = vmatpush1.bf16.msra.mxu0 %v9639_v15  ;;  %5414 = vmatpush1.bf16.msra.mxu1 %v9640_v10  ;;  %v9650_v15 = vld [vmem:[#allocation52_spill] sm:$0xff]  ;;  %v9651_v10 = vld [vmem:[#allocation31_spill] sm:$0xff] }
 0x5a5   :  { %5352 = vmatprep.subr.bf16.mxu0 %v9641_v24  ;;  %5416 = vmatprep.subr.bf16.mxu1 %v9642_v45  ;;  %v9652_v24 = vld [vmem:[#allocation54_spill] sm:$0xff]  ;;  %v9653_v45 = vld [vmem:[#allocation33_spill] sm:$0xff] }
 0x5a8   :  { %5354 = vmatpush1.bf16.msra.mxu0 %v9643_v38  ;;  %5418 = vmatpush1.bf16.msra.mxu1 %v9644_v12  ;;  %v9654_v38 = vld [vmem:[#allocation56_spill] sm:$0xff]  ;;  %v9655_v12 = vld [vmem:[#allocation35_spill] sm:$0xff] }
 0x5a9   :  { %5356 = vmatprep.subr.bf16.mxu0 %v9645_v28  ;;  %5420 = vmatprep.subr.bf16.mxu1 %v9646_v4  ;;  %v9656_v28 = vld [vmem:[#allocation58_spill] sm:$0xff]  ;;  %v9657_v4 = vld [vmem:[#allocation37_spill] sm:$0xff] }
 0x5ac   :  { %5358 = vmatpush1.bf16.msra.mxu0 %v9647_v53  ;;  %5422 = vmatpush1.bf16.msra.mxu1 %v9648_v39  ;;  %v9658_v53 = vld [vmem:[#allocation60_spill] sm:$0xff]  ;;  %v9659_v39 = vld [vmem:[#allocation39_spill] sm:$0xff] }
 0x5ad   :  { %5360 = vmatprep.subr.bf16.mxu0 %v9649_v13  ;;  %5424 = vmatprep.subr.bf16.mxu1 %v9650_v15  ;;  %v9660_v13 = vld [vmem:[#allocation62_spill] sm:$0xff]  ;;  %v9661_v15 = vld [vmem:[#allocation41_spill] sm:$0xff] }
 0x5b0   :  { %5362 = vmatpush1.bf16.msra.mxu0 %v9651_v10  ;;  %5426 = vmatpush1.bf16.msra.mxu1 %v9652_v24  ;;  %v9662_v10 = vld [vmem:[#allocation64_spill] sm:$0xff]  ;;  %v9663_v24 = vld [vmem:[#allocation43_spill] sm:$0xff] }
 0x5b1   :  { %5364 = vmatprep.subr.bf16.mxu0 %v9653_v45  ;;  %5428 = vmatprep.subr.bf16.mxu1 %v9654_v38  ;;  %v9664_v45 = vld [vmem:[#allocation66_spill] sm:$0xff]  ;;  %v9665_v38 = vld [vmem:[#allocation45_spill] sm:$0xff] }
 0x5b4   :  { %5366 = vmatpush1.bf16.msra.mxu0 %v9655_v12  ;;  %5430 = vmatpush1.bf16.msra.mxu1 %v9656_v28  ;;  %v9666_v12 = vld [vmem:[#allocation68_spill] sm:$0xff]  ;;  %v9667_v28 = vld [vmem:[#allocation47_spill] sm:$0xff] }
 0x5b5   :  { %5368 = vmatprep.subr.bf16.mxu0 %v9657_v4  ;;  %5432 = vmatprep.subr.bf16.mxu1 %v9658_v53  ;;  %v9668_v4 = vld [vmem:[#allocation70_spill] sm:$0xff]  ;;  %v9669_v53 = vld [vmem:[#allocation49_spill] sm:$0xff] }
 0x5b8   :  { %5370 = vmatpush1.bf16.msra.mxu0 %v9659_v39  ;;  %5434 = vmatpush1.bf16.msra.mxu1 %v9660_v13  ;;  %v9670_v39 = vld [vmem:[#allocation72_spill] sm:$0xff]  ;;  %v9671_v13 = vld [vmem:[#allocation51_spill] sm:$0xff] }
 0x5b9   :  { %5372 = vmatprep.subr.bf16.mxu0 %v9661_v15  ;;  %5436 = vmatprep.subr.bf16.mxu1 %v9662_v10  ;;  %v9672_v15 = vld [vmem:[#allocation74_spill] sm:$0xff]  ;;  %v9673_v10 = vld [vmem:[#allocation53_spill] sm:$0xff] }
 0x5bc   :  { %5374 = vmatpush1.bf16.msra.mxu0 %v9663_v24  ;;  %5438 = vmatpush1.bf16.msra.mxu1 %v9664_v45  ;;  %v9674_v24 = vld [vmem:[#allocation76_spill] sm:$0xff]  ;;  %v9675_v45 = vld [vmem:[#allocation55_spill] sm:$0xff] }
 0x5bd   :  { %5376 = vmatprep.subr.bf16.mxu0 %v9665_v38  ;;  %5440 = vmatprep.subr.bf16.mxu1 %v9666_v12  ;;  %v9676_v38 = vld [vmem:[#allocation78_spill] sm:$0xff]  ;;  %v9677_v12 = vld [vmem:[#allocation57_spill] sm:$0xff] }
 0x5c0   :  { %5378 = vmatpush1.bf16.msra.mxu0 %v9667_v28  ;;  %5442 = vmatpush1.bf16.msra.mxu1 %v9668_v4  ;;  %v9678_v28 = vld [vmem:[#allocation80_spill] sm:$0xff] }
 0x5c1   :  { %5380 = vmatprep.subr.bf16.mxu0 %v9669_v53  ;;  %5444 = vmatprep.subr.bf16.mxu1 %v9670_v39  ;;  %v2241_v53 = vld [vmem:[#allocation2 + $0x50] sm:$0x3] }
 0x5c4   :  { %5382 = vmatpush1.bf16.msra.mxu0 %v9671_v13  ;;  %5446 = vmatpush1.bf16.msra.mxu1 %v9672_v15  ;;  %v2242_v13 = vld [vmem:[#allocation2 + $0x58] sm:$0x3] }
 0x5c5   :  { %5384 = vmatprep.subr.bf16.mxu0 %v9673_v10  ;;  %5448 = vmatprep.subr.bf16.mxu1 %v9674_v24 }
 0x5c8   :  { %5386 = vmatpush1.bf16.msra.mxu0 %v9675_v45  ;;  %5450 = vmatpush1.bf16.msra.mxu1 %v9676_v38 }
 0x5c9   :  { %5452 = vmatprep.subr.bf16.mxu0 %v9677_v12  ;;  %5516 = vmatprep.subr.bf16.mxu1 %v9678_v28  ;;  %v2582_v28 = vrot.slane %v8283_v14, 6 }
 0x61e   :  { %v2316_v4 = vpop.f32.mrb[20].mxu0  ;;  %v2387_v63 = vpop.f32.mrb[28].mxu1 }
 0x61f   :  { %v2536_v39 = vadd.f32 %v2387_v63, %v2241_v53  ;;  %v2318_v32 = vpop.f32.mrb[21].mxu0  ;;  %v2389_v59 = vpop.f32.mrb[29].mxu1  ;;  %v2583_v63 = vrot.slane %v8285_v42, 6 }
 0x620   :  { %v2537_v15 = vadd.f32 %v2389_v59, %v2242_v13  ;;  %v2534_v59 = vadd.f32 %v2316_v4, %v2239_v43  ;;  %v2246_v43 = vld [vmem:[#allocation2 + $0x78] sm:$0x3] }
 0x621   :  { %v3926_v9 = vmul.f32 -1.442695, %v2536_v39  ;;  %v2240_v39 = vld [vmem:[#allocation2 + $0x48] sm:$0x3] }
 0x622   :  { %v3927_v10 = vmul.f32 -1.442695, %v2537_v15  ;;  %v2535_v13 = vadd.f32 %v2318_v32, %v2240_v39 }
 0x623   :  { %6253 = vpow2.f32 %v3926_v9  ;;  %v3924_v9 = vmul.f32 -1.442695, %v2534_v59 }
 0x624   :  { %6255 = vpow2.f32 %v3927_v10  ;;  %v3925_v15 = vmul.f32 -1.442695, %v2535_v13 }
 0x62d   :  { %v6254_v24 = vpop.eup %6253 }
 0x62e   :  { %v2560_v45 = vadd.f32 1.0, %v6254_v24  ;;  %v6256_v33 = vpop.eup %6255 }
 0x62f   :  { %v2561_v38 = vadd.f32 1.0, %v6256_v33 }
 0x630   :  { %6257 = vrcp.f32 %v2560_v45  ;;  %v2243_v45 = vld [vmem:[#allocation2 + $0x60] sm:$0x3] }
 0x631   :  { %6259 = vrcp.f32 %v2561_v38 }
 0x632   :  { %6261 = vpow2.f32 %v3924_v9 }
 0x633   :  { %6263 = vpow2.f32 %v3925_v15 }
 0x63a   :  { %v6258_v12 = vpop.eup %6257 }
 0x63b   :  { %v2586_v1 = vmul.f32 %v6258_v12, %v2582_v28  ;;  %v6260_v53 = vpop.eup %6259 }
 0x63c   :  { %v2587_v46 = vmul.f32 %v6260_v53, %v2583_v63  ;;  %v6262_v10 = vpop.eup %6261  ;;  %v2244_v63 = vld [vmem:[#allocation2 + $0x68] sm:$0x3] }
 0x63d   :  { %v6264_v24 = vpop.eup %6263  ;;  %v2548_v33 = vadd.f32 1.0, %v6262_v10 }
 0x63e   :  { %v2549_v38 = vadd.f32 1.0, %v6264_v24 }
 0x63f   :  { %6265 = vrcp.f32 %v2548_v33 }
 0x640   :  { %6267 = vrcp.f32 %v2549_v38 }
 0x649   :  { %v6266_v9 = vpop.eup %6265 }
 0x64a   :  { %v6268_v15 = vpop.eup %6267 }
 0x65e   :  { %v2458_v14 = vpop.f32.mrb[22].mxu0  ;;  %v2529_v12 = vpop.f32.mrb[30].mxu1 }
 0x65f   :  { %v2538_v42 = vadd.f32 %v2458_v14, %v2243_v45  ;;  %v2540_v28 = vadd.f32 %v2529_v12, %v2245_v60  ;;  %v2460_v53 = vpop.f32.mrb[23].mxu0  ;;  %v2531_v4 = vpop.f32.mrb[31].mxu1 }
 0x660   :  { %v2539_v32 = vadd.f32 %v2460_v53, %v2244_v63  ;;  %v2541_v59 = vadd.f32 %v2531_v4, %v2246_v43 }
 0x661   :  { %6269 = vtanh.f32 %v2538_v42  ;;  %v3928_v39 = vmul.f32 -1.442695, %v2540_v28 }
 0x662   :  { %6271 = vtanh.f32 %v2539_v32  ;;  %v3929_v13 = vmul.f32 -1.442695, %v2541_v59  ;;  %v9681_v59 = vld [vmem:[#allocation122_spill] sm:$0xff] }
 0x663   :  { %6273 = vpow2.f32 %v3928_v39  ;;  %v9682_v39 = vld [vmem:[#allocation103_spill] sm:$0xff] }
 0x664   :  { %6275 = vpow2.f32 %v3929_v13  ;;  %v9683_v13 = vld [vmem:[#allocation123_spill] sm:$0xff] }
 0x66b   :  { %v6270_v10 = vpop.eup %6269 }
 0x66c   :  { %v6272_v24 = vpop.eup %6271  ;;  %v2588_v33 = vmul.f32 %v6270_v10, %v6266_v9  ;;  %v9684_v9 = vld [vmem:[#allocation105_spill] sm:$0xff]  ;;  %v9686_v10 = vld [vmem:[#allocation107_spill] sm:$0xff] }
 0x66d   :  { %v6274_v45 = vpop.eup %6273  ;;  %v2589_v60 = vmul.f32 %v6272_v24, %v6268_v15  ;;  %v9685_v15 = vld [vmem:[#allocation124_spill] sm:$0xff]  ;;  %v9687_v24 = vld [vmem:[#allocation125_spill] sm:$0xff] }
 0x66e   :  { %v6276_v14 = vpop.eup %6275  ;;  %v8425_v12 = vadd.f32 %v2588_v33, %v2586_v1  ;;  %v2574_v58 = vadd.f32 1.0, %v6274_v45  ;;  %v9688_v33 = vld [vmem:[#allocation109_spill] sm:$0xff]  ;;  %v9689_v45 = vld [vmem:[#allocation126_spill] sm:$0xff] }
 0x66f   :  { %v8427_v38 = vadd.f32 %v2589_v60, %v2587_v46  ;;  %v2575_v63 = vadd.f32 1.0, %v6276_v14  ;;  %v9680_v46 = vld [vmem:[#allocation101_spill] sm:$0xff]  ;;  %v9690_v60 = vld [vmem:[#allocation111_spill] sm:$0xff] }
 0x670   :  { %6277 = vtanh.f32 %v8425_v12  ;;  %v9691_v14 = vld [vmem:[#allocation127_spill] sm:$0xff] }
 0x671   :  { %6279 = vrcp.f32 %v2574_v58  ;;  %v9679_v58 = vld [vmem:[#allocation121_spill] sm:$0xff] }
 0x672   :  { %6281 = vtanh.f32 %v8427_v38 }
 0x673   :  { %6283 = vrcp.f32 %v2575_v63  ;;  %v9692_v63 = vld [vmem:[#allocation113_spill] sm:$0xff] }
 0x67a   :  { %v6278_v42 = vpop.eup %6277 }
 0x67b   :  { %v6280_v28 = vpop.eup %6279 }
 0x67c   :  { %v6282_v53 = vpop.eup %6281  ;;  %v8431_v43 = vmul.f32 %v6280_v28, %v6278_v42  ;;  %v9693_v42 = vld [vmem:[#allocation128_spill] sm:$0xff]  ;;  %v9694_v28 = vld [vmem:[#allocation115_spill] sm:$0xff] }
 0x67d   :  { %v6284_v4 = vpop.eup %6283 }
 0x67e   :  { %v2595_v32 = vmul.f32 %v6284_v4, %v6282_v53  ;;  %2596 = vst [vmem:[#allocation3 + $0x10] sm:$0x3] %v8431_v43  ;;  %v9695_v53 = vld [vmem:[#allocation129_spill] sm:$0xff] }
 0x67f   :  { %v9696_v4 = vld [vmem:[#allocation117_spill] sm:$0xff] }
 0x680   :  { %v2598_v1 = vrot.slane %v2595_v32, 2  ;;  %2673 = vmatprep.mubr.f32.mxu0 %v2595_v32  ;;  %2744 = vmatprep.mubr.f32.mxu1 %v2595_v32 }
 0x681   :  { %2674 = vmatmul.mubr.f32.vlgmr.msra.gmra.mrb[24].mxu0 %v8431_v43  ;;  %2745 = vmatmul.mubr.f32.vlgmr.msra.gmra.mrb[32].mxu1 %v8431_v43 }
 0x682   :  { %2600 = vst [vmem:[#allocation3 + $0x8] sm:$0xc0] %v2598_v1  ;;  %5454 = vmatpush1.bf16.msra.mxu0 %v9329_v36  ;;  %5518 = vmatpush1.bf16.msra.mxu1 %v9330_v23  ;;  %v9698_v1 = vld [vmem:[#allocation119_spill] sm:$0xff] }
 0x683   :  { %2815 = vmatprep.mubr.f32.mxu0 %v2595_v32  ;;  %2886 = vmatprep.mubr.f32.mxu1 %v2595_v32  ;;  %v9697_v32 = vld [vmem:[#allocation130_spill] sm:$0xff] }
 0x684   :  { %5456 = vmatprep.subr.bf16.mxu0 %v9331_v40  ;;  %5520 = vmatprep.subr.bf16.mxu1 %v9332_v26 }
 0x686   :  { %5458 = vmatpush1.bf16.msra.mxu0 %v9333_v11  ;;  %5522 = vmatpush1.bf16.msra.mxu1 %v9334_v30 }
 0x687   :  { %5460 = vmatprep.subr.bf16.mxu0 %v9335_v25  ;;  %5524 = vmatprep.subr.bf16.mxu1 %v9336_v0 }
 0x68a   :  { %5462 = vmatpush1.bf16.msra.mxu0 %v9415_v6  ;;  %5526 = vmatpush1.bf16.msra.mxu1 %v9416_v48 }
 0x68b   :  { %5464 = vmatprep.subr.bf16.mxu0 %v9417_v55  ;;  %5528 = vmatprep.subr.bf16.mxu1 %v9418_v29 }
 0x68e   :  { %5466 = vmatpush1.bf16.msra.mxu0 %v9419_v57  ;;  %5530 = vmatpush1.bf16.msra.mxu1 %v9420_v35 }
 0x68f   :  { %5468 = vmatprep.subr.bf16.mxu0 %v9421_v47  ;;  %5532 = vmatprep.subr.bf16.mxu1 %v9422_v27 }
 0x692   :  { %5470 = vmatpush1.bf16.msra.mxu0 %v9423_v37  ;;  %5534 = vmatpush1.bf16.msra.mxu1 %v9424_v16 }
 0x693   :  { %5472 = vmatprep.subr.bf16.mxu0 %v9347_v51  ;;  %5536 = vmatprep.subr.bf16.mxu1 %v9425_v18 }
 0x696   :  { %5474 = vmatpush1.bf16.msra.mxu0 %v9349_v22  ;;  %5538 = vmatpush1.bf16.msra.mxu1 %v9426_v56 }
 0x697   :  { %5476 = vmatprep.subr.bf16.mxu0 %v9351_v3  ;;  %5540 = vmatprep.subr.bf16.mxu1 %v9427_v62 }
 0x69a   :  { %5478 = vmatpush1.bf16.msra.mxu0 %v9353_v19  ;;  %5542 = vmatpush1.bf16.msra.mxu1 %v9428_v41 }
 0x69b   :  { %5480 = vmatprep.subr.bf16.mxu0 %v9355_v54  ;;  %5544 = vmatprep.subr.bf16.mxu1 %v9429_v31 }
 0x69e   :  { %5482 = vmatpush1.bf16.msra.mxu0 %v9357_v2  ;;  %5546 = vmatpush1.bf16.msra.mxu1 %v9430_v34 }
 0x69f   :  { %5484 = vmatprep.subr.bf16.mxu0 %v9503_v7  ;;  %5548 = vmatprep.subr.bf16.mxu1 %v9431_v8 }
 0x6a2   :  { %5486 = vmatpush1.bf16.msra.mxu0 %v9504_v44  ;;  %5550 = vmatpush1.bf16.msra.mxu1 %v9432_v52 }
 0x6a3   :  { %5488 = vmatprep.subr.bf16.mxu0 %v9360_v17  ;;  %5552 = vmatprep.subr.bf16.mxu1 %v9433_v49 }
 0x6a6   :  { %5490 = vmatpush1.bf16.msra.mxu0 %v9505_v20  ;;  %5554 = vmatpush1.bf16.msra.mxu1 %v9434_v50 }
 0x6a7   :  { %5492 = vmatprep.subr.bf16.mxu0 %v9506_v61  ;;  %5556 = vmatprep.subr.bf16.mxu1 %v9435_v21 }
 0x6aa   :  { %5494 = vmatpush1.bf16.msra.mxu0 %v9591_v5  ;;  %5558 = vmatpush1.bf16.msra.mxu1 %v9679_v58 }
 0x6ab   :  { %5496 = vmatprep.subr.bf16.mxu0 %v9680_v46  ;;  %5560 = vmatprep.subr.bf16.mxu1 %v9681_v59 }
 0x6ae   :  { %5498 = vmatpush1.bf16.msra.mxu0 %v9682_v39  ;;  %5562 = vmatpush1.bf16.msra.mxu1 %v9683_v13  ;;  %v2966_v39 = vrot.slane %v8427_v38, 6 }
 0x6af   :  { %5500 = vmatprep.subr.bf16.mxu0 %v9684_v9  ;;  %5564 = vmatprep.subr.bf16.mxu1 %v9685_v15  ;;  %v2604_v15 = vld [vmem:[#allocation2 + $0x58] sm:$0xc] }
 0x6b2   :  { %5502 = vmatpush1.bf16.msra.mxu0 %v9686_v10  ;;  %5566 = vmatpush1.bf16.msra.mxu1 %v9687_v24 }
 0x6b3   :  { %5504 = vmatprep.subr.bf16.mxu0 %v9688_v33  ;;  %5568 = vmatprep.subr.bf16.mxu1 %v9689_v45  ;;  %v9699_v33 = vld [vmem:[#allocation131_spill] sm:$0xff]  ;;  %v9700_v45 = vld [vmem:[#allocation4_spill] sm:$0xff] }
 0x6b6   :  { %5506 = vmatpush1.bf16.msra.mxu0 %v9690_v60  ;;  %5570 = vmatpush1.bf16.msra.mxu1 %v9691_v14  ;;  %v9701_v60 = vld [vmem:[#allocation16_spill] sm:$0xff] }
 0x6b7   :  { %5508 = vmatprep.subr.bf16.mxu0 %v9692_v63  ;;  %5572 = vmatprep.subr.bf16.mxu1 %v9693_v42  ;;  %v9702_v42 = vld [vmem:[#allocation5_spill] sm:$0xff]  ;;  %v9711_v63 = vld [vmem:[#allocation26_spill] sm:$0xff] }
 0x6ba   :  { %5510 = vmatpush1.bf16.msra.mxu0 %v9694_v28  ;;  %5574 = vmatpush1.bf16.msra.mxu1 %v9695_v53  ;;  %v9703_v28 = vld [vmem:[#allocation18_spill] sm:$0xff] }
 0x6bb   :  { %5512 = vmatprep.subr.bf16.mxu0 %v9696_v4  ;;  %5576 = vmatprep.subr.bf16.mxu1 %v9697_v32  ;;  %v9704_v53 = vld [vmem:[#allocation6_spill] sm:$0xff]  ;;  %v9705_v4 = vld [vmem:[#allocation20_spill] sm:$0xff]  ;;  %v9706_v32 = vld [vmem:[#allocation7_spill] sm:$0xff] }
 0x6be   :  { %5514 = vmatpush1.bf16.msra.mxu0 %v9698_v1  ;;  %5578 = vmatpush1.bf16.msra.mxu1 %v9699_v33  ;;  %v9707_v1 = vld [vmem:[#allocation22_spill] sm:$0xff]  ;;  %v9708_v33 = vld [vmem:[#allocation8_spill] sm:$0xff] }
 0x6bf   :  { %5580 = vmatprep.subr.bf16.mxu0 %v9700_v45  ;;  %5644 = vmatprep.subr.bf16.mxu1 %v9701_v60  ;;  %v9709_v45 = vld [vmem:[#allocation24_spill] sm:$0xff]  ;;  %v9710_v60 = vld [vmem:[#allocation9_spill] sm:$0xff] }
 0x6c1   :  { %2816 = vmatmul.mubr.f32.vlgmr.msra.gmra.mrb[26].mxu0 %v8431_v43  ;;  %2887 = vmatmul.mubr.f32.vlgmr.msra.gmra.mrb[34].mxu1 %v8431_v43  ;;  %v9712_v43 = vld [vmem:[#allocation10_spill] sm:$0xff] }
 0x6c2   :  { %5582 = vmatpush1.bf16.msra.mxu0 %v9702_v42  ;;  %5646 = vmatpush1.bf16.msra.mxu1 %v9703_v28  ;;  %v9713_v42 = vld [vmem:[#allocation28_spill] sm:$0xff]  ;;  %v9714_v28 = vld [vmem:[#allocation11_spill] sm:$0xff] }
 0x6c3   :  { %5584 = vmatprep.subr.bf16.mxu0 %v9704_v53  ;;  %5648 = vmatprep.subr.bf16.mxu1 %v9705_v4  ;;  %v9715_v53 = vld [vmem:[#allocation30_spill] sm:$0xff]  ;;  %v9716_v4 = vld [vmem:[#allocation12_spill] sm:$0xff] }
 0x6c6   :  { %5586 = vmatpush1.bf16.msra.mxu0 %v9706_v32  ;;  %5650 = vmatpush1.bf16.msra.mxu1 %v9707_v1  ;;  %v9717_v32 = vld [vmem:[#allocation32_spill] sm:$0xff]  ;;  %v9718_v1 = vld [vmem:[#allocation13_spill] sm:$0xff] }
 0x6c7   :  { %5588 = vmatprep.subr.bf16.mxu0 %v9708_v33  ;;  %5652 = vmatprep.subr.bf16.mxu1 %v9709_v45  ;;  %v9719_v33 = vld [vmem:[#allocation34_spill] sm:$0xff] }
 0x6c8   :  { %v9720_v45 = vld [vmem:[#allocation14_spill] sm:$0xff] }
 0x6ca   :  { %5590 = vmatpush1.bf16.msra.mxu0 %v9710_v60  ;;  %5654 = vmatpush1.bf16.msra.mxu1 %v9711_v63  ;;  %v9721_v60 = vld [vmem:[#allocation36_spill] sm:$0xff]  ;;  %v9722_v63 = vld [vmem:[#allocation15_spill] sm:$0xff] }
 0x6cb   :  { %5592 = vmatprep.subr.bf16.mxu0 %v9712_v43  ;;  %5656 = vmatprep.subr.bf16.mxu1 %v9713_v42  ;;  %v9723_v43 = vld [vmem:[#allocation38_spill] sm:$0xff]  ;;  %v9724_v42 = vld [vmem:[#allocation17_spill] sm:$0xff] }
 0x6ce   :  { %5594 = vmatpush1.bf16.msra.mxu0 %v9714_v28  ;;  %5658 = vmatpush1.bf16.msra.mxu1 %v9715_v53  ;;  %v9725_v28 = vld [vmem:[#allocation40_spill] sm:$0xff]  ;;  %v9726_v53 = vld [vmem:[#allocation19_spill] sm:$0xff] }
 0x6cf   :  { %5596 = vmatprep.subr.bf16.mxu0 %v9716_v4  ;;  %5660 = vmatprep.subr.bf16.mxu1 %v9717_v32  ;;  %v9727_v4 = vld [vmem:[#allocation42_spill] sm:$0xff]  ;;  %v9728_v32 = vld [vmem:[#allocation21_spill] sm:$0xff] }
 0x6d2   :  { %5598 = vmatpush1.bf16.msra.mxu0 %v9718_v1  ;;  %5662 = vmatpush1.bf16.msra.mxu1 %v9719_v33  ;;  %v9729_v1 = vld [vmem:[#allocation44_spill] sm:$0xff]  ;;  %v9730_v33 = vld [vmem:[#allocation23_spill] sm:$0xff] }
 0x6d3   :  { %5600 = vmatprep.subr.bf16.mxu0 %v9720_v45  ;;  %5664 = vmatprep.subr.bf16.mxu1 %v9721_v60  ;;  %v9731_v45 = vld [vmem:[#allocation46_spill] sm:$0xff]  ;;  %v9732_v60 = vld [vmem:[#allocation25_spill] sm:$0xff] }
 0x6d6   :  { %5602 = vmatpush1.bf16.msra.mxu0 %v9722_v63  ;;  %5666 = vmatpush1.bf16.msra.mxu1 %v9723_v43  ;;  %v9733_v63 = vld [vmem:[#allocation48_spill] sm:$0xff]  ;;  %v9734_v43 = vld [vmem:[#allocation27_spill] sm:$0xff] }
 0x6d7   :  { %5604 = vmatprep.subr.bf16.mxu0 %v9724_v42  ;;  %5668 = vmatprep.subr.bf16.mxu1 %v9725_v28  ;;  %v9735_v42 = vld [vmem:[#allocation50_spill] sm:$0xff]  ;;  %v9736_v28 = vld [vmem:[#allocation29_spill] sm:$0xff] }
 0x6da   :  { %5606 = vmatpush1.bf16.msra.mxu0 %v9726_v53  ;;  %5670 = vmatpush1.bf16.msra.mxu1 %v9727_v4  ;;  %v9737_v53 = vld [vmem:[#allocation52_spill] sm:$0xff]  ;;  %v9738_v4 = vld [vmem:[#allocation31_spill] sm:$0xff] }
 0x6db   :  { %5608 = vmatprep.subr.bf16.mxu0 %v9728_v32  ;;  %5672 = vmatprep.subr.bf16.mxu1 %v9729_v1  ;;  %v9739_v32 = vld [vmem:[#allocation54_spill] sm:$0xff]  ;;  %v9740_v1 = vld [vmem:[#allocation33_spill] sm:$0xff] }
 0x6de   :  { %5610 = vmatpush1.bf16.msra.mxu0 %v9730_v33  ;;  %5674 = vmatpush1.bf16.msra.mxu1 %v9731_v45  ;;  %v9741_v33 = vld [vmem:[#allocation56_spill] sm:$0xff]  ;;  %v9742_v45 = vld [vmem:[#allocation35_spill] sm:$0xff] }
 0x6df   :  { %5612 = vmatprep.subr.bf16.mxu0 %v9732_v60  ;;  %5676 = vmatprep.subr.bf16.mxu1 %v9733_v63  ;;  %v9743_v60 = vld [vmem:[#allocation58_spill] sm:$0xff]  ;;  %v9744_v63 = vld [vmem:[#allocation37_spill] sm:$0xff] }
 0x6e2   :  { %5614 = vmatpush1.bf16.msra.mxu0 %v9734_v43  ;;  %5678 = vmatpush1.bf16.msra.mxu1 %v9735_v42  ;;  %v9745_v43 = vld [vmem:[#allocation60_spill] sm:$0xff]  ;;  %v9746_v42 = vld [vmem:[#allocation39_spill] sm:$0xff] }
 0x6e3   :  { %5616 = vmatprep.subr.bf16.mxu0 %v9736_v28  ;;  %5680 = vmatprep.subr.bf16.mxu1 %v9737_v53  ;;  %v9747_v28 = vld [vmem:[#allocation62_spill] sm:$0xff]  ;;  %v9748_v53 = vld [vmem:[#allocation41_spill] sm:$0xff] }
 0x6e6   :  { %5618 = vmatpush1.bf16.msra.mxu0 %v9738_v4  ;;  %5682 = vmatpush1.bf16.msra.mxu1 %v9739_v32  ;;  %v9749_v4 = vld [vmem:[#allocation64_spill] sm:$0xff]  ;;  %v9750_v32 = vld [vmem:[#allocation43_spill] sm:$0xff] }
 0x6e7   :  { %5620 = vmatprep.subr.bf16.mxu0 %v9740_v1  ;;  %5684 = vmatprep.subr.bf16.mxu1 %v9741_v33  ;;  %v9751_v1 = vld [vmem:[#allocation66_spill] sm:$0xff]  ;;  %v9752_v33 = vld [vmem:[#allocation45_spill] sm:$0xff] }
 0x6ea   :  { %5622 = vmatpush1.bf16.msra.mxu0 %v9742_v45  ;;  %5686 = vmatpush1.bf16.msra.mxu1 %v9743_v60  ;;  %v9753_v45 = vld [vmem:[#allocation68_spill] sm:$0xff]  ;;  %v9754_v60 = vld [vmem:[#allocation47_spill] sm:$0xff] }
 0x6eb   :  { %5624 = vmatprep.subr.bf16.mxu0 %v9744_v63  ;;  %5688 = vmatprep.subr.bf16.mxu1 %v9745_v43  ;;  %v9755_v63 = vld [vmem:[#allocation70_spill] sm:$0xff]  ;;  %v9756_v43 = vld [vmem:[#allocation49_spill] sm:$0xff] }
 0x6ee   :  { %5626 = vmatpush1.bf16.msra.mxu0 %v9746_v42  ;;  %5690 = vmatpush1.bf16.msra.mxu1 %v9747_v28  ;;  %v9757_v42 = vld [vmem:[#allocation72_spill] sm:$0xff]  ;;  %v9758_v28 = vld [vmem:[#allocation51_spill] sm:$0xff] }
 0x6ef   :  { %5628 = vmatprep.subr.bf16.mxu0 %v9748_v53  ;;  %5692 = vmatprep.subr.bf16.mxu1 %v9749_v4  ;;  %v9759_v53 = vld [vmem:[#allocation74_spill] sm:$0xff]  ;;  %v9760_v4 = vld [vmem:[#allocation53_spill] sm:$0xff] }
 0x6f2   :  { %5630 = vmatpush1.bf16.msra.mxu0 %v9750_v32  ;;  %5694 = vmatpush1.bf16.msra.mxu1 %v9751_v1  ;;  %v9761_v32 = vld [vmem:[#allocation76_spill] sm:$0xff]  ;;  %v9762_v1 = vld [vmem:[#allocation55_spill] sm:$0xff] }
 0x6f3   :  { %5632 = vmatprep.subr.bf16.mxu0 %v9752_v33  ;;  %5696 = vmatprep.subr.bf16.mxu1 %v9753_v45  ;;  %v9763_v33 = vld [vmem:[#allocation78_spill] sm:$0xff]  ;;  %v9764_v45 = vld [vmem:[#allocation57_spill] sm:$0xff] }
 0x6f6   :  { %5634 = vmatpush1.bf16.msra.mxu0 %v9754_v60  ;;  %5698 = vmatpush1.bf16.msra.mxu1 %v9755_v63  ;;  %v9765_v60 = vld [vmem:[#allocation80_spill] sm:$0xff] }
 0x6f7   :  { %5636 = vmatprep.subr.bf16.mxu0 %v9756_v43  ;;  %5700 = vmatprep.subr.bf16.mxu1 %v9757_v42 }
 0x6fa   :  { %5638 = vmatpush1.bf16.msra.mxu0 %v9758_v28  ;;  %5702 = vmatpush1.bf16.msra.mxu1 %v9759_v53  ;;  %v2603_v28 = vld [vmem:[#allocation2 + $0x50] sm:$0xc] }
 0x6fb   :  { %5640 = vmatprep.subr.bf16.mxu0 %v9760_v4  ;;  %5704 = vmatprep.subr.bf16.mxu1 %v9761_v32 }
 0x6fe   :  { %5642 = vmatpush1.bf16.msra.mxu0 %v9762_v1  ;;  %5706 = vmatpush1.bf16.msra.mxu1 %v9763_v33 }
 0x6ff   :  { %5708 = vmatprep.subr.bf16.mxu0 %v9764_v45  ;;  %5772 = vmatprep.subr.bf16.mxu1 %v9765_v60  ;;  %v2965_v60 = vrot.slane %v8425_v12, 6 }
 0x754   :  { %v2675_v63 = vpop.f32.mrb[24].mxu0  ;;  %v2746_v43 = vpop.f32.mrb[32].mxu1 }
 0x755   :  { %v2903_v14 = vrot.slane %v2746_v43, 6  ;;  %v2677_v42 = vpop.f32.mrb[25].mxu0  ;;  %v2748_v24 = vpop.f32.mrb[33].mxu1 }
 0x756   :  { %v2904_v10 = vrot.slane %v2748_v24, 6 }
 0x757   :  { %v2919_v53 = vadd.f32 %v2903_v14, %v2603_v28  ;;  %v2901_v28 = vrot.slane %v2675_v63, 6  ;;  %v2605_v63 = vld [vmem:[#allocation2 + $0x60] sm:$0xc] }
 0x758   :  { %v2920_v4 = vadd.f32 %v2904_v10, %v2604_v15  ;;  %v2902_v15 = vrot.slane %v2677_v42, 6  ;;  %v2601_v10 = vld [vmem:[#allocation2 + $0x40] sm:$0xc]  ;;  %v2607_v42 = vld [vmem:[#allocation2 + $0x70] sm:$0xc] }
 0x759   :  { %v3932_v9 = vmul.f32 -1.442695, %v2919_v53  ;;  %v2917_v53 = vadd.f32 %v2901_v28, %v2601_v10 }
 0x75a   :  { %v3933_v32 = vmul.f32 -1.442695, %v2920_v4 }
 0x75b   :  { %6285 = vpow2.f32 %v3932_v9  ;;  %v2602_v9 = vld [vmem:[#allocation2 + $0x48] sm:$0xc] }
 0x75c   :  { %6287 = vpow2.f32 %v3933_v32  ;;  %v2918_v4 = vadd.f32 %v2902_v15, %v2602_v9  ;;  %v3930_v32 = vmul.f32 -1.442695, %v2917_v53  ;;  %v2606_v53 = vld [vmem:[#allocation2 + $0x68] sm:$0xc]  ;;  %v2608_v9 = vld [vmem:[#allocation2 + $0x78] sm:$0xc] }
 0x765   :  { %v6286_v1 = vpop.eup %6285 }
 0x766   :  { %v2943_v33 = vadd.f32 1.0, %v6286_v1  ;;  %v6288_v13 = vpop.eup %6287  ;;  %v3931_v1 = vmul.f32 -1.442695, %v2918_v4 }
 0x767   :  { %v2944_v45 = vadd.f32 1.0, %v6288_v13 }
 0x768   :  { %6289 = vrcp.f32 %v2943_v33 }
 0x769   :  { %6291 = vrcp.f32 %v2944_v45 }
 0x76a   :  { %6293 = vpow2.f32 %v3930_v32 }
 0x76b   :  { %6295 = vpow2.f32 %v3931_v1 }
 0x772   :  { %v6290_v43 = vpop.eup %6289 }
 0x773   :  { %v2969_v59 = vmul.f32 %v6290_v43, %v2965_v60  ;;  %v6292_v24 = vpop.eup %6291 }
 0x774   :  { %v2970_v14 = vmul.f32 %v6292_v24, %v2966_v39  ;;  %v6294_v13 = vpop.eup %6293 }
 0x775   :  { %v6296_v33 = vpop.eup %6295  ;;  %v2931_v45 = vadd.f32 1.0, %v6294_v13 }
 0x776   :  { %v2932_v12 = vadd.f32 1.0, %v6296_v33 }
 0x777   :  { %6297 = vrcp.f32 %v2931_v45 }
 0x778   :  { %6299 = vrcp.f32 %v2932_v12 }
 0x794   :  { %v2817_v46 = vpop.f32.mrb[26].mxu0  ;;  %v2888_v58 = vpop.f32.mrb[34].mxu1 }
 0x795   :  { %v2905_v38 = vrot.slane %v2817_v46, 6  ;;  %v2907_v60 = vrot.slane %v2888_v58, 6  ;;  %v2819_v43 = vpop.f32.mrb[27].mxu0  ;;  %v2890_v39 = vpop.f32.mrb[35].mxu1 }
 0x796   :  { %v2906_v24 = vrot.slane %v2819_v43, 6  ;;  %v2908_v28 = vrot.slane %v2890_v39, 6  ;;  %v6298_v58 = vpop.eup %6297 }
 0x797   :  { %v2921_v15 = vadd.f32 %v2905_v38, %v2605_v63  ;;  %v2923_v10 = vadd.f32 %v2907_v60, %v2607_v42  ;;  %v6300_v46 = vpop.eup %6299 }
 0x798   :  { %v2922_v4 = vadd.f32 %v2906_v24, %v2606_v53  ;;  %v2924_v32 = vadd.f32 %v2908_v28, %v2608_v9 }
 0x799   :  { %6301 = vtanh.f32 %v2921_v15  ;;  %v3934_v1 = vmul.f32 -1.442695, %v2923_v10 }
 0x79a   :  { %6303 = vtanh.f32 %v2922_v4  ;;  %v3935_v13 = vmul.f32 -1.442695, %v2924_v32  ;;  %v9767_v32 = vld [vmem:[#allocation121_spill] sm:$0xff] }
 0x79b   :  { %6305 = vpow2.f32 %v3934_v1  ;;  %v9768_v1 = vld [vmem:[#allocation101_spill] sm:$0xff] }
 0x79c   :  { %6307 = vpow2.f32 %v3935_v13  ;;  %v9769_v13 = vld [vmem:[#allocation122_spill] sm:$0xff] }
 0x7a3   :  { %v6302_v33 = vpop.eup %6301 }
 0x7a4   :  { %v6304_v5 = vpop.eup %6303  ;;  %v2971_v43 = vmul.f32 %v6302_v33, %v6298_v58  ;;  %v9770_v58 = vld [vmem:[#allocation103_spill] sm:$0xff]  ;;  %v9772_v33 = vld [vmem:[#allocation105_spill] sm:$0xff] }
 0x7a5   :  { %v6306_v39 = vpop.eup %6305  ;;  %v2972_v45 = vmul.f32 %v6304_v5, %v6300_v46  ;;  %v9771_v46 = vld [vmem:[#allocation123_spill] sm:$0xff] }
 0x7a6   :  { %v6308_v38 = vpop.eup %6307  ;;  %v8568_v60 = vadd.f32 %v2971_v43, %v2969_v59  ;;  %v2957_v63 = vadd.f32 1.0, %v6306_v39  ;;  %v9773_v43 = vld [vmem:[#allocation124_spill] sm:$0xff]  ;;  %v9774_v39 = vld [vmem:[#allocation107_spill] sm:$0xff] }
 0x7a7   :  { %v8570_v12 = vadd.f32 %v2972_v45, %v2970_v14  ;;  %v2958_v42 = vadd.f32 1.0, %v6308_v38  ;;  %v9766_v14 = vld [vmem:[#allocation99_spill] sm:$0xff]  ;;  %v9775_v45 = vld [vmem:[#allocation125_spill] sm:$0xff] }
 0x7a8   :  { %6309 = vtanh.f32 %v8568_v60  ;;  %v9776_v38 = vld [vmem:[#allocation109_spill] sm:$0xff] }
 0x7a9   :  { %6311 = vrcp.f32 %v2957_v63  ;;  %v9777_v63 = vld [vmem:[#allocation126_spill] sm:$0xff] }
 0x7aa   :  { %6313 = vtanh.f32 %v8570_v12 }
 0x7ab   :  { %6315 = vrcp.f32 %v2958_v42  ;;  %v9778_v42 = vld [vmem:[#allocation111_spill] sm:$0xff] }
 0x7b2   :  { %v6310_v24 = vpop.eup %6309 }
 0x7b3   :  { %v6312_v28 = vpop.eup %6311 }
 0x7b4   :  { %v6314_v15 = vpop.eup %6313  ;;  %v2977_v10 = vmul.f32 %v6312_v28, %v6310_v24  ;;  %v9779_v24 = vld [vmem:[#allocation127_spill] sm:$0xff]  ;;  %v9780_v28 = vld [vmem:[#allocation113_spill] sm:$0xff] }
 0x7b5   :  { %v6316_v53 = vpop.eup %6315 }
 0x7b6   :  { %v2978_v9 = vmul.f32 %v6316_v53, %v6314_v15  ;;  %2979 = vst [vmem:[#allocation3 + $0x10] sm:$0xc] %v2977_v10  ;;  %v8574_v4 = vrot.slane %v2977_v10, 2  ;;  %v9781_v15 = vld [vmem:[#allocation128_spill] sm:$0xff]  ;;  %v9782_v10 = vld [vmem:[#allocation115_spill] sm:$0xff]  ;;  %v9783_v53 = vld [vmem:[#allocation129_spill] sm:$0xff] }
 0x7b8   :  { %v2981_v5 = vrot.slane %v2978_v9, 6  ;;  %v2994_v59 = vrot.slane %v2978_v9, 2  ;;  %v9784_v9 = vld [vmem:[#allocation117_spill] sm:$0xff] }
 0x7ba   :  { %2983 = vst [vmem:[#allocation3 + $0x8] sm:$0x30] %v2981_v5  ;;  %3061 = vmatprep.mubr.f32.mxu0 %v2994_v59  ;;  %3132 = vmatprep.mubr.f32.mxu1 %v2994_v59  ;;  %v9785_v5 = vld [vmem:[#allocation130_spill] sm:$0xff] }
 0x7bb   :  { %3062 = vmatmul.mubr.f32.vlgmr.msra.gmra.mrb[28].mxu0 %v8574_v4  ;;  %3133 = vmatmul.mubr.f32.vlgmr.msra.gmra.mrb[36].mxu1 %v8574_v4 }
 0x7bc   :  { %5710 = vmatpush1.bf16.msra.mxu0 %v9329_v36  ;;  %5774 = vmatpush1.bf16.msra.mxu1 %v9330_v23 }
 0x7bd   :  { %3203 = vmatprep.mubr.f32.mxu0 %v2994_v59  ;;  %3274 = vmatprep.mubr.f32.mxu1 %v2994_v59  ;;  %v9786_v59 = vld [vmem:[#allocation119_spill] sm:$0xff] }
 0x7be   :  { %5712 = vmatprep.subr.bf16.mxu0 %v9331_v40  ;;  %5776 = vmatprep.subr.bf16.mxu1 %v9332_v26 }
 0x7c0   :  { %5714 = vmatpush1.bf16.msra.mxu0 %v9333_v11  ;;  %5778 = vmatpush1.bf16.msra.mxu1 %v9334_v30 }
 0x7c1   :  { %5716 = vmatprep.subr.bf16.mxu0 %v9335_v25  ;;  %5780 = vmatprep.subr.bf16.mxu1 %v9336_v0 }
 0x7c4   :  { %5718 = vmatpush1.bf16.msra.mxu0 %v9415_v6  ;;  %5782 = vmatpush1.bf16.msra.mxu1 %v9416_v48 }
 0x7c5   :  { %5720 = vmatprep.subr.bf16.mxu0 %v9417_v55  ;;  %5784 = vmatprep.subr.bf16.mxu1 %v9418_v29 }
 0x7c8   :  { %5722 = vmatpush1.bf16.msra.mxu0 %v9419_v57  ;;  %5786 = vmatpush1.bf16.msra.mxu1 %v9420_v35 }
 0x7c9   :  { %5724 = vmatprep.subr.bf16.mxu0 %v9421_v47  ;;  %5788 = vmatprep.subr.bf16.mxu1 %v9422_v27 }
 0x7cc   :  { %5726 = vmatpush1.bf16.msra.mxu0 %v9423_v37  ;;  %5790 = vmatpush1.bf16.msra.mxu1 %v9424_v16 }
 0x7cd   :  { %5728 = vmatprep.subr.bf16.mxu0 %v9347_v51  ;;  %5792 = vmatprep.subr.bf16.mxu1 %v9425_v18 }
 0x7d0   :  { %5730 = vmatpush1.bf16.msra.mxu0 %v9349_v22  ;;  %5794 = vmatpush1.bf16.msra.mxu1 %v9426_v56 }
 0x7d1   :  { %5732 = vmatprep.subr.bf16.mxu0 %v9351_v3  ;;  %5796 = vmatprep.subr.bf16.mxu1 %v9427_v62 }
 0x7d4   :  { %5734 = vmatpush1.bf16.msra.mxu0 %v9353_v19  ;;  %5798 = vmatpush1.bf16.msra.mxu1 %v9428_v41 }
 0x7d5   :  { %5736 = vmatprep.subr.bf16.mxu0 %v9355_v54  ;;  %5800 = vmatprep.subr.bf16.mxu1 %v9429_v31 }
 0x7d8   :  { %5738 = vmatpush1.bf16.msra.mxu0 %v9357_v2  ;;  %5802 = vmatpush1.bf16.msra.mxu1 %v9430_v34 }
 0x7d9   :  { %5740 = vmatprep.subr.bf16.mxu0 %v9503_v7  ;;  %5804 = vmatprep.subr.bf16.mxu1 %v9431_v8 }
 0x7dc   :  { %5742 = vmatpush1.bf16.msra.mxu0 %v9504_v44  ;;  %5806 = vmatpush1.bf16.msra.mxu1 %v9432_v52 }
 0x7dd   :  { %5744 = vmatprep.subr.bf16.mxu0 %v9360_v17  ;;  %5808 = vmatprep.subr.bf16.mxu1 %v9433_v49 }
 0x7e0   :  { %5746 = vmatpush1.bf16.msra.mxu0 %v9505_v20  ;;  %5810 = vmatpush1.bf16.msra.mxu1 %v9434_v50 }
 0x7e1   :  { %5748 = vmatprep.subr.bf16.mxu0 %v9506_v61  ;;  %5812 = vmatprep.subr.bf16.mxu1 %v9435_v21 }
 0x7e4   :  { %5750 = vmatpush1.bf16.msra.mxu0 %v9766_v14  ;;  %5814 = vmatpush1.bf16.msra.mxu1 %v9767_v32 }
 0x7e5   :  { %5752 = vmatprep.subr.bf16.mxu0 %v9768_v1  ;;  %5816 = vmatprep.subr.bf16.mxu1 %v9769_v13 }
 0x7e8   :  { %5754 = vmatpush1.bf16.msra.mxu0 %v9770_v58  ;;  %5818 = vmatpush1.bf16.msra.mxu1 %v9771_v46  ;;  %v3354_v58 = vrot.slane %v8570_v12, 6 }
 0x7e9   :  { %5756 = vmatprep.subr.bf16.mxu0 %v9772_v33  ;;  %5820 = vmatprep.subr.bf16.mxu1 %v9773_v43  ;;  %v2987_v43 = vld [vmem:[#allocation2 + $0x58] sm:$0x30] }
 0x7ec   :  { %5758 = vmatpush1.bf16.msra.mxu0 %v9774_v39  ;;  %5822 = vmatpush1.bf16.msra.mxu1 %v9775_v45 }
 0x7ed   :  { %5760 = vmatprep.subr.bf16.mxu0 %v9776_v38  ;;  %5824 = vmatprep.subr.bf16.mxu1 %v9777_v63  ;;  %v9787_v38 = vld [vmem:[#allocation131_spill] sm:$0xff]  ;;  %v9788_v63 = vld [vmem:[#allocation4_spill] sm:$0xff] }
 0x7f0   :  { %5762 = vmatpush1.bf16.msra.mxu0 %v9778_v42  ;;  %5826 = vmatpush1.bf16.msra.mxu1 %v9779_v24  ;;  %v9789_v42 = vld [vmem:[#allocation16_spill] sm:$0xff] }
 0x7f1   :  { %5764 = vmatprep.subr.bf16.mxu0 %v9780_v28  ;;  %5828 = vmatprep.subr.bf16.mxu1 %v9781_v15  ;;  %v9790_v15 = vld [vmem:[#allocation5_spill] sm:$0xff]  ;;  %v9799_v28 = vld [vmem:[#allocation26_spill] sm:$0xff] }
 0x7f4   :  { %5766 = vmatpush1.bf16.msra.mxu0 %v9782_v10  ;;  %5830 = vmatpush1.bf16.msra.mxu1 %v9783_v53  ;;  %v9791_v10 = vld [vmem:[#allocation18_spill] sm:$0xff] }
 0x7f5   :  { %5768 = vmatprep.subr.bf16.mxu0 %v9784_v9  ;;  %5832 = vmatprep.subr.bf16.mxu1 %v9785_v5  ;;  %v9792_v53 = vld [vmem:[#allocation6_spill] sm:$0xff]  ;;  %v9793_v9 = vld [vmem:[#allocation20_spill] sm:$0xff]  ;;  %v9794_v5 = vld [vmem:[#allocation7_spill] sm:$0xff] }
 0x7f8   :  { %5770 = vmatpush1.bf16.msra.mxu0 %v9786_v59  ;;  %5834 = vmatpush1.bf16.msra.mxu1 %v9787_v38  ;;  %v9795_v59 = vld [vmem:[#allocation22_spill] sm:$0xff]  ;;  %v9796_v38 = vld [vmem:[#allocation8_spill] sm:$0xff] }
 0x7f9   :  { %5836 = vmatprep.subr.bf16.mxu0 %v9788_v63  ;;  %5900 = vmatprep.subr.bf16.mxu1 %v9789_v42  ;;  %v9797_v63 = vld [vmem:[#allocation24_spill] sm:$0xff]  ;;  %v9798_v42 = vld [vmem:[#allocation9_spill] sm:$0xff] }
 0x7fb   :  { %3204 = vmatmul.mubr.f32.vlgmr.msra.gmra.mrb[30].mxu0 %v8574_v4  ;;  %3275 = vmatmul.mubr.f32.vlgmr.msra.gmra.mrb[38].mxu1 %v8574_v4  ;;  %v9800_v4 = vld [vmem:[#allocation10_spill] sm:$0xff] }
 0x7fc   :  { %5838 = vmatpush1.bf16.msra.mxu0 %v9790_v15  ;;  %5902 = vmatpush1.bf16.msra.mxu1 %v9791_v10  ;;  %v9801_v15 = vld [vmem:[#allocation28_spill] sm:$0xff]  ;;  %v9802_v10 = vld [vmem:[#allocation11_spill] sm:$0xff] }
 0x7fd   :  { %5840 = vmatprep.subr.bf16.mxu0 %v9792_v53  ;;  %5904 = vmatprep.subr.bf16.mxu1 %v9793_v9  ;;  %v9803_v53 = vld [vmem:[#allocation30_spill] sm:$0xff]  ;;  %v9804_v9 = vld [vmem:[#allocation12_spill] sm:$0xff] }
 0x800   :  { %5842 = vmatpush1.bf16.msra.mxu0 %v9794_v5  ;;  %5906 = vmatpush1.bf16.msra.mxu1 %v9795_v59  ;;  %v9805_v5 = vld [vmem:[#allocation32_spill] sm:$0xff]  ;;  %v9806_v59 = vld [vmem:[#allocation13_spill] sm:$0xff] }
 0x801   :  { %5844 = vmatprep.subr.bf16.mxu0 %v9796_v38  ;;  %5908 = vmatprep.subr.bf16.mxu1 %v9797_v63  ;;  %v9807_v38 = vld [vmem:[#allocation34_spill] sm:$0xff] }
 0x802   :  { %v9808_v63 = vld [vmem:[#allocation14_spill] sm:$0xff] }
 0x804   :  { %5846 = vmatpush1.bf16.msra.mxu0 %v9798_v42  ;;  %5910 = vmatpush1.bf16.msra.mxu1 %v9799_v28  ;;  %v9809_v42 = vld [vmem:[#allocation36_spill] sm:$0xff]  ;;  %v9810_v28 = vld [vmem:[#allocation15_spill] sm:$0xff] }
 0x805   :  { %5848 = vmatprep.subr.bf16.mxu0 %v9800_v4  ;;  %5912 = vmatprep.subr.bf16.mxu1 %v9801_v15  ;;  %v9811_v4 = vld [vmem:[#allocation38_spill] sm:$0xff]  ;;  %v9812_v15 = vld [vmem:[#allocation17_spill] sm:$0xff] }
 0x808   :  { %5850 = vmatpush1.bf16.msra.mxu0 %v9802_v10  ;;  %5914 = vmatpush1.bf16.msra.mxu1 %v9803_v53  ;;  %v9813_v10 = vld [vmem:[#allocation40_spill] sm:$0xff]  ;;  %v9814_v53 = vld [vmem:[#allocation19_spill] sm:$0xff] }
 0x809   :  { %5852 = vmatprep.subr.bf16.mxu0 %v9804_v9  ;;  %5916 = vmatprep.subr.bf16.mxu1 %v9805_v5  ;;  %v9815_v9 = vld [vmem:[#allocation42_spill] sm:$0xff]  ;;  %v9816_v5 = vld [vmem:[#allocation21_spill] sm:$0xff] }
 0x80c   :  { %5854 = vmatpush1.bf16.msra.mxu0 %v9806_v59  ;;  %5918 = vmatpush1.bf16.msra.mxu1 %v9807_v38  ;;  %v9817_v59 = vld [vmem:[#allocation44_spill] sm:$0xff]  ;;  %v9818_v38 = vld [vmem:[#allocation23_spill] sm:$0xff] }
 0x80d   :  { %5856 = vmatprep.subr.bf16.mxu0 %v9808_v63  ;;  %5920 = vmatprep.subr.bf16.mxu1 %v9809_v42  ;;  %v9819_v63 = vld [vmem:[#allocation46_spill] sm:$0xff]  ;;  %v9820_v42 = vld [vmem:[#allocation25_spill] sm:$0xff] }
 0x810   :  { %5858 = vmatpush1.bf16.msra.mxu0 %v9810_v28  ;;  %5922 = vmatpush1.bf16.msra.mxu1 %v9811_v4  ;;  %v9821_v28 = vld [vmem:[#allocation48_spill] sm:$0xff]  ;;  %v9822_v4 = vld [vmem:[#allocation27_spill] sm:$0xff] }
 0x811   :  { %5860 = vmatprep.subr.bf16.mxu0 %v9812_v15  ;;  %5924 = vmatprep.subr.bf16.mxu1 %v9813_v10  ;;  %v9823_v15 = vld [vmem:[#allocation50_spill] sm:$0xff]  ;;  %v9824_v10 = vld [vmem:[#allocation29_spill] sm:$0xff] }
 0x814   :  { %5862 = vmatpush1.bf16.msra.mxu0 %v9814_v53  ;;  %5926 = vmatpush1.bf16.msra.mxu1 %v9815_v9  ;;  %v9825_v53 = vld [vmem:[#allocation52_spill] sm:$0xff]  ;;  %v9826_v9 = vld [vmem:[#allocation31_spill] sm:$0xff] }
 0x815   :  { %5864 = vmatprep.subr.bf16.mxu0 %v9816_v5  ;;  %5928 = vmatprep.subr.bf16.mxu1 %v9817_v59  ;;  %v9827_v5 = vld [vmem:[#allocation54_spill] sm:$0xff]  ;;  %v9828_v59 = vld [vmem:[#allocation33_spill] sm:$0xff] }
 0x818   :  { %5866 = vmatpush1.bf16.msra.mxu0 %v9818_v38  ;;  %5930 = vmatpush1.bf16.msra.mxu1 %v9819_v63  ;;  %v9829_v38 = vld [vmem:[#allocation56_spill] sm:$0xff]  ;;  %v9830_v63 = vld [vmem:[#allocation35_spill] sm:$0xff] }
 0x819   :  { %5868 = vmatprep.subr.bf16.mxu0 %v9820_v42  ;;  %5932 = vmatprep.subr.bf16.mxu1 %v9821_v28  ;;  %v9831_v42 = vld [vmem:[#allocation58_spill] sm:$0xff]  ;;  %v9832_v28 = vld [vmem:[#allocation37_spill] sm:$0xff] }
 0x81c   :  { %5870 = vmatpush1.bf16.msra.mxu0 %v9822_v4  ;;  %5934 = vmatpush1.bf16.msra.mxu1 %v9823_v15  ;;  %v9833_v4 = vld [vmem:[#allocation60_spill] sm:$0xff]  ;;  %v9834_v15 = vld [vmem:[#allocation39_spill] sm:$0xff] }
 0x81d   :  { %5872 = vmatprep.subr.bf16.mxu0 %v9824_v10  ;;  %5936 = vmatprep.subr.bf16.mxu1 %v9825_v53  ;;  %v9835_v10 = vld [vmem:[#allocation62_spill] sm:$0xff]  ;;  %v9836_v53 = vld [vmem:[#allocation41_spill] sm:$0xff] }
 0x820   :  { %5874 = vmatpush1.bf16.msra.mxu0 %v9826_v9  ;;  %5938 = vmatpush1.bf16.msra.mxu1 %v9827_v5  ;;  %v9837_v9 = vld [vmem:[#allocation64_spill] sm:$0xff]  ;;  %v9838_v5 = vld [vmem:[#allocation43_spill] sm:$0xff] }
 0x821   :  { %5876 = vmatprep.subr.bf16.mxu0 %v9828_v59  ;;  %5940 = vmatprep.subr.bf16.mxu1 %v9829_v38  ;;  %v9839_v59 = vld [vmem:[#allocation66_spill] sm:$0xff]  ;;  %v9840_v38 = vld [vmem:[#allocation45_spill] sm:$0xff] }
 0x824   :  { %5878 = vmatpush1.bf16.msra.mxu0 %v9830_v63  ;;  %5942 = vmatpush1.bf16.msra.mxu1 %v9831_v42  ;;  %v9841_v63 = vld [vmem:[#allocation68_spill] sm:$0xff]  ;;  %v9842_v42 = vld [vmem:[#allocation47_spill] sm:$0xff] }
 0x825   :  { %5880 = vmatprep.subr.bf16.mxu0 %v9832_v28  ;;  %5944 = vmatprep.subr.bf16.mxu1 %v9833_v4  ;;  %v9843_v28 = vld [vmem:[#allocation70_spill] sm:$0xff]  ;;  %v9844_v4 = vld [vmem:[#allocation49_spill] sm:$0xff] }
 0x828   :  { %5882 = vmatpush1.bf16.msra.mxu0 %v9834_v15  ;;  %5946 = vmatpush1.bf16.msra.mxu1 %v9835_v10  ;;  %v9845_v15 = vld [vmem:[#allocation72_spill] sm:$0xff]  ;;  %v9846_v10 = vld [vmem:[#allocation51_spill] sm:$0xff] }
 0x829   :  { %5884 = vmatprep.subr.bf16.mxu0 %v9836_v53  ;;  %5948 = vmatprep.subr.bf16.mxu1 %v9837_v9  ;;  %v9847_v53 = vld [vmem:[#allocation74_spill] sm:$0xff]  ;;  %v9848_v9 = vld [vmem:[#allocation53_spill] sm:$0xff] }
 0x82c   :  { %5886 = vmatpush1.bf16.msra.mxu0 %v9838_v5  ;;  %5950 = vmatpush1.bf16.msra.mxu1 %v9839_v59  ;;  %v9849_v5 = vld [vmem:[#allocation76_spill] sm:$0xff]  ;;  %v9850_v59 = vld [vmem:[#allocation55_spill] sm:$0xff] }
 0x82d   :  { %5888 = vmatprep.subr.bf16.mxu0 %v9840_v38  ;;  %5952 = vmatprep.subr.bf16.mxu1 %v9841_v63  ;;  %v9851_v38 = vld [vmem:[#allocation78_spill] sm:$0xff]  ;;  %v9852_v63 = vld [vmem:[#allocation57_spill] sm:$0xff] }
 0x830   :  { %5890 = vmatpush1.bf16.msra.mxu0 %v9842_v42  ;;  %5954 = vmatpush1.bf16.msra.mxu1 %v9843_v28  ;;  %v9853_v42 = vld [vmem:[#allocation80_spill] sm:$0xff] }
 0x831   :  { %5892 = vmatprep.subr.bf16.mxu0 %v9844_v4  ;;  %5956 = vmatprep.subr.bf16.mxu1 %v9845_v15 }
 0x834   :  { %5894 = vmatpush1.bf16.msra.mxu0 %v9846_v10  ;;  %5958 = vmatpush1.bf16.msra.mxu1 %v9847_v53  ;;  %v2986_v10 = vld [vmem:[#allocation2 + $0x50] sm:$0x30] }
 0x835   :  { %5896 = vmatprep.subr.bf16.mxu0 %v9848_v9  ;;  %5960 = vmatprep.subr.bf16.mxu1 %v9849_v5 }
 0x838   :  { %5898 = vmatpush1.bf16.msra.mxu0 %v9850_v59  ;;  %5962 = vmatpush1.bf16.msra.mxu1 %v9851_v38 }
 0x839   :  { %5964 = vmatprep.subr.bf16.mxu0 %v9852_v63  ;;  %6028 = vmatprep.subr.bf16.mxu1 %v9853_v42  ;;  %v3353_v42 = vrot.slane %v8568_v60, 6 }
 0x88e   :  { %v3063_v28 = vpop.f32.mrb[28].mxu0  ;;  %v3134_v4 = vpop.f32.mrb[36].mxu1 }
 0x88f   :  { %v3291_v24 = vrot.slane %v3134_v4, 4  ;;  %v3065_v15 = vpop.f32.mrb[29].mxu0  ;;  %v3136_v45 = vpop.f32.mrb[37].mxu1 }
 0x890   :  { %v3292_v39 = vrot.slane %v3136_v45, 4 }
 0x891   :  { %v3307_v53 = vadd.f32 %v3291_v24, %v2986_v10  ;;  %v3289_v10 = vrot.slane %v3063_v28, 4  ;;  %v2988_v28 = vld [vmem:[#allocation2 + $0x60] sm:$0x30] }
 0x892   :  { %v3308_v9 = vadd.f32 %v3292_v39, %v2987_v43  ;;  %v3290_v43 = vrot.slane %v3065_v15, 4  ;;  %v2984_v39 = vld [vmem:[#allocation2 + $0x40] sm:$0x30]  ;;  %v2990_v15 = vld [vmem:[#allocation2 + $0x70] sm:$0x30] }
 0x893   :  { %v3938_v33 = vmul.f32 -1.442695, %v3307_v53  ;;  %v3305_v53 = vadd.f32 %v3289_v10, %v2984_v39 }
 0x894   :  { %v3939_v5 = vmul.f32 -1.442695, %v3308_v9 }
 0x895   :  { %6317 = vpow2.f32 %v3938_v33  ;;  %v2985_v33 = vld [vmem:[#allocation2 + $0x48] sm:$0x30] }
 0x896   :  { %6319 = vpow2.f32 %v3939_v5  ;;  %v3306_v9 = vadd.f32 %v3290_v43, %v2985_v33  ;;  %v3936_v5 = vmul.f32 -1.442695, %v3305_v53  ;;  %v2989_v53 = vld [vmem:[#allocation2 + $0x68] sm:$0x30]  ;;  %v2991_v33 = vld [vmem:[#allocation2 + $0x78] sm:$0x30] }
 0x89f   :  { %v6318_v59 = vpop.eup %6317 }
 0x8a0   :  { %v3331_v38 = vadd.f32 1.0, %v6318_v59  ;;  %v6320_v46 = vpop.eup %6319  ;;  %v3937_v59 = vmul.f32 -1.442695, %v3306_v9 }
 0x8a1   :  { %v3332_v63 = vadd.f32 1.0, %v6320_v46 }
 0x8a2   :  { %6321 = vrcp.f32 %v3331_v38 }
 0x8a3   :  { %6323 = vrcp.f32 %v3332_v63 }
 0x8a4   :  { %6325 = vpow2.f32 %v3936_v5 }
 0x8a5   :  { %6327 = vpow2.f32 %v3937_v59 }
 0x8ac   :  { %v6322_v4 = vpop.eup %6321 }
 0x8ad   :  { %v3357_v13 = vmul.f32 %v6322_v4, %v3353_v42  ;;  %v6324_v45 = vpop.eup %6323 }
 0x8ae   :  { %v3358_v24 = vmul.f32 %v6324_v45, %v3354_v58  ;;  %v6326_v46 = vpop.eup %6325 }
 0x8af   :  { %v6328_v38 = vpop.eup %6327  ;;  %v3319_v63 = vadd.f32 1.0, %v6326_v46 }
 0x8b0   :  { %v3320_v60 = vadd.f32 1.0, %v6328_v38 }
 0x8b1   :  { %6329 = vrcp.f32 %v3319_v63 }
 0x8b2   :  { %6331 = vrcp.f32 %v3320_v60 }
 0x8ce   :  { %v3205_v1 = vpop.f32.mrb[30].mxu0  ;;  %v3276_v32 = vpop.f32.mrb[38].mxu1 }
 0x8cf   :  { %v3293_v12 = vrot.slane %v3205_v1, 4  ;;  %v3295_v42 = vrot.slane %v3276_v32, 4  ;;  %v3207_v4 = vpop.f32.mrb[31].mxu0  ;;  %v3278_v58 = vpop.f32.mrb[39].mxu1 }
 0x8d0   :  { %v3294_v45 = vrot.slane %v3207_v4, 4  ;;  %v3296_v10 = vrot.slane %v3278_v58, 4  ;;  %v6330_v32 = vpop.eup %6329 }
 0x8d1   :  { %v3309_v43 = vadd.f32 %v3293_v12, %v2988_v28  ;;  %v3311_v39 = vadd.f32 %v3295_v42, %v2990_v15  ;;  %v6332_v1 = vpop.eup %6331 }
 0x8d2   :  { %v3310_v9 = vadd.f32 %v3294_v45, %v2989_v53  ;;  %v3312_v5 = vadd.f32 %v3296_v10, %v2991_v33 }
 0x8d3   :  { %6333 = vtanh.f32 %v3309_v43  ;;  %v3940_v59 = vmul.f32 -1.442695, %v3311_v39 }
 0x8d4   :  { %6335 = vtanh.f32 %v3310_v9  ;;  %v3941_v46 = vmul.f32 -1.442695, %v3312_v5  ;;  %v3787_v5 = vld [vmem:[%s8895_s4 + $0xb8] sm:$0xff] }
 0x8d5   :  { %6337 = vpow2.f32 %v3940_v59 }
 0x8d6   :  { %6339 = vpow2.f32 %v3941_v46  ;;  %v3770_v46 = vld [vmem:[%s8895_s4 + $0x30] sm:$0xff] }
 0x8dd   :  { %v6334_v38 = vpop.eup %6333 }
 0x8de   :  { %v6336_v14 = vpop.eup %6335  ;;  %v3359_v4 = vmul.f32 %v6334_v38, %v6330_v32  ;;  %v3771_v32 = vld [vmem:[%s8895_s4 + $0x38] sm:$0xff]  ;;  %v3788_v38 = vld [vmem:[%s8895_s4 + $0xc0] sm:$0xff] }
 0x8df   :  { %v6338_v58 = vpop.eup %6337  ;;  %v3360_v63 = vmul.f32 %v6336_v14, %v6332_v1  ;;  %v6105_v1 = vpack.c.bf16 %v3771_v32, %v3770_v46 }
 0x8e0   :  { %v6340_v12 = vpop.eup %6339  ;;  %v8710_v42 = vadd.f32 %v3359_v4, %v3357_v13  ;;  %v3345_v28 = vadd.f32 1.0, %v6338_v58  ;;  %v3789_v4 = vld [vmem:[%s8895_s4 + $0xc8] sm:$0xff] }
 0x8e1   :  { %v8712_v60 = vadd.f32 %v3360_v63, %v3358_v24  ;;  %v3346_v15 = vadd.f32 1.0, %v6340_v12  ;;  %v3786_v24 = vld [vmem:[%s8895_s4 + $0xb0] sm:$0xff]  ;;  %v6107_v58 = vpack.c.bf16 %v3789_v4, %v3788_v38  ;;  %v3772_v63 = vld [vmem:[%s8895_s4 + $0x40] sm:$0xff]  ;;  %v3773_v12 = vld [vmem:[%s8895_s4 + $0x48] sm:$0xff] }
 0x8e2   :  { %6341 = vtanh.f32 %v8710_v42  ;;  %v6103_v59 = vpack.c.bf16 %v3787_v5, %v3786_v24  ;;  %v3376_v38 = vld [vmem:[#allocation2 + $0x60] sm:$0xc0]  ;;  %v3378_v4 = vld [vmem:[#allocation2 + $0x70] sm:$0xc0] }
 0x8e3   :  { %6343 = vrcp.f32 %v3345_v28  ;;  %v6109_v28 = vpack.c.bf16 %v3773_v12, %v3772_v63 }
 0x8e4   :  { %6345 = vtanh.f32 %v8712_v60 }
 0x8e5   :  { %6347 = vrcp.f32 %v3346_v15  ;;  %v3790_v15 = vld [vmem:[%s8895_s4 + $0xd0] sm:$0xff] }
 0x8ec   :  { %v6342_v45 = vpop.eup %6341 }
 0x8ed   :  { %v6344_v10 = vpop.eup %6343 }
 0x8ee   :  { %v6346_v43 = vpop.eup %6345  ;;  %v3365_v39 = vmul.f32 %v6344_v10, %v6342_v45  ;;  %v3791_v45 = vld [vmem:[%s8895_s4 + $0xd8] sm:$0xff] }
 0x8ef   :  { %v6348_v53 = vpop.eup %6347  ;;  %v6111_v10 = vpack.c.bf16 %v3791_v45, %v3790_v15  ;;  %v3377_v15 = vld [vmem:[#allocation2 + $0x68] sm:$0xc0]  ;;  %v3379_v45 = vld [vmem:[#allocation2 + $0x78] sm:$0xc0] }
 0x8f0   :  { %v3366_v33 = vmul.f32 %v6348_v53, %v6346_v43  ;;  %3367 = vst [vmem:[#allocation3 + $0x10] sm:$0x30] %v3365_v39  ;;  %v8716_v9 = vrot.slane %v3365_v39, 4  ;;  %v3774_v43 = vld [vmem:[%s8895_s4 + $0x50] sm:$0xff]  ;;  %v3775_v39 = vld [vmem:[%s8895_s4 + $0x58] sm:$0xff] }
 0x8f1   :  { %v6113_v53 = vpack.c.bf16 %v3775_v39, %v3774_v43 }
 0x8f2   :  { %v3369_v14 = vrot.slane %v3366_v33, 2  ;;  %v3382_v13 = vrot.slane %v3366_v33, 4  ;;  %v3792_v33 = vld [vmem:[%s8895_s4 + $0xe0] sm:$0xff] }
 0x8f4   :  { %3371 = vst [vmem:[#allocation3 + $0x8] sm:$0xc] %v3369_v14  ;;  %3449 = vmatprep.mubr.f32.mxu0 %v3382_v13  ;;  %3520 = vmatprep.mubr.f32.mxu1 %v3382_v13  ;;  %v3793_v14 = vld [vmem:[%s8895_s4 + $0xe8] sm:$0xff] }
 0x8f5   :  { %3450 = vmatmul.mubr.f32.vlgmr.msra.gmra.mrb[32].mxu0 %v8716_v9  ;;  %3521 = vmatmul.mubr.f32.vlgmr.msra.gmra.mrb[40].mxu1 %v8716_v9 }
 0x8f6   :  { %5966 = vmatpush1.bf16.msra.mxu0 %v9329_v36  ;;  %6030 = vmatpush1.bf16.msra.mxu1 %v9330_v23  ;;  %v9854_v36 = vld [vmem:[#allocation99_spill] sm:$0xff]  ;;  %v9855_v23 = vld [vmem:[#allocation121_spill] sm:$0xff] }
 0x8f7   :  { %3591 = vmatprep.mubr.f32.mxu0 %v3382_v13  ;;  %3662 = vmatprep.mubr.f32.mxu1 %v3382_v13  ;;  %v6115_v13 = vpack.c.bf16 %v3793_v14, %v3792_v33 }
 0x8f8   :  { %5968 = vmatprep.subr.bf16.mxu0 %v9331_v40  ;;  %6032 = vmatprep.subr.bf16.mxu1 %v9332_v26  ;;  %v9856_v40 = vld [vmem:[#allocation101_spill] sm:$0xff]  ;;  %v9857_v26 = vld [vmem:[#allocation122_spill] sm:$0xff] }
 0x8fa   :  { %5970 = vmatpush1.bf16.msra.mxu0 %v9333_v11  ;;  %6034 = vmatpush1.bf16.msra.mxu1 %v9334_v30  ;;  %v9858_v11 = vld [vmem:[#allocation103_spill] sm:$0xff] }
 0x8fb   :  { %5972 = vmatprep.subr.bf16.mxu0 %v9335_v25  ;;  %6036 = vmatprep.subr.bf16.mxu1 %v9336_v0  ;;  %v9859_v30 = vld [vmem:[#allocation123_spill] sm:$0xff]  ;;  %v9860_v25 = vld [vmem:[#allocation105_spill] sm:$0xff]  ;;  %v9861_v0 = vld [vmem:[#allocation124_spill] sm:$0xff] }
 0x8fe   :  { %5974 = vmatpush1.bf16.msra.mxu0 %v9415_v6  ;;  %6038 = vmatpush1.bf16.msra.mxu1 %v9416_v48  ;;  %v9869_v6 = vld [vmem:[#allocation128_spill] sm:$0xff]  ;;  %v9870_v48 = vld [vmem:[#allocation115_spill] sm:$0xff] }
 0x8ff   :  { %5976 = vmatprep.subr.bf16.mxu0 %v9417_v55  ;;  %6040 = vmatprep.subr.bf16.mxu1 %v9418_v29  ;;  %v9871_v55 = vld [vmem:[#allocation129_spill] sm:$0xff] }
 0x900   :  { %v9872_v29 = vld [vmem:[#allocation117_spill] sm:$0xff] }
 0x902   :  { %5978 = vmatpush1.bf16.msra.mxu0 %v9419_v57  ;;  %6042 = vmatpush1.bf16.msra.mxu1 %v9420_v35  ;;  %v9873_v57 = vld [vmem:[#allocation130_spill] sm:$0xff]  ;;  %v9874_v35 = vld [vmem:[#allocation119_spill] sm:$0xff] }
 0x903   :  { %5980 = vmatprep.subr.bf16.mxu0 %v9421_v47  ;;  %6044 = vmatprep.subr.bf16.mxu1 %v9422_v27  ;;  %v9875_v47 = vld [vmem:[#allocation131_spill] sm:$0xff]  ;;  %v3780_v27 = vld [vmem:[%s8895_s4 + $0x80] sm:$0xff] }
 0x906   :  { %5982 = vmatpush1.bf16.msra.mxu0 %v9423_v37  ;;  %6046 = vmatpush1.bf16.msra.mxu1 %v9424_v16  ;;  %v3781_v37 = vld [vmem:[%s8895_s4 + $0x88] sm:$0xff] }
 0x907   :  { %5984 = vmatprep.subr.bf16.mxu0 %v9347_v51  ;;  %6048 = vmatprep.subr.bf16.mxu1 %v9425_v18  ;;  %v9868_v51 = vld [vmem:[#allocation113_spill] sm:$0xff]  ;;  %v6091_v16 = vpack.c.bf16 %v3781_v37, %v3780_v27  ;;  %v3764_v18 = vld [vmem:[%s8895_s4] sm:$0xff] }
 0x90a   :  { %5986 = vmatpush1.bf16.msra.mxu0 %v9349_v22  ;;  %6050 = vmatpush1.bf16.msra.mxu1 %v9426_v56  ;;  %v9862_v22 = vld [vmem:[#allocation107_spill] sm:$0xff]  ;;  %v3765_v56 = vld [vmem:[%s8895_s4 + $0x8] sm:$0xff] }
 0x90b   :  { %5988 = vmatprep.subr.bf16.mxu0 %v9351_v3  ;;  %6052 = vmatprep.subr.bf16.mxu1 %v9427_v62  ;;  %v9863_v3 = vld [vmem:[#allocation125_spill] sm:$0xff]  ;;  %v6093_v62 = vpack.c.bf16 %v3765_v56, %v3764_v18  ;;  %v3742_v56 = vrot.slane %v8712_v60, 6 }
 0x90e   :  { %5990 = vmatpush1.bf16.msra.mxu0 %v9353_v19  ;;  %6054 = vmatpush1.bf16.msra.mxu1 %v9428_v41  ;;  %v9865_v19 = vld [vmem:[#allocation126_spill] sm:$0xff] }
 0x90f   :  { %5992 = vmatprep.subr.bf16.mxu0 %v9355_v54  ;;  %6056 = vmatprep.subr.bf16.mxu1 %v9429_v31  ;;  %v9866_v54 = vld [vmem:[#allocation111_spill] sm:$0xff]  ;;  %v3782_v41 = vld [vmem:[%s8895_s4 + $0x90] sm:$0xff] }
 0x910   :  { %v3783_v31 = vld [vmem:[%s8895_s4 + $0x98] sm:$0xff] }
 0x912   :  { %5994 = vmatpush1.bf16.msra.mxu0 %v9357_v2  ;;  %6058 = vmatpush1.bf16.msra.mxu1 %v9430_v34  ;;  %v9867_v2 = vld [vmem:[#allocation127_spill] sm:$0xff]  ;;  %v6095_v34 = vpack.c.bf16 %v3783_v31, %v3782_v41 }
 0x913   :  { %5996 = vmatprep.subr.bf16.mxu0 %v9503_v7  ;;  %6060 = vmatprep.subr.bf16.mxu1 %v9431_v8  ;;  %v3766_v8 = vld [vmem:[%s8895_s4 + $0x10] sm:$0xff] }
 0x916   :  { %5998 = vmatpush1.bf16.msra.mxu0 %v9504_v44  ;;  %6062 = vmatpush1.bf16.msra.mxu1 %v9432_v52  ;;  %v3767_v52 = vld [vmem:[%s8895_s4 + $0x18] sm:$0xff]  ;;  %v3768_v44 = vld [vmem:[%s8895_s4 + $0x20] sm:$0xff] }
 0x917   :  { %6000 = vmatprep.subr.bf16.mxu0 %v9360_v17  ;;  %6064 = vmatprep.subr.bf16.mxu1 %v9433_v49  ;;  %v9864_v17 = vld [vmem:[#allocation109_spill] sm:$0xff]  ;;  %v6097_v49 = vpack.c.bf16 %v3767_v52, %v3766_v8  ;;  %v3372_v52 = vld [vmem:[#allocation2 + $0x40] sm:$0xc0] }
 0x91a   :  { %6002 = vmatpush1.bf16.msra.mxu0 %v9505_v20  ;;  %6066 = vmatpush1.bf16.msra.mxu1 %v9434_v50  ;;  %v3784_v50 = vld [vmem:[%s8895_s4 + $0xa0] sm:$0xff]  ;;  %v3769_v20 = vld [vmem:[%s8895_s4 + $0x28] sm:$0xff] }
 0x91b   :  { %6004 = vmatprep.subr.bf16.mxu0 %v9506_v61  ;;  %6068 = vmatprep.subr.bf16.mxu1 %v9435_v21  ;;  %v3785_v21 = vld [vmem:[%s8895_s4 + $0xa8] sm:$0xff]  ;;  %v6101_v61 = vpack.c.bf16 %v3769_v20, %v3768_v44 }
 0x91c   :  { %v6099_v7 = vpack.c.bf16 %v3785_v21, %v3784_v50  ;;  %v3373_v50 = vld [vmem:[#allocation2 + $0x48] sm:$0xc0] }
 0x91e   :  { %6006 = vmatpush1.bf16.msra.mxu0 %v9854_v36  ;;  %6070 = vmatpush1.bf16.msra.mxu1 %v9855_v23  ;;  %v3777_v36 = vld [vmem:[%s8895_s4 + $0x68] sm:$0xff] }
 0x91f   :  { %6008 = vmatprep.subr.bf16.mxu0 %v9856_v40  ;;  %6072 = vmatprep.subr.bf16.mxu1 %v9857_v26  ;;  %v3794_v40 = vld [vmem:[%s8895_s4 + $0xf0] sm:$0xff]  ;;  %v3795_v26 = vld [vmem:[%s8895_s4 + $0xf8] sm:$0xff] }
 0x922   :  { %6010 = vmatpush1.bf16.msra.mxu0 %v9858_v11  ;;  %6074 = vmatpush1.bf16.msra.mxu1 %v9859_v30  ;;  %v3778_v11 = vld [vmem:[%s8895_s4 + $0x70] sm:$0xff]  ;;  %v6119_v30 = vpack.c.bf16 %v3795_v26, %v3794_v40 }
 0x923   :  { %6012 = vmatprep.subr.bf16.mxu0 %v9860_v25  ;;  %6076 = vmatprep.subr.bf16.mxu1 %v9861_v0  ;;  %v3779_v25 = vld [vmem:[%s8895_s4 + $0x78] sm:$0xff] }
 0x924   :  { %v6121_v0 = vpack.c.bf16 %v3779_v25, %v3778_v11 }
 0x926   :  { %6014 = vmatpush1.bf16.msra.mxu0 %v9862_v22  ;;  %6078 = vmatpush1.bf16.msra.mxu1 %v9863_v3 }
 0x927   :  { %6016 = vmatprep.subr.bf16.mxu0 %v9864_v17  ;;  %6080 = vmatprep.subr.bf16.mxu1 %v9865_v19 }
 0x92a   :  { %6018 = vmatpush1.bf16.msra.mxu0 %v9866_v54  ;;  %6082 = vmatpush1.bf16.msra.mxu1 %v9867_v2  ;;  %v3374_v2 = vld [vmem:[#allocation2 + $0x50] sm:$0xc0] }
 0x92b   :  { %6020 = vmatprep.subr.bf16.mxu0 %v9868_v51  ;;  %6084 = vmatprep.subr.bf16.mxu1 %v9869_v6 }
 0x92e   :  { %6022 = vmatpush1.bf16.msra.mxu0 %v9870_v48  ;;  %6086 = vmatpush1.bf16.msra.mxu1 %v9871_v55  ;;  %v3375_v48 = vld [vmem:[#allocation2 + $0x58] sm:$0xc0] }
 0x92f   :  { %6024 = vmatprep.subr.bf16.mxu0 %v9872_v29  ;;  %6088 = vmatprep.subr.bf16.mxu1 %v9873_v57 }
 0x932   :  { %6026 = vmatpush1.bf16.msra.mxu0 %v9874_v35  ;;  %6090 = vmatpush1.bf16.msra.mxu1 %v9875_v47 }
 0x933   :  { %6092 = vmatprep.subr.bf16.mxu0 %v6091_v16  ;;  %v3741_v16 = vrot.slane %v8710_v42, 6 }
 0x935   :  { %3592 = vmatmul.mubr.f32.vlgmr.msra.gmra.mrb[34].mxu0 %v8716_v9  ;;  %3663 = vmatmul.mubr.f32.vlgmr.msra.gmra.mrb[42].mxu1 %v8716_v9  ;;  %v3776_v9 = vld [vmem:[%s8895_s4 + $0x60] sm:$0xff] }
 0x936   :  { %6094 = vmatpush3.bf16.msra.mxu0 %v6093_v62  ;;  %v6117_v23 = vpack.c.bf16 %v3777_v36, %v3776_v9 }
 0x937   :  { %6096 = vmatprep.subr.bf16.mxu0 %v6095_v34 }
 0x93a   :  { %6098 = vmatpush3.bf16.msra.mxu0 %v6097_v49 }
 0x93b   :  { %6100 = vmatprep.subr.bf16.mxu0 %v6099_v7 }
 0x93e   :  { %6102 = vmatpush3.bf16.msra.mxu0 %v6101_v61 }
 0x93f   :  { %6104 = vmatprep.subr.bf16.mxu0 %v6103_v59 }
 0x942   :  { %6106 = vmatpush3.bf16.msra.mxu0 %v6105_v1 }
 0x943   :  { %6108 = vmatprep.subr.bf16.mxu0 %v6107_v58 }
 0x946   :  { %6110 = vmatpush3.bf16.msra.mxu0 %v6109_v28 }
 0x947   :  { %6112 = vmatprep.subr.bf16.mxu0 %v6111_v10 }
 0x94a   :  { %6114 = vmatpush3.bf16.msra.mxu0 %v6113_v53 }
 0x94b   :  { %6116 = vmatprep.subr.bf16.mxu0 %v6115_v13 }
 0x94e   :  { %6118 = vmatpush3.bf16.msra.mxu0 %v6117_v23 }
 0x94f   :  { %6120 = vmatprep.subr.bf16.mxu0 %v6119_v30 }
 0x952   :  { %6122 = vmatpush3.bf16.msra.mxu0 %v6121_v0 }
 0x9c8   :  { %v3451_v22 = vpop.f32.mrb[32].mxu0  ;;  %v3522_v3 = vpop.f32.mrb[40].mxu1 }
 0x9c9   :  { %v3679_v17 = vrot.slane %v3522_v3, 2  ;;  %v3453_v19 = vpop.f32.mrb[33].mxu0  ;;  %v3524_v54 = vpop.f32.mrb[41].mxu1  ;;  %v3677_v34 = vrot.slane %v3451_v22, 2 }
 0x9ca   :  { %v3680_v51 = vrot.slane %v3524_v54, 2  ;;  %v3678_v8 = vrot.slane %v3453_v19, 2 }
 0x9cb   :  { %v3695_v6 = vadd.f32 %v3679_v17, %v3374_v2  ;;  %v3693_v49 = vadd.f32 %v3677_v34, %v3372_v52 }
 0x9cc   :  { %v3696_v55 = vadd.f32 %v3680_v51, %v3375_v48  ;;  %v3694_v21 = vadd.f32 %v3678_v8, %v3373_v50  ;;  %v3760_v48 = vld [vmem:[#allocation3] sm:$0xff] }
 0x9cd   :  { %v3944_v29 = vmul.f32 -1.442695, %v3695_v6  ;;  %v3942_v7 = vmul.f32 -1.442695, %v3693_v49 }
 0x9ce   :  { %v3945_v57 = vmul.f32 -1.442695, %v3696_v55  ;;  %v3943_v44 = vmul.f32 -1.442695, %v3694_v21  ;;  %v3763_v55 = vld [vmem:[#allocation3 + $0x18] sm:$0xff] }
 0x9cf   :  { %6349 = vpow2.f32 %v3944_v29 }
 0x9d0   :  { %6351 = vpow2.f32 %v3945_v57 }
 0x9d9   :  { %v6350_v35 = vpop.eup %6349 }
 0x9da   :  { %v3719_v47 = vadd.f32 1.0, %v6350_v35  ;;  %v6352_v27 = vpop.eup %6351  ;;  %v3948_v35 = vld [vmem:[%s8896_s5] ss:$0 sm:$0xff] }
 0x9db   :  { %v3720_v37 = vadd.f32 1.0, %v6352_v27 }
 0x9dc   :  { %6353 = vrcp.f32 %v3719_v47 }
 0x9dd   :  { %6355 = vrcp.f32 %v3720_v37 }
 0x9de   :  { %6357 = vpow2.f32 %v3942_v7 }
 0x9df   :  { %6359 = vpow2.f32 %v3943_v44 }
 0x9e6   :  { %v6354_v18 = vpop.eup %6353 }
 0x9e7   :  { %v3745_v62 = vmul.f32 %v6354_v18, %v3741_v16  ;;  %v6356_v41 = vpop.eup %6355 }
 0x9e8   :  { %v3746_v31 = vmul.f32 %v6356_v41, %v3742_v56  ;;  %v6358_v20 = vpop.eup %6357 }
 0x9e9   :  { %v6360_v61 = vpop.eup %6359  ;;  %v3707_v24 = vadd.f32 1.0, %v6358_v20 }
 0x9ea   :  { %v3708_v42 = vadd.f32 1.0, %v6360_v61 }
 0x9eb   :  { %6361 = vrcp.f32 %v3707_v24 }
 0x9ec   :  { %6363 = vrcp.f32 %v3708_v42 }
 0x9f5   :  { %v6362_v33 = vpop.eup %6361 }
 0x9f6   :  { %v6364_v14 = vpop.eup %6363 }
 0xa08   :  { %v3593_v5 = vpop.f32.mrb[34].mxu0  ;;  %v3664_v59 = vpop.f32.mrb[42].mxu1 }
 0xa09   :  { %v3681_v60 = vrot.slane %v3593_v5, 2  ;;  %v3683_v46 = vrot.slane %v3664_v59, 2  ;;  %v3595_v32 = vpop.f32.mrb[35].mxu0  ;;  %v3666_v1 = vpop.f32.mrb[43].mxu1 }
 0xa0a   :  { %v3682_v58 = vrot.slane %v3595_v32, 2  ;;  %v3684_v63 = vrot.slane %v3666_v1, 2 }
 0xa0b   :  { %v3697_v12 = vadd.f32 %v3681_v60, %v3376_v38  ;;  %v3699_v28 = vadd.f32 %v3683_v46, %v3378_v4 }
 0xa0c   :  { %v3698_v10 = vadd.f32 %v3682_v58, %v3377_v15  ;;  %v3700_v43 = vadd.f32 %v3684_v63, %v3379_v45 }
 0xa0d   :  { %6365 = vtanh.f32 %v3697_v12  ;;  %v3946_v39 = vmul.f32 -1.442695, %v3699_v28 }
 0xa0e   :  { %6367 = vtanh.f32 %v3698_v10  ;;  %v3947_v53 = vmul.f32 -1.442695, %v3700_v43 }
 0xa0f   :  { %6369 = vpow2.f32 %v3946_v39 }
 0xa10   :  { %6371 = vpow2.f32 %v3947_v53 }
 0xa17   :  { %v6366_v13 = vpop.eup %6365 }
 0xa18   :  { %v6368_v9 = vpop.eup %6367  ;;  %v3747_v36 = vmul.f32 %v6366_v13, %v6362_v33 }
 0xa19   :  { %v6370_v23 = vpop.eup %6369  ;;  %v3748_v40 = vmul.f32 %v6368_v9, %v6364_v14 }
 0xa1a   :  { %v6372_v26 = vpop.eup %6371  ;;  %v3749_v11 = vadd.f32 %v3747_v36, %v3745_v62  ;;  %v3733_v30 = vadd.f32 1.0, %v6370_v23 }
 0xa1b   :  { %v3750_v25 = vadd.f32 %v3748_v40, %v3746_v31  ;;  %v3734_v0 = vadd.f32 1.0, %v6372_v26 }
 0xa1c   :  { %6373 = vtanh.f32 %v3749_v11 }
 0xa1d   :  { %6375 = vrcp.f32 %v3733_v30 }
 0xa1e   :  { %6377 = vtanh.f32 %v3750_v25 }
 0xa1f   :  { %6379 = vrcp.f32 %v3734_v0 }
 0xa26   :  { %v6374_v22 = vpop.eup %6373 }
 0xa27   :  { %v6376_v3 = vpop.eup %6375 }
 0xa28   :  { %v6378_v17 = vpop.eup %6377  ;;  %v3753_v19 = vmul.f32 %v6376_v3, %v6374_v22 }
 0xa29   :  { %v6380_v54 = vpop.eup %6379 }
 0xa2a   :  { %3755 = vst [vmem:[#allocation3 + $0x10] sm:$0xc0] %v3753_v19  ;;  %v3754_v2 = vmul.f32 %v6380_v54, %v6378_v17 }
 0xa2c   :  { %v3757_v51 = vrot.slane %v3754_v2, 6 }
 0xa2e   :  { %3759 = vst [vmem:[#allocation3 + $0x8] sm:$0x3] %v3757_v51 }
 0xa31   :  { %v3762_v29 = vld [vmem:[#allocation3 + $0x10] sm:$0xff] }
 0xa35   :  { %v3761_v6 = vld [vmem:[#allocation3 + $0x8] sm:$0xff] }
 0xa36   :  { %3867 = vmatprep.mubr.f32.mxu0 %v3761_v6 }
 0xa37   :  { %3868 = vmatmul.mubr.f32.vlgmr.msra.gmra.mrb[36].mxu0 %v3760_v48 }
 0xa38   :  { %3872 = vmatprep.mubr.f32.mxu0 %v3763_v55 }
 0xa3b   :  { %3873 = vmatmul.mubr.f32.gmra.mrb[38].mxu0 %v3762_v29 }
 0xb0a   :  { %v3981_v57 = vpop.f32.mrb[36].mxu0 }
 0xb0b   :  { %v3982_v47 = vpop.f32.mrb[37].mxu0 }
 0xb0c   :  { %v3983_v27 = vadd.f32 %v3982_v47, %v3981_v57 }
 0xb0e   :  { %v3870_v37 = vadd.f32 %v3983_v27, %v3948_v35  ;;  %v3984_v16 = vpop.f32.mrb[38].mxu0 }
 0xb0f   :  { %v3985_v18 = vpop.f32.mrb[39].mxu0 }
 0xb10   :  { %3878 = vst [vmem:[%s8897_s6] sm:$0xff] %v3870_v37  ;;  %v3986_v56 = vadd.f32 %v3985_v18, %v3984_v16 }
 0xb12   :  { %v3875_v62 = vadd.f32 %v3986_v56, %v3948_v35 }
 0xb14   :  { %3879 = vst [vmem:[%s8897_s6 + $0x8] sm:$0xff] %v3875_v62 }

</bundles_post_ra>
